<compile_context>
chip_gen: v5e
topology: v5e:2x2
jax: 0.10.0
libtpu: 0.0.40
codegen_flags: <defaults>
</compile_context>

<pallas_src>
import functools

import numpy as np

import jax
import jax.numpy as jnp
from jax.experimental import pallas as pl
from jax.experimental.pallas import tpu as pltpu


# (in_channels, out_channels, kernel_size, stride, padding) per layer
_LAYER_SPECS = (
    (512, 128, 3, 1, 1),   # upconv1
    (128, 128, 4, 2, 1),   # upconv2
    (128, 64, 3, 1, 1),    # upconv3
    (64, 16, 4, 2, 0),     # upconv4
    (16, 1, 3, 1, 0),      # upconv5
)

_LANES = 128                      # fixed lane width of the packed activations
_MATMUL_DTYPE = jnp.bfloat16      # MXU operand dtype (f32 accumulation)


def _out_len(l_in, k, s, p):
    return (l_in - 1) * s - 2 * p + k


def _placement_matrix(l_in, l_out, k_sz, stride, padding, n_batch):
    """(K*_LANES, _LANES) 0/1 matrix: row k*_LANES + n*l_in + i scatters tap k
    of (batch n, input position i) to output lane n*l_out + (i*stride-p+k).
    Rows for padding lanes are zero, so garbage in pad lanes never propagates."""
    g = np.zeros((k_sz * _LANES, _LANES), np.float32)
    for k in range(k_sz):
        for n in range(n_batch):
            for i in range(l_in):
                j = i * stride - padding + k
                if 0 <= j < l_out:
                    g[k * _LANES + n * l_in + i, n * l_out + j] = 1.0
    return g


def _fused_decoder_kernel(x_ref, *refs, layer_specs):
    """All 5 transposed-conv layers + 4 fused SiLUs; intermediates never leave
    VMEM/vregs.  Activations are (C, 128): channels on sublanes, packed
    (batch x length, zero-padded) on lanes."""
    n = len(layer_specs)
    w_refs = refs[:n]
    g_refs = refs[n:2 * n]
    b_refs = refs[2 * n:3 * n]
    o_ref = refs[3 * n]

    a = x_ref[...]                                       # (512, 128) f32
    for idx, (_, cout, k_sz, _, _) in enumerate(layer_specs):
        w = w_refs[idx][...]                             # (K*Cout, Cin) bf16
        g = g_refs[idx][...]                             # (K*128, 128) bf16
        b = b_refs[idx][...]                             # (Cout, 1)     f32

        # Channel contraction for all K taps in one MXU matmul.
        z = jnp.dot(w, a.astype(w.dtype),
                    preferred_element_type=jnp.float32)  # (K*Cout, 128)

        # Lay the K tap slices side by side along lanes (128-aligned chunks),
        # then place all taps with ONE matmul against the constant 0/1 matrix.
        z_wide = jnp.concatenate(
            [z[k * cout:(k + 1) * cout, :] for k in range(k_sz)],
            axis=1)                                      # (Cout, K*128)
        a = jnp.dot(z_wide.astype(g.dtype), g,
                    preferred_element_type=jnp.float32) + b   # (Cout, 128) f32

        if idx < n - 1:                                  # SiLU on layers 1..4
            a = a * jax.nn.sigmoid(a)                    # f32 VPU/EUP

    o_ref[...] = a.astype(o_ref.dtype)                   # (1, 128) lane-dense


def init_params(key):
    """Deterministic init matching PyTorch ConvTranspose1d parameter shapes."""
    params = []
    for i, (cin, cout, k, _, _) in enumerate(_LAYER_SPECS):
        kw, kb = jax.random.split(jax.random.fold_in(key, i))
        scale = 1.0 / jnp.sqrt(float(cin * k))
        w = jax.random.uniform(kw, (cin, cout, k), jnp.float32, -scale, scale)
        b = jax.random.uniform(kb, (cout,), jnp.float32, -scale, scale)
        params.append((w, b))
    return params


@jax.jit
def unet_decoder_forward(x_ncl, params):
    """x_ncl: (N, 512, L) float32 (PyTorch NCL). Returns (N, 1, L_out) NCL."""
    # Dropout1d(p=0) is the identity; the torch.tensor(... requires_grad) line
    # in the reference forward is just a dtype cast -> both fold away.
    x = x_ncl.astype(jnp.float32)
    N, c_in, L = x.shape
    assert c_in == _LAYER_SPECS[0][0]

    # Pack batch along lanes: (N, C, L) -> (C, N*L), pad lanes to 128.
    assert N * L <= _LANES, "TODO(synk): add a batch/length-block grid"
    x_packed = jnp.transpose(x, (1, 0, 2)).reshape(c_in, N * L)
    x_packed = jnp.pad(x_packed, ((0, 0), (0, _LANES - N * L)))

    w_list, g_list, b_list = [], [], []
    flops = 0
    trans = 0
    l = L
    for idx, ((w, b), (cin, cout, k, s, p)) in enumerate(
            zip(params, _LAYER_SPECS)):
        l_out = _out_len(l, k, s, p)
        assert N * l_out <= _LANES, "TODO(synk): add a batch/length-block grid"
        # (Cin, Cout, K) -> (K*Cout, Cin); row k*Cout+co holds weight[:, co, k].
        w_list.append(jnp.transpose(w, (2, 1, 0))
                      .reshape(k * cout, cin).astype(_MATMUL_DTYPE))
        # Placement matrices hoisted to the wrapper (exact 0/1 in bf16).
        g_list.append(jnp.asarray(_placement_matrix(l, l_out, k, s, p, N),
                                  dtype=_MATMUL_DTYPE))
        # (Cout, 1) broadcasts along lanes; kept f32 (cheap VPU add).
        b_list.append(b.reshape(cout, 1).astype(jnp.float32))
        flops += 2 * (k * cout) * cin * _LANES + 2 * cout * (k * _LANES) * _LANES
        if idx < len(_LAYER_SPECS) - 1:
            trans += cout * _LANES                     # sigmoid in fused SiLU
        l = l_out
    l_final = l

    in_specs = [pl.BlockSpec((c_in, _LANES), lambda i: (0, 0))]
    in_specs += [pl.BlockSpec(w.shape, lambda i: (0, 0)) for w in w_list]
    in_specs += [pl.BlockSpec(g.shape, lambda i: (0, 0)) for g in g_list]
    in_specs += [pl.BlockSpec(b.shape, lambda i: (0, 0)) for b in b_list]

    bytes_accessed = int(
        x_packed.size * 4
        + sum(w.size * 2 for w in w_list)
        + sum(g.size * 2 for g in g_list)
        + sum(b.size * 4 for b in b_list)
        + _LANES * 4)

    kern = functools.partial(_fused_decoder_kernel, layer_specs=_LAYER_SPECS)
    out = pl.pallas_call(
        kern,
        out_shape=jax.ShapeDtypeStruct((1, _LANES), jnp.float32),
        grid=(1,),                       # whole (packed) batch in one step
        in_specs=in_specs,
        out_specs=pl.BlockSpec((1, _LANES), lambda i: (0, 0)),
        compiler_params=pltpu.CompilerParams(
            dimension_semantics=("arbitrary",)),
        cost_estimate=pl.CostEstimate(
            flops=int(flops),
            transcendentals=int(trans),
            bytes_accessed=bytes_accessed),
    )(x_packed, *w_list, *g_list, *b_list)

    # Un-pack lanes: (1, 128) -> valid (1, N*l_final) -> (N, 1, l_final).
    return out[:, :N * l_final].reshape(N, l_final)[:, None, :]


# ----------------------- pure-JAX reference (for a self-check) --------------
def _ref_layer(x, w, b, s, p):
    N, cin, L = x.shape
    cout, K = w.shape[1], w.shape[2]
    l_out = _out_len(L, K, s, p)
    m = np.zeros((L, K, l_out), np.float32)
    for i in range(L):
        for k in range(K):
            j = i * s - p + k
            if 0 <= j < l_out:
                m[i, k, j] = 1.0
    y = jnp.einsum('nci,cok,ikj->noj', x, w, jnp.asarray(m),
                   precision=jax.lax.Precision.HIGHEST)
    return y + b[None, :, None]


def _ref_forward(x, params):
    a = x.astype(jnp.float32)
    n_layers = len(_LAYER_SPECS)
    for idx, ((w, b), (_, _, _, s, p)) in enumerate(zip(params, _LAYER_SPECS)):
        a = _ref_layer(a, w, b, s, p)
        if idx < n_layers - 1:
            a = a * jax.nn.sigmoid(a)
    return a


if __name__ == "__main__":
    key = jax.random.PRNGKey(0)
    k_x, k_p = jax.random.split(key)

    N, C_IN, L = 2, 512, 8          # small seq; channel sizes fixed by module
    x = jax.random.normal(k_x, (N, C_IN, L), dtype=jnp.float32)
    params = init_params(k_p)

    out = unet_decoder_forward(x, params)
    jax.block_until_ready(out)

    # L = 8 -> 8 -> 16 -> 16 -> 34 -> 36 ; channels -> 1
    assert out.shape == (N, 1, 36), out.shape

    ref = _ref_forward(x, params)
    max_err = float(jnp.max(jnp.abs(out - ref)))
    assert jnp.allclose(out, ref, atol=2e-2, rtol=2e-2), max_err

    print("KERNEL_OK")
</pallas_src>

<mosaic_0001>
module attributes {stable_mosaic.version = 11 : i64} {
  func.func @_fused_decoder_kernel(%arg0: i32, %arg1: memref<512x128xf32, #tpu.memory_space<vmem>>, %arg2: memref<384x512xbf16, #tpu.memory_space<vmem>>, %arg3: memref<512x128xbf16, #tpu.memory_space<vmem>>, %arg4: memref<192x128xbf16, #tpu.memory_space<vmem>>, %arg5: memref<64x64xbf16, #tpu.memory_space<vmem>>, %arg6: memref<3x16xbf16, #tpu.memory_space<vmem>>, %arg7: memref<384x128xbf16, #tpu.memory_space<vmem>>, %arg8: memref<512x128xbf16, #tpu.memory_space<vmem>>, %arg9: memref<384x128xbf16, #tpu.memory_space<vmem>>, %arg10: memref<512x128xbf16, #tpu.memory_space<vmem>>, %arg11: memref<384x128xbf16, #tpu.memory_space<vmem>>, %arg12: memref<128x1xf32, #tpu.memory_space<vmem>>, %arg13: memref<128x1xf32, #tpu.memory_space<vmem>>, %arg14: memref<64x1xf32, #tpu.memory_space<vmem>>, %arg15: memref<16x1xf32, #tpu.memory_space<vmem>>, %arg16: memref<1x1xf32, #tpu.memory_space<vmem>>, %arg17: memref<1x128xf32, #tpu.memory_space<vmem>>) attributes {dimension_semantics = [#tpu.dimension_semantics<arbitrary>], iteration_bounds = array<i64: 1>, scalar_prefetch = 0 : i64, scratch_operands = 0 : i64, tpu.core_type = #tpu.core_type<tc>, window_params = [{pipeline_mode = #tpu.pipeline_mode<synchronous>, transform_indices = @transform_0, window_bounds = array<i64: 512, 128>}, {pipeline_mode = #tpu.pipeline_mode<synchronous>, transform_indices = @transform_1, window_bounds = array<i64: 384, 512>}, {pipeline_mode = #tpu.pipeline_mode<synchronous>, transform_indices = @transform_2, window_bounds = array<i64: 512, 128>}, {pipeline_mode = #tpu.pipeline_mode<synchronous>, transform_indices = @transform_3, window_bounds = array<i64: 192, 128>}, {pipeline_mode = #tpu.pipeline_mode<synchronous>, transform_indices = @transform_4, window_bounds = array<i64: 64, 64>}, {pipeline_mode = #tpu.pipeline_mode<synchronous>, transform_indices = @transform_5, window_bounds = array<i64: 3, 16>}, {pipeline_mode = #tpu.pipeline_mode<synchronous>, transform_indices = @transform_6, window_bounds = array<i64: 384, 128>}, {pipeline_mode = #tpu.pipeline_mode<synchronous>, transform_indices = @transform_7, window_bounds = array<i64: 512, 128>}, {pipeline_mode = #tpu.pipeline_mode<synchronous>, transform_indices = @transform_8, window_bounds = array<i64: 384, 128>}, {pipeline_mode = #tpu.pipeline_mode<synchronous>, transform_indices = @transform_9, window_bounds = array<i64: 512, 128>}, {pipeline_mode = #tpu.pipeline_mode<synchronous>, transform_indices = @transform_10, window_bounds = array<i64: 384, 128>}, {pipeline_mode = #tpu.pipeline_mode<synchronous>, transform_indices = @transform_11, window_bounds = array<i64: 128, 1>}, {pipeline_mode = #tpu.pipeline_mode<synchronous>, transform_indices = @transform_12, window_bounds = array<i64: 128, 1>}, {pipeline_mode = #tpu.pipeline_mode<synchronous>, transform_indices = @transform_13, window_bounds = array<i64: 64, 1>}, {pipeline_mode = #tpu.pipeline_mode<synchronous>, transform_indices = @transform_14, window_bounds = array<i64: 16, 1>}, {pipeline_mode = #tpu.pipeline_mode<synchronous>, transform_indices = @transform_15, window_bounds = array<i64: 1, 1>}, {pipeline_mode = #tpu.pipeline_mode<synchronous>, transform_indices = @transform_16, window_bounds = array<i64: 1, 128>}]} {
    %c0 = arith.constant 0 : index
    %c0_0 = arith.constant 0 : index
    %0 = vector.load %arg1[%c0, %c0_0] : memref<512x128xf32, #tpu.memory_space<vmem>>, vector<512x128xf32>
    %c0_1 = arith.constant 0 : index
    %c0_2 = arith.constant 0 : index
    %1 = vector.load %arg2[%c0_1, %c0_2] : memref<384x512xbf16, #tpu.memory_space<vmem>>, vector<384x512xbf16>
    %c0_3 = arith.constant 0 : index
    %c0_4 = arith.constant 0 : index
    %2 = vector.load %arg7[%c0_3, %c0_4] : memref<384x128xbf16, #tpu.memory_space<vmem>>, vector<384x128xbf16>
    %c0_5 = arith.constant 0 : index
    %c0_6 = arith.constant 0 : index
    %3 = vector.load %arg12[%c0_5, %c0_6] : memref<128x1xf32, #tpu.memory_space<vmem>>, vector<128x1xf32>
    %4 = arith.truncf %0 : vector<512x128xf32> to vector<512x128xbf16>
    %cst = arith.constant dense<0.000000e+00> : vector<384x128xf32>
    %5 = tpu.matmul %1, %4, %cst {dimension_numbers = #tpu.dot_dimension_numbers<[1], [0], [0], [1], [0, 0, 1, 1], [], []>} : vector<384x512xbf16>, vector<512x128xbf16>, vector<384x128xf32> -> vector<384x128xf32>
    %6 = vector.extract_strided_slice %5 {offsets = [0, 0], sizes = [128, 128], strides = [1, 1]} : vector<384x128xf32> to vector<128x128xf32>
    %7 = vector.extract_strided_slice %5 {offsets = [128, 0], sizes = [128, 128], strides = [1, 1]} : vector<384x128xf32> to vector<128x128xf32>
    %8 = vector.extract_strided_slice %5 {offsets = [256, 0], sizes = [128, 128], strides = [1, 1]} : vector<384x128xf32> to vector<128x128xf32>
    %9 = tpu.concatenate %6, %7, %8 in 1 : vector<128x128xf32>, vector<128x128xf32>, vector<128x128xf32> -> vector<128x384xf32>
    %10 = arith.truncf %9 : vector<128x384xf32> to vector<128x384xbf16>
    %cst_7 = arith.constant dense<0.000000e+00> : vector<128x128xf32>
    %11 = tpu.matmul %10, %2, %cst_7 {dimension_numbers = #tpu.dot_dimension_numbers<[1], [0], [0], [1], [0, 0, 1, 1], [], []>} : vector<128x384xbf16>, vector<384x128xbf16>, vector<128x128xf32> -> vector<128x128xf32>
    %12 = vector.broadcast %3 : vector<128x1xf32> to vector<128x128xf32>
    %13 = arith.addf %11, %12 : vector<128x128xf32>
    %14 = arith.negf %13 : vector<128x128xf32>
    %15 = math.exp %14 : vector<128x128xf32>
    %cst_8 = arith.constant 1.000000e+00 : f32
    %16 = vector.broadcast %cst_8 : f32 to vector<128x128xf32>
    %17 = arith.addf %16, %15 : vector<128x128xf32>
    %18 = arith.divf %16, %17 : vector<128x128xf32>
    %19 = arith.mulf %13, %18 : vector<128x128xf32>
    %c0_9 = arith.constant 0 : index
    %c0_10 = arith.constant 0 : index
    %20 = vector.load %arg3[%c0_9, %c0_10] : memref<512x128xbf16, #tpu.memory_space<vmem>>, vector<512x128xbf16>
    %c0_11 = arith.constant 0 : index
    %c0_12 = arith.constant 0 : index
    %21 = vector.load %arg8[%c0_11, %c0_12] : memref<512x128xbf16, #tpu.memory_space<vmem>>, vector<512x128xbf16>
    %c0_13 = arith.constant 0 : index
    %c0_14 = arith.constant 0 : index
    %22 = vector.load %arg13[%c0_13, %c0_14] : memref<128x1xf32, #tpu.memory_space<vmem>>, vector<128x1xf32>
    %23 = arith.truncf %19 : vector<128x128xf32> to vector<128x128xbf16>
    %cst_15 = arith.constant dense<0.000000e+00> : vector<512x128xf32>
    %24 = tpu.matmul %20, %23, %cst_15 {dimension_numbers = #tpu.dot_dimension_numbers<[1], [0], [0], [1], [0, 0, 1, 1], [], []>} : vector<512x128xbf16>, vector<128x128xbf16>, vector<512x128xf32> -> vector<512x128xf32>
    %25 = vector.extract_strided_slice %24 {offsets = [0, 0], sizes = [128, 128], strides = [1, 1]} : vector<512x128xf32> to vector<128x128xf32>
    %26 = vector.extract_strided_slice %24 {offsets = [128, 0], sizes = [128, 128], strides = [1, 1]} : vector<512x128xf32> to vector<128x128xf32>
    %27 = vector.extract_strided_slice %24 {offsets = [256, 0], sizes = [128, 128], strides = [1, 1]} : vector<512x128xf32> to vector<128x128xf32>
    %28 = vector.extract_strided_slice %24 {offsets = [384, 0], sizes = [128, 128], strides = [1, 1]} : vector<512x128xf32> to vector<128x128xf32>
    %29 = tpu.concatenate %25, %26, %27, %28 in 1 : vector<128x128xf32>, vector<128x128xf32>, vector<128x128xf32>, vector<128x128xf32> -> vector<128x512xf32>
    %30 = arith.truncf %29 : vector<128x512xf32> to vector<128x512xbf16>
    %cst_16 = arith.constant dense<0.000000e+00> : vector<128x128xf32>
    %31 = tpu.matmul %30, %21, %cst_16 {dimension_numbers = #tpu.dot_dimension_numbers<[1], [0], [0], [1], [0, 0, 1, 1], [], []>} : vector<128x512xbf16>, vector<512x128xbf16>, vector<128x128xf32> -> vector<128x128xf32>
    %32 = vector.broadcast %22 : vector<128x1xf32> to vector<128x128xf32>
    %33 = arith.addf %31, %32 : vector<128x128xf32>
    %34 = arith.negf %33 : vector<128x128xf32>
    %35 = math.exp %34 : vector<128x128xf32>
    %cst_17 = arith.constant 1.000000e+00 : f32
    %36 = vector.broadcast %cst_17 : f32 to vector<128x128xf32>
    %37 = arith.addf %36, %35 : vector<128x128xf32>
    %38 = arith.divf %36, %37 : vector<128x128xf32>
    %39 = arith.mulf %33, %38 : vector<128x128xf32>
    %c0_18 = arith.constant 0 : index
    %c0_19 = arith.constant 0 : index
    %40 = vector.load %arg4[%c0_18, %c0_19] : memref<192x128xbf16, #tpu.memory_space<vmem>>, vector<192x128xbf16>
    %c0_20 = arith.constant 0 : index
    %c0_21 = arith.constant 0 : index
    %41 = vector.load %arg9[%c0_20, %c0_21] : memref<384x128xbf16, #tpu.memory_space<vmem>>, vector<384x128xbf16>
    %c0_22 = arith.constant 0 : index
    %c0_23 = arith.constant 0 : index
    %42 = vector.load %arg14[%c0_22, %c0_23] : memref<64x1xf32, #tpu.memory_space<vmem>>, vector<64x1xf32>
    %43 = arith.truncf %39 : vector<128x128xf32> to vector<128x128xbf16>
    %cst_24 = arith.constant dense<0.000000e+00> : vector<192x128xf32>
    %44 = tpu.matmul %40, %43, %cst_24 {dimension_numbers = #tpu.dot_dimension_numbers<[1], [0], [0], [1], [0, 0, 1, 1], [], []>} : vector<192x128xbf16>, vector<128x128xbf16>, vector<192x128xf32> -> vector<192x128xf32>
    %45 = vector.extract_strided_slice %44 {offsets = [0, 0], sizes = [64, 128], strides = [1, 1]} : vector<192x128xf32> to vector<64x128xf32>
    %46 = vector.extract_strided_slice %44 {offsets = [64, 0], sizes = [64, 128], strides = [1, 1]} : vector<192x128xf32> to vector<64x128xf32>
    %47 = vector.extract_strided_slice %44 {offsets = [128, 0], sizes = [64, 128], strides = [1, 1]} : vector<192x128xf32> to vector<64x128xf32>
    %48 = tpu.concatenate %45, %46, %47 in 1 : vector<64x128xf32>, vector<64x128xf32>, vector<64x128xf32> -> vector<64x384xf32>
    %49 = arith.truncf %48 : vector<64x384xf32> to vector<64x384xbf16>
    %cst_25 = arith.constant dense<0.000000e+00> : vector<64x128xf32>
    %50 = tpu.matmul %49, %41, %cst_25 {dimension_numbers = #tpu.dot_dimension_numbers<[1], [0], [0], [1], [0, 0, 1, 1], [], []>} : vector<64x384xbf16>, vector<384x128xbf16>, vector<64x128xf32> -> vector<64x128xf32>
    %51 = vector.broadcast %42 : vector<64x1xf32> to vector<64x128xf32>
    %52 = arith.addf %50, %51 : vector<64x128xf32>
    %53 = arith.negf %52 : vector<64x128xf32>
    %54 = math.exp %53 : vector<64x128xf32>
    %cst_26 = arith.constant 1.000000e+00 : f32
    %55 = vector.broadcast %cst_26 : f32 to vector<64x128xf32>
    %56 = arith.addf %55, %54 : vector<64x128xf32>
    %57 = arith.divf %55, %56 : vector<64x128xf32>
    %58 = arith.mulf %52, %57 : vector<64x128xf32>
    %c0_27 = arith.constant 0 : index
    %c0_28 = arith.constant 0 : index
    %59 = vector.load %arg5[%c0_27, %c0_28] : memref<64x64xbf16, #tpu.memory_space<vmem>>, vector<64x64xbf16>
    %c0_29 = arith.constant 0 : index
    %c0_30 = arith.constant 0 : index
    %60 = vector.load %arg10[%c0_29, %c0_30] : memref<512x128xbf16, #tpu.memory_space<vmem>>, vector<512x128xbf16>
    %c0_31 = arith.constant 0 : index
    %c0_32 = arith.constant 0 : index
    %61 = vector.load %arg15[%c0_31, %c0_32] : memref<16x1xf32, #tpu.memory_space<vmem>>, vector<16x1xf32>
    %62 = arith.truncf %58 : vector<64x128xf32> to vector<64x128xbf16>
    %cst_33 = arith.constant dense<0.000000e+00> : vector<64x128xf32>
    %63 = tpu.matmul %59, %62, %cst_33 {dimension_numbers = #tpu.dot_dimension_numbers<[1], [0], [0], [1], [0, 0, 1, 1], [], []>} : vector<64x64xbf16>, vector<64x128xbf16>, vector<64x128xf32> -> vector<64x128xf32>
    %64 = vector.extract_strided_slice %63 {offsets = [0, 0], sizes = [16, 128], strides = [1, 1]} : vector<64x128xf32> to vector<16x128xf32>
    %65 = vector.extract_strided_slice %63 {offsets = [16, 0], sizes = [16, 128], strides = [1, 1]} : vector<64x128xf32> to vector<16x128xf32>
    %66 = vector.extract_strided_slice %63 {offsets = [32, 0], sizes = [16, 128], strides = [1, 1]} : vector<64x128xf32> to vector<16x128xf32>
    %67 = vector.extract_strided_slice %63 {offsets = [48, 0], sizes = [16, 128], strides = [1, 1]} : vector<64x128xf32> to vector<16x128xf32>
    %68 = tpu.concatenate %64, %65, %66, %67 in 1 : vector<16x128xf32>, vector<16x128xf32>, vector<16x128xf32>, vector<16x128xf32> -> vector<16x512xf32>
    %69 = arith.truncf %68 : vector<16x512xf32> to vector<16x512xbf16>
    %cst_34 = arith.constant dense<0.000000e+00> : vector<16x128xf32>
    %70 = tpu.matmul %69, %60, %cst_34 {dimension_numbers = #tpu.dot_dimension_numbers<[1], [0], [0], [1], [0, 0, 1, 1], [], []>} : vector<16x512xbf16>, vector<512x128xbf16>, vector<16x128xf32> -> vector<16x128xf32>
    %71 = vector.broadcast %61 : vector<16x1xf32> to vector<16x128xf32>
    %72 = arith.addf %70, %71 : vector<16x128xf32>
    %73 = arith.negf %72 : vector<16x128xf32>
    %74 = math.exp %73 : vector<16x128xf32>
    %cst_35 = arith.constant 1.000000e+00 : f32
    %75 = vector.broadcast %cst_35 : f32 to vector<16x128xf32>
    %76 = arith.addf %75, %74 : vector<16x128xf32>
    %77 = arith.divf %75, %76 : vector<16x128xf32>
    %78 = arith.mulf %72, %77 : vector<16x128xf32>
    %c0_36 = arith.constant 0 : index
    %c0_37 = arith.constant 0 : index
    %79 = vector.load %arg6[%c0_36, %c0_37] : memref<3x16xbf16, #tpu.memory_space<vmem>>, vector<3x16xbf16>
    %c0_38 = arith.constant 0 : index
    %c0_39 = arith.constant 0 : index
    %80 = vector.load %arg11[%c0_38, %c0_39] : memref<384x128xbf16, #tpu.memory_space<vmem>>, vector<384x128xbf16>
    %c0_40 = arith.constant 0 : index
    %c0_41 = arith.constant 0 : index
    %81 = vector.load %arg16[%c0_40, %c0_41] : memref<1x1xf32, #tpu.memory_space<vmem>>, vector<1x1xf32>
    %82 = arith.truncf %78 : vector<16x128xf32> to vector<16x128xbf16>
    %cst_42 = arith.constant dense<0.000000e+00> : vector<3x128xf32>
    %83 = tpu.matmul %79, %82, %cst_42 {dimension_numbers = #tpu.dot_dimension_numbers<[1], [0], [0], [1], [0, 0, 1, 1], [], []>} : vector<3x16xbf16>, vector<16x128xbf16>, vector<3x128xf32> -> vector<3x128xf32>
    %84 = vector.extract_strided_slice %83 {offsets = [0, 0], sizes = [1, 128], strides = [1, 1]} : vector<3x128xf32> to vector<1x128xf32>
    %85 = vector.extract_strided_slice %83 {offsets = [1, 0], sizes = [1, 128], strides = [1, 1]} : vector<3x128xf32> to vector<1x128xf32>
    %86 = vector.extract_strided_slice %83 {offsets = [2, 0], sizes = [1, 128], strides = [1, 1]} : vector<3x128xf32> to vector<1x128xf32>
    %87 = tpu.concatenate %84, %85, %86 in 1 : vector<1x128xf32>, vector<1x128xf32>, vector<1x128xf32> -> vector<1x384xf32>
    %88 = arith.truncf %87 : vector<1x384xf32> to vector<1x384xbf16>
    %cst_43 = arith.constant dense<0.000000e+00> : vector<1x128xf32>
    %89 = tpu.matmul %88, %80, %cst_43 {dimension_numbers = #tpu.dot_dimension_numbers<[1], [0], [0], [1], [0, 0, 1, 1], [], []>} : vector<1x384xbf16>, vector<384x128xbf16>, vector<1x128xf32> -> vector<1x128xf32>
    %90 = vector.broadcast %81 : vector<1x1xf32> to vector<1x128xf32>
    %91 = arith.addf %89, %90 : vector<1x128xf32>
    %c0_44 = arith.constant 0 : index
    %c0_45 = arith.constant 0 : index
    %92 = vector.load %arg17[%c0_44, %c0_45] : memref<1x128xf32, #tpu.memory_space<vmem>>, vector<1x128xf32>
    tpu.vector_store %arg17[%c0_44, %c0_45], %91 {strides = array<i32>} : memref<1x128xf32, #tpu.memory_space<vmem>>, vector<1x128xf32>,
    return
  }
  func.func @transform_0(%arg0: i32) -> (i32, i32) {
    %c0_i32 = arith.constant 0 : i32
    %c0_i32_0 = arith.constant 0 : i32
    %c0_i32_1 = arith.constant 0 : i32
    return %c0_i32, %c0_i32_0 : i32, i32
  }
  func.func @transform_1(%arg0: i32) -> (i32, i32) {
    %c0_i32 = arith.constant 0 : i32
    %c0_i32_0 = arith.constant 0 : i32
    %c0_i32_1 = arith.constant 0 : i32
    return %c0_i32, %c0_i32_0 : i32, i32
  }
  func.func @transform_2(%arg0: i32) -> (i32, i32) {
    %c0_i32 = arith.constant 0 : i32
    %c0_i32_0 = arith.constant 0 : i32
    %c0_i32_1 = arith.constant 0 : i32
    return %c0_i32, %c0_i32_0 : i32, i32
  }
  func.func @transform_3(%arg0: i32) -> (i32, i32) {
    %c0_i32 = arith.constant 0 : i32
    %c0_i32_0 = arith.constant 0 : i32
    %c0_i32_1 = arith.constant 0 : i32
    return %c0_i32, %c0_i32_0 : i32, i32
  }
  func.func @transform_4(%arg0: i32) -> (i32, i32) {
    %c0_i32 = arith.constant 0 : i32
    %c0_i32_0 = arith.constant 0 : i32
    %c0_i32_1 = arith.constant 0 : i32
    return %c0_i32, %c0_i32_0 : i32, i32
  }
  func.func @transform_5(%arg0: i32) -> (i32, i32) {
    %c0_i32 = arith.constant 0 : i32
    %c0_i32_0 = arith.constant 0 : i32
    %c0_i32_1 = arith.constant 0 : i32
    return %c0_i32, %c0_i32_0 : i32, i32
  }
  func.func @transform_6(%arg0: i32) -> (i32, i32) {
    %c0_i32 = arith.constant 0 : i32
    %c0_i32_0 = arith.constant 0 : i32
    %c0_i32_1 = arith.constant 0 : i32
    return %c0_i32, %c0_i32_0 : i32, i32
  }
  func.func @transform_7(%arg0: i32) -> (i32, i32) {
    %c0_i32 = arith.constant 0 : i32
    %c0_i32_0 = arith.constant 0 : i32
    %c0_i32_1 = arith.constant 0 : i32
    return %c0_i32, %c0_i32_0 : i32, i32
  }
  func.func @transform_8(%arg0: i32) -> (i32, i32) {
    %c0_i32 = arith.constant 0 : i32
    %c0_i32_0 = arith.constant 0 : i32
    %c0_i32_1 = arith.constant 0 : i32
    return %c0_i32, %c0_i32_0 : i32, i32
  }
  func.func @transform_9(%arg0: i32) -> (i32, i32) {
    %c0_i32 = arith.constant 0 : i32
    %c0_i32_0 = arith.constant 0 : i32
    %c0_i32_1 = arith.constant 0 : i32
    return %c0_i32, %c0_i32_0 : i32, i32
  }
  func.func @transform_10(%arg0: i32) -> (i32, i32) {
    %c0_i32 = arith.constant 0 : i32
    %c0_i32_0 = arith.constant 0 : i32
    %c0_i32_1 = arith.constant 0 : i32
    return %c0_i32, %c0_i32_0 : i32, i32
  }
  func.func @transform_11(%arg0: i32) -> (i32, i32) {
    %c0_i32 = arith.constant 0 : i32
    %c0_i32_0 = arith.constant 0 : i32
    %c0_i32_1 = arith.constant 0 : i32
    return %c0_i32, %c0_i32_0 : i32, i32
  }
  func.func @transform_12(%arg0: i32) -> (i32, i32) {
    %c0_i32 = arith.constant 0 : i32
    %c0_i32_0 = arith.constant 0 : i32
    %c0_i32_1 = arith.constant 0 : i32
    return %c0_i32, %c0_i32_0 : i32, i32
  }
  func.func @transform_13(%arg0: i32) -> (i32, i32) {
    %c0_i32 = arith.constant 0 : i32
    %c0_i32_0 = arith.constant 0 : i32
    %c0_i32_1 = arith.constant 0 : i32
    return %c0_i32, %c0_i32_0 : i32, i32
  }
  func.func @transform_14(%arg0: i32) -> (i32, i32) {
    %c0_i32 = arith.constant 0 : i32
    %c0_i32_0 = arith.constant 0 : i32
    %c0_i32_1 = arith.constant 0 : i32
    return %c0_i32, %c0_i32_0 : i32, i32
  }
  func.func @transform_15(%arg0: i32) -> (i32, i32) {
    %c0_i32 = arith.constant 0 : i32
    %c0_i32_0 = arith.constant 0 : i32
    %c0_i32_1 = arith.constant 0 : i32
    return %c0_i32, %c0_i32_0 : i32, i32
  }
  func.func @transform_16(%arg0: i32) -> (i32, i32) {
    %c0_i32 = arith.constant 0 : i32
    %c0_i32_0 = arith.constant 0 : i32
    %c0_i32_1 = arith.constant 0 : i32
    return %c0_i32, %c0_i32_0 : i32, i32
  }
}

</mosaic_0001>

<bundles_post_ra>
// kernel: unet_decoder_forward.1
= control target key start
LH: loop header
LB: loop body
LE: loop exit
PB: predicated region body
PF: predicated region fallthrough
CT: control target
= control target key end

     0   :  { %s9194_s0 = inlined_call_operand.vmem [shape: f32[512,128], index: 0, kind: input, shape index: {}]   ;;  %s9195_s1 = inlined_call_operand.vmem [shape: bf16[384,512], index: 1, kind: input, shape index: {}]   ;;  %s9196_s6 = inlined_call_operand.vmem [shape: bf16[384,128], index: 6, kind: input, shape index: {}]   ;;  %s9197_s11 = inlined_call_operand.vmem [shape: f32[128,1], index: 11, kind: input, shape index: {}]   ;;  %s9198_s12 = inlined_call_operand.vmem [shape: f32[128,1], index: 12, kind: input, shape index: {}]   ;;  %s9199_s13 = inlined_call_operand.vmem [shape: f32[64,1], index: 13, kind: input, shape index: {}]   ;;  %s9200_s15 = inlined_call_operand.<no memory space> [shape: f32[1,1], index: 15, kind: input, shape index: {}]   ;;  %s9201_s14 = inlined_call_operand.vmem [shape: f32[16,1], index: 14, kind: input, shape index: {}]   ;;  %s9202_s2 = inlined_call_operand.vmem [shape: bf16[512,128], index: 2, kind: input, shape index: {}]   ;;  %s9203_s7 = inlined_call_operand.vmem [shape: bf16[512,128], index: 7, kind: input, shape index: {}]   ;;  %s9204_s3 = inlined_call_operand.vmem [shape: bf16[192,128], index: 3, kind: input, shape index: {}]   ;;  %s9205_s8 = inlined_call_operand.vmem [shape: bf16[384,128], index: 8, kind: input, shape index: {}]   ;;  %s9206_s4 = inlined_call_operand.vmem [shape: bf16[64,64], index: 4, kind: input, shape index: {}]   ;;  %s9207_s9 = inlined_call_operand.vmem [shape: bf16[512,128], index: 9, kind: input, shape index: {}]   ;;  %s9208_s10 = inlined_call_operand.vmem [shape: bf16[384,128], index: 10, kind: input, shape index: {}]   ;;  %s9209_s5 = inlined_call_operand.vmem [shape: bf16[3,16], index: 5, kind: input, shape index: {}]   ;;  %s9210_s16 = inlined_call_operand.vmem [shape: f32[1,128], index: 16, kind: output, shape index: {}]  }
   0x1   :  { %9223 = sst [smem:[#allocation15_spill]] %s9194_s0 }
   0x2   :  { %s9224_s23 = sld [smem:[#allocation15_spill]] }
   0x8   :  { %v70_v0 = vld [vmem:[%s9224_s23 + $0x70] sm:$0xff]  ;;  %v71_v1 = vld [vmem:[%s9224_s23 + $0x78] sm:$0xff]  ;;  %v68_v11 = vld [vmem:[%s9224_s23 + $0x60] sm:$0xff] }
   0x9   :  { %v86_v2 = vld [vmem:[%s9224_s23 + $0xf0] sm:$0xff]  ;;  %v287_v3 = vpack.c.bf16 %v71_v1, %v70_v0  ;;  %v87_v4 = vld [vmem:[%s9224_s23 + $0xf8] sm:$0xff]  ;;  %v69_v13 = vld [vmem:[%s9224_s23 + $0x68] sm:$0xff] }
   0xa   :  { %v102_v5 = vld [vmem:[%s9224_s23 + $0x170] sm:$0xff]  ;;  %v103_v6 = vld [vmem:[%s9224_s23 + $0x178] sm:$0xff]  ;;  %v295_v7 = vpack.c.bf16 %v87_v4, %v86_v2  ;;  %v84_v14 = vld [vmem:[%s9224_s23 + $0xe0] sm:$0xff]  ;;  %v286_v16 = vpack.c.bf16 %v69_v13, %v68_v11 }
   0xb   :  { %v303_v8 = vpack.c.bf16 %v103_v6, %v102_v5  ;;  %v118_v9 = vld [vmem:[%s9224_s23 + $0x1f0] sm:$0xff]  ;;  %v119_v10 = vld [vmem:[%s9224_s23 + $0x1f8] sm:$0xff]  ;;  %792 = vmatpush.bf16.msra.mxu0 %v287_v3  ;;  %v85_v15 = vld [vmem:[%s9224_s23 + $0xe8] sm:$0xff] }
   0xc   :  { %v311_v12 = vpack.c.bf16 %v119_v10, %v118_v9  ;;  %921 = vmatpush.bf16.msra.mxu1 %v295_v7  ;;  %v294_v17 = vpack.c.bf16 %v85_v15, %v84_v14  ;;  %v100_v18 = vld [vmem:[%s9224_s23 + $0x160] sm:$0xff]  ;;  %v101_v19 = vld [vmem:[%s9224_s23 + $0x168] sm:$0xff]  ;;  %v66_v23 = vld [vmem:[%s9224_s23 + $0x50] sm:$0xff] }
   0xd   :  { %1050 = vmatpush.bf16.msra.mxu2 %v303_v8  ;;  %v116_v20 = vld [vmem:[%s9224_s23 + $0x1e0] sm:$0xff]  ;;  %v302_v21 = vpack.c.bf16 %v101_v19, %v100_v18  ;;  %v117_v22 = vld [vmem:[%s9224_s23 + $0x1e8] sm:$0xff]  ;;  %v67_v24 = vld [vmem:[%s9224_s23 + $0x58] sm:$0xff] }
   0xe   :  { %1179 = vmatpush.bf16.msra.mxu3 %v311_v12  ;;  %v310_v25 = vpack.c.bf16 %v117_v22, %v116_v20  ;;  %v82_v26 = vld [vmem:[%s9224_s23 + $0xd0] sm:$0xff]  ;;  %v83_v27 = vld [vmem:[%s9224_s23 + $0xd8] sm:$0xff]  ;;  %v285_v29 = vpack.c.bf16 %v67_v24, %v66_v23  ;;  %v64_v35 = vld [vmem:[%s9224_s23 + $0x40] sm:$0xff] }
   0xf   :  { %v98_v28 = vld [vmem:[%s9224_s23 + $0x150] sm:$0xff]  ;;  %793 = vmatpush.bf16.msra.mxu0 %v286_v16  ;;  %v99_v30 = vld [vmem:[%s9224_s23 + $0x158] sm:$0xff]  ;;  %v293_v33 = vpack.c.bf16 %v83_v27, %v82_v26  ;;  %v65_v36 = vld [vmem:[%s9224_s23 + $0x48] sm:$0xff] }
  0x10   :  { %v114_v31 = vld [vmem:[%s9224_s23 + $0x1d0] sm:$0xff]  ;;  %v115_v32 = vld [vmem:[%s9224_s23 + $0x1d8] sm:$0xff]  ;;  %922 = vmatpush.bf16.msra.mxu1 %v294_v17  ;;  %v301_v34 = vpack.c.bf16 %v99_v30, %v98_v28  ;;  %v80_v37 = vld [vmem:[%s9224_s23 + $0xc0] sm:$0xff]  ;;  %v284_v44 = vpack.c.bf16 %v65_v36, %v64_v35 }
  0x11   :  { %1051 = vmatpush.bf16.msra.mxu2 %v302_v21  ;;  %v309_v38 = vpack.c.bf16 %v115_v32, %v114_v31  ;;  %v81_v39 = vld [vmem:[%s9224_s23 + $0xc8] sm:$0xff]  ;;  %v96_v40 = vld [vmem:[%s9224_s23 + $0x140] sm:$0xff]  ;;  %v62_v47 = vld [vmem:[%s9224_s23 + $0x30] sm:$0xff] }
  0x12   :  { %1180 = vmatpush.bf16.msra.mxu3 %v310_v25  ;;  %v97_v41 = vld [vmem:[%s9224_s23 + $0x148] sm:$0xff]  ;;  %v112_v42 = vld [vmem:[%s9224_s23 + $0x1c0] sm:$0xff]  ;;  %v292_v45 = vpack.c.bf16 %v81_v39, %v80_v37  ;;  %v63_v48 = vld [vmem:[%s9224_s23 + $0x38] sm:$0xff] }
  0x13   :  { %v113_v43 = vld [vmem:[%s9224_s23 + $0x1c8] sm:$0xff]  ;;  %794 = vmatpush.bf16.msra.mxu0 %v285_v29  ;;  %v300_v46 = vpack.c.bf16 %v97_v41, %v96_v40  ;;  %v78_v49 = vld [vmem:[%s9224_s23 + $0xb0] sm:$0xff]  ;;  %v79_v51 = vld [vmem:[%s9224_s23 + $0xb8] sm:$0xff]  ;;  %v283_v56 = vpack.c.bf16 %v63_v48, %v62_v47 }
  0x14   :  { %923 = vmatpush.bf16.msra.mxu1 %v293_v33  ;;  %v308_v50 = vpack.c.bf16 %v113_v43, %v112_v42  ;;  %v94_v52 = vld [vmem:[%s9224_s23 + $0x130] sm:$0xff]  ;;  %v95_v53 = vld [vmem:[%s9224_s23 + $0x138] sm:$0xff]  ;;  %v291_v57 = vpack.c.bf16 %v79_v51, %v78_v49  ;;  %v60_v59 = vld [vmem:[%s9224_s23 + $0x20] sm:$0xff] }
  0x15   :  { %1052 = vmatpush.bf16.msra.mxu2 %v301_v34  ;;  %v110_v54 = vld [vmem:[%s9224_s23 + $0x1b0] sm:$0xff]  ;;  %v111_v55 = vld [vmem:[%s9224_s23 + $0x1b8] sm:$0xff]  ;;  %v299_v58 = vpack.c.bf16 %v95_v53, %v94_v52  ;;  %v61_v60 = vld [vmem:[%s9224_s23 + $0x28] sm:$0xff] }
  0x16   :  { %1181 = vmatpush.bf16.msra.mxu3 %v309_v38  ;;  %v76_v61 = vld [vmem:[%s9224_s23 + $0xa0] sm:$0xff]  ;;  %v307_v62 = vpack.c.bf16 %v111_v55, %v110_v54  ;;  %v77_v63 = vld [vmem:[%s9224_s23 + $0xa8] sm:$0xff]  ;;  %v282_v4 = vpack.c.bf16 %v61_v60, %v60_v59  ;;  %v58_v7 = vld [vmem:[%s9224_s23 + $0x10] sm:$0xff] }
  0x17   :  { %795 = vmatpush.bf16.msra.mxu0 %v284_v44  ;;  %v92_v0 = vld [vmem:[%s9224_s23 + $0x120] sm:$0xff]  ;;  %v93_v1 = vld [vmem:[%s9224_s23 + $0x128] sm:$0xff]  ;;  %v290_v5 = vpack.c.bf16 %v77_v63, %v76_v61  ;;  %v59_v8 = vld [vmem:[%s9224_s23 + $0x18] sm:$0xff] }
  0x18   :  { %924 = vmatpush.bf16.msra.mxu1 %v292_v45  ;;  %v108_v2 = vld [vmem:[%s9224_s23 + $0x1a0] sm:$0xff]  ;;  %v109_v3 = vld [vmem:[%s9224_s23 + $0x1a8] sm:$0xff]  ;;  %v298_v6 = vpack.c.bf16 %v93_v1, %v92_v0  ;;  %v74_v9 = vld [vmem:[%s9224_s23 + $0x90] sm:$0xff]  ;;  %v281_v16 = vpack.c.bf16 %v59_v8, %v58_v7 }
  0x19   :  { %1053 = vmatpush.bf16.msra.mxu2 %v300_v46  ;;  %v306_v10 = vpack.c.bf16 %v109_v3, %v108_v2  ;;  %v75_v11 = vld [vmem:[%s9224_s23 + $0x98] sm:$0xff]  ;;  %v90_v12 = vld [vmem:[%s9224_s23 + $0x110] sm:$0xff]  ;;  %v56_v19 = vld [vmem:[%s9224_s23] sm:$0xff] }
  0x1a   :  { %1182 = vmatpush.bf16.msra.mxu3 %v308_v50  ;;  %v91_v13 = vld [vmem:[%s9224_s23 + $0x118] sm:$0xff]  ;;  %v106_v14 = vld [vmem:[%s9224_s23 + $0x190] sm:$0xff]  ;;  %v289_v17 = vpack.c.bf16 %v75_v11, %v74_v9  ;;  %v57_v20 = vld [vmem:[%s9224_s23 + $0x8] sm:$0xff] }
  0x1b   :  { %796 = vmatpush.bf16.msra.mxu0 %v283_v56  ;;  %v107_v15 = vld [vmem:[%s9224_s23 + $0x198] sm:$0xff]  ;;  %v297_v18 = vpack.c.bf16 %v91_v13, %v90_v12  ;;  %v72_v21 = vld [vmem:[%s9224_s23 + $0x80] sm:$0xff]  ;;  %v73_v23 = vld [vmem:[%s9224_s23 + $0x88] sm:$0xff]  ;;  %v280_v28 = vpack.c.bf16 %v57_v20, %v56_v19 }
  0x1c   :  { %925 = vmatpush.bf16.msra.mxu1 %v291_v57  ;;  %v305_v22 = vpack.c.bf16 %v107_v15, %v106_v14  ;;  %v88_v24 = vld [vmem:[%s9224_s23 + $0x100] sm:$0xff]  ;;  %v89_v25 = vld [vmem:[%s9224_s23 + $0x108] sm:$0xff]  ;;  %v5909_v30 = vld [vmem:[%s9195_s1 + $0xc] sm:$0xf0]  ;;  %v288_v32 = vpack.c.bf16 %v73_v23, %v72_v21 }
  0x1d   :  { %1054 = vmatpush.bf16.msra.mxu2 %v299_v58  ;;  %v104_v26 = vld [vmem:[%s9224_s23 + $0x180] sm:$0xff]  ;;  %v105_v27 = vld [vmem:[%s9224_s23 + $0x188] sm:$0xff]  ;;  %v296_v33 = vpack.c.bf16 %v89_v25, %v88_v24  ;;  %v4744_v34 = vld [vmem:[%s9195_s1 + $0x10] sm:$0xf0] }
  0x1e   :  { %1183 = vmatpush.bf16.msra.mxu3 %v307_v62  ;;  %v4742_v29 = vld [vmem:[%s9195_s1] sm:$0xf]  ;;  %v5907_v31 = vld [vmem:[%s9195_s1 + $0x4] sm:$0xf]  ;;  %v4750_v35 = vld [vmem:[%s9195_s1 + $0x8] sm:$0xf]  ;;  %v304_v37 = vpack.c.bf16 %v105_v27, %v104_v26 }
  0x1f   :  { %797 = vmatpush.bf16.msra.mxu0 %v282_v4  ;;  %v5910_v36 = vld [vmem:[%s9195_s1 + $0x14] sm:$0xf0]  ;;  %v5908_v38 = vld [vmem:[%s9195_s1 + $0xc] sm:$0xf]  ;;  %v4752_v39 = vld [vmem:[%s9195_s1 + $0x18] sm:$0xf0]  ;;  %v4743_v40 = vor.u32 %v5909_v30, %v4742_v29  ;;  %v4747_v41 = vor.u32 %v5907_v31, %v4744_v34 }
  0x20   :  { %926 = vmatpush.bf16.msra.mxu1 %v290_v5  ;;  %v4751_v42 = vor.u32 %v5910_v36, %v4750_v35  ;;  %v4755_v43 = vor.u32 %v5908_v38, %v4752_v39  ;;  %v4758_v44 = vld [vmem:[%s9195_s1 + $0x20] sm:$0xf]  ;;  %v5913_v45 = vld [vmem:[%s9195_s1 + $0x2c] sm:$0xf0]  ;;  %v5911_v46 = vld [vmem:[%s9195_s1 + $0x24] sm:$0xf] }
  0x21   :  { %1055 = vmatpush.bf16.msra.mxu2 %v298_v6  ;;  %v4760_v47 = vld [vmem:[%s9195_s1 + $0x30] sm:$0xf0]  ;;  %v4766_v48 = vld [vmem:[%s9195_s1 + $0x28] sm:$0xf]  ;;  %v5914_v49 = vld [vmem:[%s9195_s1 + $0x34] sm:$0xf0]  ;;  %v4759_v52 = vor.u32 %v5913_v45, %v4758_v44 }
  0x22   :  { %1184 = vmatpush.bf16.msra.mxu3 %v306_v10  ;;  %v5912_v50 = vld [vmem:[%s9195_s1 + $0x2c] sm:$0xf]  ;;  %v4768_v51 = vld [vmem:[%s9195_s1 + $0x38] sm:$0xf0]  ;;  %v4763_v53 = vor.u32 %v5911_v46, %v4760_v47  ;;  %v4767_v54 = vor.u32 %v5914_v49, %v4766_v48  ;;  %v4774_v56 = vld [vmem:[%s9195_s1 + $0x40] sm:$0xf] }
  0x23   :  { %798 = vmatpush.bf16.msra.mxu0 %v281_v16  ;;  %v4771_v55 = vor.u32 %v5912_v50, %v4768_v51  ;;  %v5917_v57 = vld [vmem:[%s9195_s1 + $0x4c] sm:$0xf0]  ;;  %v5915_v58 = vld [vmem:[%s9195_s1 + $0x44] sm:$0xf]  ;;  %v4776_v59 = vld [vmem:[%s9195_s1 + $0x50] sm:$0xf0] }
  0x24   :  { %927 = vmatpush.bf16.msra.mxu1 %v289_v17  ;;  %v4782_v60 = vld [vmem:[%s9195_s1 + $0x48] sm:$0xf]  ;;  %v5918_v61 = vld [vmem:[%s9195_s1 + $0x54] sm:$0xf0]  ;;  %v5916_v62 = vld [vmem:[%s9195_s1 + $0x4c] sm:$0xf]  ;;  %v4775_v0 = vor.u32 %v5917_v57, %v4774_v56  ;;  %v4779_v1 = vor.u32 %v5915_v58, %v4776_v59 }
  0x25   :  { %1056 = vmatpush.bf16.msra.mxu2 %v297_v18  ;;  %v4784_v63 = vld [vmem:[%s9195_s1 + $0x58] sm:$0xf0]  ;;  %v4783_v2 = vor.u32 %v5918_v61, %v4782_v60  ;;  %v4790_v4 = vld [vmem:[%s9195_s1 + $0x60] sm:$0xf]  ;;  %v5921_v5 = vld [vmem:[%s9195_s1 + $0x6c] sm:$0xf0] }
  0x26   :  { %1185 = vmatpush.bf16.msra.mxu3 %v305_v22  ;;  %v4787_v3 = vor.u32 %v5916_v62, %v4784_v63  ;;  %v5919_v6 = vld [vmem:[%s9195_s1 + $0x64] sm:$0xf]  ;;  %v4792_v7 = vld [vmem:[%s9195_s1 + $0x70] sm:$0xf0]  ;;  %v4798_v8 = vld [vmem:[%s9195_s1 + $0x68] sm:$0xf]  ;;  %v4791_v12 = vor.u32 %v5921_v5, %v4790_v4 }
  0x27   :  { %799 = vmatpush.bf16.msra.mxu0 %v280_v28  ;;  %v5922_v9 = vld [vmem:[%s9195_s1 + $0x74] sm:$0xf0]  ;;  %v5920_v10 = vld [vmem:[%s9195_s1 + $0x6c] sm:$0xf]  ;;  %v4800_v11 = vld [vmem:[%s9195_s1 + $0x78] sm:$0xf0]  ;;  %v4795_v13 = vor.u32 %v5919_v6, %v4792_v7 }
  0x28   :  { %928 = vmatpush.bf16.msra.mxu1 %v288_v32  ;;  %v4799_v14 = vor.u32 %v5922_v9, %v4798_v8  ;;  %v4803_v15 = vor.u32 %v5920_v10, %v4800_v11  ;;  %v4806_v16 = vld [vmem:[%s9195_s1 + $0x80] sm:$0xf]  ;;  %v5925_v17 = vld [vmem:[%s9195_s1 + $0x8c] sm:$0xf0]  ;;  %v5923_v18 = vld [vmem:[%s9195_s1 + $0x84] sm:$0xf] }
  0x29   :  { %1057 = vmatpush.bf16.msra.mxu2 %v296_v33  ;;  %v4808_v19 = vld [vmem:[%s9195_s1 + $0x90] sm:$0xf0]  ;;  %v4814_v20 = vld [vmem:[%s9195_s1 + $0x88] sm:$0xf]  ;;  %v5926_v21 = vld [vmem:[%s9195_s1 + $0x94] sm:$0xf0]  ;;  %v4807_v24 = vor.u32 %v5925_v17, %v4806_v16 }
  0x2a   :  { %1186 = vmatpush.bf16.msra.mxu3 %v304_v37  ;;  %800 = vmatmul.bf16.vlgmr.msra.gmra.mxu0 %v4743_v40  ;;  %v5924_v22 = vld [vmem:[%s9195_s1 + $0x8c] sm:$0xf]  ;;  %v4816_v23 = vld [vmem:[%s9195_s1 + $0x98] sm:$0xf0]  ;;  %v4811_v25 = vor.u32 %v5923_v18, %v4808_v19  ;;  %v4815_v26 = vor.u32 %v5926_v21, %v4814_v20  ;;  %v4822_v28 = vld [vmem:[%s9195_s1 + $0xa0] sm:$0xf] }
  0x2b   :  { %929 = vmatmul.bf16.vlgmr.msra.gmra.mxu1 %v4747_v41  ;;  %v4819_v27 = vor.u32 %v5924_v22, %v4816_v23  ;;  %v5929_v29 = vld [vmem:[%s9195_s1 + $0xac] sm:$0xf0]  ;;  %v5927_v30 = vld [vmem:[%s9195_s1 + $0xa4] sm:$0xf]  ;;  %v4824_v31 = vld [vmem:[%s9195_s1 + $0xb0] sm:$0xf0] }
  0x2c   :  { %1058 = vmatmul.bf16.vlgmr.msra.gmra.mxu2 %v4751_v42  ;;  %v4830_v32 = vld [vmem:[%s9195_s1 + $0xa8] sm:$0xf]  ;;  %v5930_v33 = vld [vmem:[%s9195_s1 + $0xb4] sm:$0xf0]  ;;  %v5928_v34 = vld [vmem:[%s9195_s1 + $0xac] sm:$0xf]  ;;  %v4823_v36 = vor.u32 %v5929_v29, %v4822_v28  ;;  %v4827_v37 = vor.u32 %v5927_v30, %v4824_v31 }
  0x2d   :  { %1187 = vmatmul.bf16.vlgmr.msra.gmra.mxu3 %v4755_v43  ;;  %v4832_v35 = vld [vmem:[%s9195_s1 + $0xb8] sm:$0xf0]  ;;  %v4831_v38 = vor.u32 %v5930_v33, %v4830_v32  ;;  %v4838_v40 = vld [vmem:[%s9195_s1 + $0xc0] sm:$0xf]  ;;  %v5933_v41 = vld [vmem:[%s9195_s1 + $0xcc] sm:$0xf0] }
  0x2e   :  { %v4835_v39 = vor.u32 %v5928_v34, %v4832_v35  ;;  %v5931_v42 = vld [vmem:[%s9195_s1 + $0xc4] sm:$0xf]  ;;  %v4840_v43 = vld [vmem:[%s9195_s1 + $0xd0] sm:$0xf0]  ;;  %v4846_v44 = vld [vmem:[%s9195_s1 + $0xc8] sm:$0xf]  ;;  %v4839_v48 = vor.u32 %v5933_v41, %v4838_v40 }
  0x2f   :  { %v5934_v45 = vld [vmem:[%s9195_s1 + $0xd4] sm:$0xf0]  ;;  %v5932_v46 = vld [vmem:[%s9195_s1 + $0xcc] sm:$0xf]  ;;  %v4848_v47 = vld [vmem:[%s9195_s1 + $0xd8] sm:$0xf0]  ;;  %v4843_v49 = vor.u32 %v5931_v42, %v4840_v43 }
  0x30   :  { %v4847_v50 = vor.u32 %v5934_v45, %v4846_v44  ;;  %v4851_v51 = vor.u32 %v5932_v46, %v4848_v47  ;;  %v4862_v56 = vld [vmem:[%s9195_s1 + $0xe8] sm:$0xf]  ;;  %v5938_v57 = vld [vmem:[%s9195_s1 + $0xf4] sm:$0xf0]  ;;  %v5936_v58 = vld [vmem:[%s9195_s1 + $0xec] sm:$0xf] }
  0x31   :  { %v4864_v59 = vld [vmem:[%s9195_s1 + $0xf8] sm:$0xf0]  ;;  %v4863_v62 = vor.u32 %v5938_v57, %v4862_v56  ;;  %v4878_v4 = vld [vmem:[%s9195_s1 + $0x108] sm:$0xf]  ;;  %v5942_v5 = vld [vmem:[%s9195_s1 + $0x114] sm:$0xf0] }
  0x32   :  { %v4867_v63 = vor.u32 %v5936_v58, %v4864_v59  ;;  %v5940_v6 = vld [vmem:[%s9195_s1 + $0x10c] sm:$0xf]  ;;  %v4880_v7 = vld [vmem:[%s9195_s1 + $0x118] sm:$0xf0]  ;;  %v4879_v11 = vor.u32 %v5942_v5, %v4878_v4  ;;  %v4886_v22 = vld [vmem:[%s9195_s1 + $0x120] sm:$0xf] }
  0x33   :  { %v5945_v23 = vld [vmem:[%s9195_s1 + $0x12c] sm:$0xf0]  ;;  %v5944_v28 = vld [vmem:[%s9195_s1 + $0x12c] sm:$0xf]  ;;  %v4896_v29 = vld [vmem:[%s9195_s1 + $0x138] sm:$0xf0] }
  0x34   :  { %v4887_v31 = vor.u32 %v5945_v23, %v4886_v22  ;;  %v4912_v56 = vld [vmem:[%s9195_s1 + $0x158] sm:$0xf0] }
  0x3a   :  { %805 = vmatmul.bf16.gmra.mxu0 %v4759_v52  ;;  %v4854_v52 = vld [vmem:[%s9195_s1 + $0xe0] sm:$0xf] }
  0x3b   :  { %934 = vmatmul.bf16.gmra.mxu1 %v4763_v53  ;;  %v5937_v53 = vld [vmem:[%s9195_s1 + $0xec] sm:$0xf0] }
  0x3c   :  { %1063 = vmatmul.bf16.gmra.mxu2 %v4767_v54  ;;  %v5935_v54 = vld [vmem:[%s9195_s1 + $0xe4] sm:$0xf]  ;;  %v4855_v60 = vor.u32 %v5937_v53, %v4854_v52  ;;  %v4904_v52 = vld [vmem:[%s9195_s1 + $0x150] sm:$0xf0]  ;;  %v4910_v53 = vld [vmem:[%s9195_s1 + $0x148] sm:$0xf] }
  0x3d   :  { %1192 = vmatmul.bf16.gmra.mxu3 %v4771_v55  ;;  %v4856_v55 = vld [vmem:[%s9195_s1 + $0xf0] sm:$0xf0] }
  0x3e   :  { %v4859_v61 = vor.u32 %v5935_v54, %v4856_v55  ;;  %v5950_v54 = vld [vmem:[%s9195_s1 + $0x154] sm:$0xf0]  ;;  %v5948_v55 = vld [vmem:[%s9195_s1 + $0x14c] sm:$0xf] }
  0x4a   :  { %810 = vmatmul.bf16.gmra.mxu0 %v4775_v0  ;;  %v4870_v0 = vld [vmem:[%s9195_s1 + $0x100] sm:$0xf] }
  0x4b   :  { %939 = vmatmul.bf16.gmra.mxu1 %v4779_v1  ;;  %v5941_v1 = vld [vmem:[%s9195_s1 + $0x10c] sm:$0xf0] }
  0x4c   :  { %1068 = vmatmul.bf16.gmra.mxu2 %v4783_v2  ;;  %v5939_v2 = vld [vmem:[%s9195_s1 + $0x104] sm:$0xf]  ;;  %v4871_v8 = vor.u32 %v5941_v1, %v4870_v0  ;;  %v4915_v1 = vor.u32 %v5948_v55, %v4912_v56 }
  0x4d   :  { %1197 = vmatmul.bf16.gmra.mxu3 %v4787_v3  ;;  %v4872_v3 = vld [vmem:[%s9195_s1 + $0x110] sm:$0xf0] }
  0x4e   :  { %v4875_v10 = vor.u32 %v5939_v2, %v4872_v3 }
  0x5a   :  { %815 = vmatmul.bf16.gmra.mxu0 %v4791_v12 }
  0x5b   :  { %944 = vmatmul.bf16.gmra.mxu1 %v4795_v13  ;;  %v4883_v13 = vor.u32 %v5940_v6, %v4880_v7 }
  0x5c   :  { %1073 = vmatmul.bf16.gmra.mxu2 %v4799_v14 }
  0x5d   :  { %1202 = vmatmul.bf16.gmra.mxu3 %v4803_v15 }
  0x6a   :  { %820 = vmatmul.bf16.gmra.mxu0 %v4807_v24  ;;  %v5943_v24 = vld [vmem:[%s9195_s1 + $0x124] sm:$0xf] }
  0x6b   :  { %949 = vmatmul.bf16.gmra.mxu1 %v4811_v25  ;;  %v4888_v25 = vld [vmem:[%s9195_s1 + $0x130] sm:$0xf0] }
  0x6c   :  { %1078 = vmatmul.bf16.gmra.mxu2 %v4815_v26  ;;  %v4894_v26 = vld [vmem:[%s9195_s1 + $0x128] sm:$0xf]  ;;  %v4891_v35 = vor.u32 %v5943_v24, %v4888_v25 }
  0x6d   :  { %1207 = vmatmul.bf16.gmra.mxu3 %v4819_v27  ;;  %v5946_v27 = vld [vmem:[%s9195_s1 + $0x134] sm:$0xf0] }
  0x7a   :  { %825 = vmatmul.bf16.gmra.mxu0 %v4823_v36  ;;  %v4895_v36 = vor.u32 %v5946_v27, %v4894_v26 }
  0x7b   :  { %954 = vmatmul.bf16.gmra.mxu1 %v4827_v37 }
  0x7c   :  { %1083 = vmatmul.bf16.gmra.mxu2 %v4831_v38  ;;  %v4899_v38 = vor.u32 %v5944_v28, %v4896_v29 }
  0x7d   :  { %1212 = vmatmul.bf16.gmra.mxu3 %v4835_v39 }
  0x8a   :  { %830 = vmatmul.bf16.gmra.mxu0 %v4839_v48 }
  0x8b   :  { %959 = vmatmul.bf16.gmra.mxu1 %v4843_v49  ;;  %v4902_v49 = vld [vmem:[%s9195_s1 + $0x140] sm:$0xf] }
  0x8c   :  { %1088 = vmatmul.bf16.gmra.mxu2 %v4847_v50  ;;  %v5949_v50 = vld [vmem:[%s9195_s1 + $0x14c] sm:$0xf0] }
  0x8d   :  { %1217 = vmatmul.bf16.gmra.mxu3 %v4851_v51  ;;  %v5947_v51 = vld [vmem:[%s9195_s1 + $0x144] sm:$0xf]  ;;  %v4903_v58 = vor.u32 %v5949_v50, %v4902_v49  ;;  %v5956_v49 = vld [vmem:[%s9195_s1 + $0x18c] sm:$0xf]  ;;  %v4944_v50 = vld [vmem:[%s9195_s1 + $0x198] sm:$0xf0] }
  0x9a   :  { %835 = vmatmul.bf16.gmra.mxu0 %v4855_v60 }
  0x9b   :  { %964 = vmatmul.bf16.gmra.mxu1 %v4859_v61 }
  0x9c   :  { %1093 = vmatmul.bf16.gmra.mxu2 %v4863_v62  ;;  %v4907_v62 = vor.u32 %v5947_v51, %v4904_v52 }
  0x9d   :  { %1222 = vmatmul.bf16.gmra.mxu3 %v4867_v63  ;;  %v4911_v63 = vor.u32 %v5950_v54, %v4910_v53 }
  0xa7   :  { %v801_v9 = vpop.f32.mrf.mxu0 }
  0xa8   :  { %v930_v12 = vpop.f32.mrf.mxu1 }
  0xa9   :  { %v931_v14 = vadd.f32 %v930_v12, %v801_v9  ;;  %v4918_v12 = vld [vmem:[%s9195_s1 + $0x160] sm:$0xf] }
  0xaa   :  { %840 = vmatmul.bf16.gmra.mxu0 %v4871_v8 }
  0xab   :  { %969 = vmatmul.bf16.gmra.mxu1 %v4875_v10 }
  0xac   :  { %1098 = vmatmul.bf16.gmra.mxu2 %v4879_v11 }
  0xad   :  { %1227 = vmatmul.bf16.gmra.mxu3 %v4883_v13  ;;  %v5953_v13 = vld [vmem:[%s9195_s1 + $0x16c] sm:$0xf0] }
  0xae   :  { %v4919_v22 = vor.u32 %v5953_v13, %v4918_v12  ;;  %v4952_v12 = vld [vmem:[%s9195_s1 + $0x1b0] sm:$0xf0]  ;;  %v4958_v13 = vld [vmem:[%s9195_s1 + $0x1a8] sm:$0xf] }
  0xaf   :  { %v1059_v15 = vpop.f32.mrf.mxu2  ;;  %v803_v18 = vpop.f32.mrf.mxu0 }
  0xb0   :  { %v1060_v16 = vadd.f32 %v1059_v15, %v931_v14  ;;  %v1188_v17 = vpop.f32.mrf.mxu3  ;;  %v932_v19 = vpop.f32.mrf.mxu1  ;;  %v5951_v14 = vld [vmem:[%s9195_s1 + $0x164] sm:$0xf]  ;;  %v4920_v15 = vld [vmem:[%s9195_s1 + $0x170] sm:$0xf0] }
  0xb1   :  { %v933_v21 = vadd.f32 %v932_v19, %v803_v18  ;;  %v5952_v18 = vld [vmem:[%s9195_s1 + $0x16c] sm:$0xf]  ;;  %v4928_v19 = vld [vmem:[%s9195_s1 + $0x178] sm:$0xf0]  ;;  %v4923_v26 = vor.u32 %v5951_v14, %v4920_v15  ;;  %v5962_v14 = vld [vmem:[%s9195_s1 + $0x1b4] sm:$0xf0] }
  0xb2   :  { %v6861_v20 = vadd.f32 %v1188_v17, %v1060_v16  ;;  %v4926_v16 = vld [vmem:[%s9195_s1 + $0x168] sm:$0xf]  ;;  %v5954_v17 = vld [vmem:[%s9195_s1 + $0x174] sm:$0xf0]  ;;  %v4931_v29 = vor.u32 %v5952_v18, %v4928_v19  ;;  %v5960_v15 = vld [vmem:[%s9195_s1 + $0x1ac] sm:$0xf] }
  0xb3   :  { %v4927_v27 = vor.u32 %v5954_v17, %v4926_v16  ;;  %v4960_v16 = vld [vmem:[%s9195_s1 + $0x1b8] sm:$0xf0] }
  0xb7   :  { %v1061_v30 = vpop.f32.mrf.mxu2  ;;  %v806_v34 = vpop.f32.mrf.mxu0 }
  0xb8   :  { %v1062_v32 = vadd.f32 %v1061_v30, %v933_v21  ;;  %v1190_v33 = vpop.f32.mrf.mxu3  ;;  %v935_v37 = vpop.f32.mrf.mxu1 }
  0xb9   :  { %v936_v40 = vadd.f32 %v935_v37, %v806_v34 }
  0xba   :  { %v6887_v39 = vadd.f32 %v1190_v33, %v1062_v32  ;;  %845 = vmatmul.bf16.gmra.mxu0 %v4887_v31 }
  0xbb   :  { %974 = vmatmul.bf16.gmra.mxu1 %v4891_v35 }
  0xbc   :  { %v1308_v41 = vpack.c.bf16 %v6887_v39, %v6861_v20  ;;  %1103 = vmatmul.bf16.gmra.mxu2 %v4895_v36 }
  0xbd   :  { %1232 = vmatmul.bf16.gmra.mxu3 %v4899_v38 }
  0xbf   :  { %v1064_v42 = vpop.f32.mrf.mxu2  ;;  %v808_v45 = vpop.f32.mrf.mxu0 }
  0xc0   :  { %v1065_v43 = vadd.f32 %v1064_v42, %v936_v40  ;;  %v1193_v44 = vpop.f32.mrf.mxu3  ;;  %v937_v46 = vpop.f32.mrf.mxu1  ;;  %v4934_v42 = vld [vmem:[%s9195_s1 + $0x180] sm:$0xf] }
  0xc1   :  { %v938_v48 = vadd.f32 %v937_v46, %v808_v45  ;;  %v4936_v45 = vld [vmem:[%s9195_s1 + $0x190] sm:$0xf0]  ;;  %v4942_v46 = vld [vmem:[%s9195_s1 + $0x188] sm:$0xf] }
  0xc2   :  { %v6891_v47 = vadd.f32 %v1193_v44, %v1065_v43  ;;  %v5957_v43 = vld [vmem:[%s9195_s1 + $0x18c] sm:$0xf0]  ;;  %v5955_v44 = vld [vmem:[%s9195_s1 + $0x184] sm:$0xf] }
  0xc3   :  { %v4935_v52 = vor.u32 %v5957_v43, %v4934_v42  ;;  %v4939_v56 = vor.u32 %v5955_v44, %v4936_v45  ;;  %v4966_v42 = vld [vmem:[%s9195_s1 + $0x1c0] sm:$0xf]  ;;  %v5965_v43 = vld [vmem:[%s9195_s1 + $0x1cc] sm:$0xf0]  ;;  %v5963_v44 = vld [vmem:[%s9195_s1 + $0x1c4] sm:$0xf] }
  0xc4   :  { %v4968_v45 = vld [vmem:[%s9195_s1 + $0x1d0] sm:$0xf0] }
  0xc7   :  { %v1066_v57 = vpop.f32.mrf.mxu2  ;;  %v811_v61 = vpop.f32.mrf.mxu0 }
  0xc8   :  { %v1067_v59 = vadd.f32 %v1066_v57, %v938_v48  ;;  %v1195_v60 = vpop.f32.mrf.mxu3  ;;  %v940_v0 = vpop.f32.mrf.mxu1  ;;  %v5958_v48 = vld [vmem:[%s9195_s1 + $0x194] sm:$0xf0] }
  0xc9   :  { %v941_v3 = vadd.f32 %v940_v0, %v811_v61  ;;  %v4943_v57 = vor.u32 %v5958_v48, %v4942_v46  ;;  %v4974_v46 = vld [vmem:[%s9195_s1 + $0x1c8] sm:$0xf]  ;;  %v5966_v48 = vld [vmem:[%s9195_s1 + $0x1d4] sm:$0xf0] }
  0xca   :  { %v6917_v2 = vadd.f32 %v1195_v60, %v1067_v59  ;;  %850 = vmatmul.bf16.gmra.mxu0 %v4903_v58  ;;  %v4947_v59 = vor.u32 %v5956_v49, %v4944_v50  ;;  %v5964_v49 = vld [vmem:[%s9195_s1 + $0x1cc] sm:$0xf]  ;;  %v4976_v50 = vld [vmem:[%s9195_s1 + $0x1d8] sm:$0xf0] }
  0xcb   :  { %979 = vmatmul.bf16.gmra.mxu1 %v4907_v62 }
  0xcc   :  { %v1311_v4 = vpack.c.bf16 %v6917_v2, %v6891_v47  ;;  %1108 = vmatmul.bf16.gmra.mxu2 %v4911_v63 }
  0xcd   :  { %1237 = vmatmul.bf16.gmra.mxu3 %v4915_v1 }
  0xcf   :  { %v1069_v5 = vpop.f32.mrf.mxu2  ;;  %v813_v8 = vpop.f32.mrf.mxu0 }
  0xd0   :  { %v1070_v6 = vadd.f32 %v1069_v5, %v941_v3  ;;  %v1198_v7 = vpop.f32.mrf.mxu3  ;;  %v942_v9 = vpop.f32.mrf.mxu1 }
  0xd1   :  { %v943_v11 = vadd.f32 %v942_v9, %v813_v8  ;;  %v4950_v8 = vld [vmem:[%s9195_s1 + $0x1a0] sm:$0xf]  ;;  %v5961_v9 = vld [vmem:[%s9195_s1 + $0x1ac] sm:$0xf0] }
  0xd2   :  { %v6921_v10 = vadd.f32 %v1198_v7, %v1070_v6  ;;  %v4951_v18 = vor.u32 %v5961_v9, %v4950_v8 }
  0xd7   :  { %v1071_v21 = vpop.f32.mrf.mxu2  ;;  %v816_v25 = vpop.f32.mrf.mxu0 }
  0xd8   :  { %v1072_v23 = vadd.f32 %v1071_v21, %v943_v11  ;;  %v1200_v24 = vpop.f32.mrf.mxu3  ;;  %v945_v28 = vpop.f32.mrf.mxu1  ;;  %v5959_v11 = vld [vmem:[%s9195_s1 + $0x1a4] sm:$0xf] }
  0xd9   :  { %v946_v31 = vadd.f32 %v945_v28, %v816_v25 }
  0xda   :  { %v6947_v30 = vadd.f32 %v1200_v24, %v1072_v23  ;;  %855 = vmatmul.bf16.gmra.mxu0 %v4919_v22  ;;  %v4955_v23 = vor.u32 %v5959_v11, %v4952_v12  ;;  %v4959_v24 = vor.u32 %v5962_v14, %v4958_v13  ;;  %v4982_v12 = vld [vmem:[%s9195_s1 + $0x1e0] sm:$0xf]  ;;  %v5969_v13 = vld [vmem:[%s9195_s1 + $0x1ec] sm:$0xf0]  ;;  %v5967_v14 = vld [vmem:[%s9195_s1 + $0x1e4] sm:$0xf] }
  0xdb   :  { %984 = vmatmul.bf16.gmra.mxu1 %v4923_v26  ;;  %v4963_v26 = vor.u32 %v5960_v15, %v4960_v16  ;;  %v4984_v15 = vld [vmem:[%s9195_s1 + $0x1f0] sm:$0xf0]  ;;  %v4990_v16 = vld [vmem:[%s9195_s1 + $0x1e8] sm:$0xf] }
  0xdc   :  { %v1314_v32 = vpack.c.bf16 %v6947_v30, %v6921_v10  ;;  %1113 = vmatmul.bf16.gmra.mxu2 %v4927_v27 }
  0xdd   :  { %1242 = vmatmul.bf16.gmra.mxu3 %v4931_v29 }
  0xdf   :  { %v1074_v33 = vpop.f32.mrf.mxu2  ;;  %v818_v36 = vpop.f32.mrf.mxu0 }
  0xe0   :  { %v1075_v34 = vadd.f32 %v1074_v33, %v946_v31  ;;  %v1203_v35 = vpop.f32.mrf.mxu3  ;;  %v947_v37 = vpop.f32.mrf.mxu1 }
  0xe1   :  { %v948_v40 = vadd.f32 %v947_v37, %v818_v36 }
  0xe2   :  { %v6951_v38 = vadd.f32 %v1203_v35, %v1075_v34 }
  0xe7   :  { %v1076_v51 = vpop.f32.mrf.mxu2  ;;  %v821_v55 = vpop.f32.mrf.mxu0 }
  0xe8   :  { %v1077_v53 = vadd.f32 %v1076_v51, %v948_v40  ;;  %v1205_v54 = vpop.f32.mrf.mxu3  ;;  %v950_v58 = vpop.f32.mrf.mxu1 }
  0xe9   :  { %v951_v61 = vadd.f32 %v950_v58, %v821_v55 }
  0xea   :  { %v6977_v60 = vadd.f32 %v1205_v54, %v1077_v53  ;;  %860 = vmatmul.bf16.gmra.mxu0 %v4935_v52  ;;  %v4967_v52 = vor.u32 %v5965_v43, %v4966_v42 }
  0xeb   :  { %989 = vmatmul.bf16.gmra.mxu1 %v4939_v56  ;;  %v4971_v56 = vor.u32 %v5963_v44, %v4968_v45 }
  0xec   :  { %v1317_v62 = vpack.c.bf16 %v6977_v60, %v6951_v38  ;;  %1118 = vmatmul.bf16.gmra.mxu2 %v4943_v57  ;;  %v4975_v57 = vor.u32 %v5966_v48, %v4974_v46 }
  0xed   :  { %1247 = vmatmul.bf16.gmra.mxu3 %v4947_v59  ;;  %v4979_v59 = vor.u32 %v5964_v49, %v4976_v50  ;;  %v4998_v49 = vld [vmem:[%s9195_s1 + $0x200] sm:$0xf]  ;;  %v5973_v50 = vld [vmem:[%s9195_s1 + $0x20c] sm:$0xf0] }
  0xef   :  { %v1079_v63 = vpop.f32.mrf.mxu2  ;;  %v823_v3 = vpop.f32.mrf.mxu0 }
  0xf0   :  { %v1080_v0 = vadd.f32 %v1079_v63, %v951_v61  ;;  %v1208_v1 = vpop.f32.mrf.mxu3  ;;  %v952_v5 = vpop.f32.mrf.mxu1 }
  0xf1   :  { %v953_v7 = vadd.f32 %v952_v5, %v823_v3 }
  0xf2   :  { %v6981_v6 = vadd.f32 %v1208_v1, %v1080_v0 }
  0xf7   :  { %v1081_v17 = vpop.f32.mrf.mxu2  ;;  %v826_v22 = vpop.f32.mrf.mxu0 }
  0xf8   :  { %v1082_v19 = vadd.f32 %v1081_v17, %v953_v7  ;;  %v1210_v21 = vpop.f32.mrf.mxu3  ;;  %v955_v25 = vpop.f32.mrf.mxu1  ;;  %v5970_v17 = vld [vmem:[%s9195_s1 + $0x1f4] sm:$0xf0] }
  0xf9   :  { %v956_v28 = vadd.f32 %v955_v25, %v826_v22  ;;  %v4983_v22 = vor.u32 %v5969_v13, %v4982_v12 }
  0xfa   :  { %v7007_v27 = vadd.f32 %v1210_v21, %v1082_v19  ;;  %865 = vmatmul.bf16.gmra.mxu0 %v4951_v18  ;;  %v5968_v18 = vld [vmem:[%s9195_s1 + $0x1ec] sm:$0xf]  ;;  %v4992_v19 = vld [vmem:[%s9195_s1 + $0x1f8] sm:$0xf0] }
  0xfb   :  { %994 = vmatmul.bf16.gmra.mxu1 %v4955_v23 }
  0xfc   :  { %v1320_v29 = vpack.c.bf16 %v7007_v27, %v6981_v6  ;;  %1123 = vmatmul.bf16.gmra.mxu2 %v4959_v24 }
  0xfd   :  { %1252 = vmatmul.bf16.gmra.mxu3 %v4963_v26  ;;  %v4987_v26 = vor.u32 %v5967_v14, %v4984_v15 }
  0xff   :  { %v1084_v31 = vpop.f32.mrf.mxu2  ;;  %v828_v35 = vpop.f32.mrf.mxu0 }
 0x100   :  { %v1085_v33 = vadd.f32 %v1084_v31, %v956_v28  ;;  %v1213_v34 = vpop.f32.mrf.mxu3  ;;  %v957_v36 = vpop.f32.mrf.mxu1  ;;  %v4991_v28 = vor.u32 %v5970_v17, %v4990_v16 }
 0x101   :  { %v958_v40 = vadd.f32 %v957_v36, %v828_v35 }
 0x102   :  { %v7011_v37 = vadd.f32 %v1213_v34, %v1085_v33  ;;  %v4995_v33 = vor.u32 %v5968_v18, %v4992_v19 }
 0x107   :  { %v1086_v51 = vpop.f32.mrf.mxu2  ;;  %v831_v55 = vpop.f32.mrf.mxu0 }
 0x108   :  { %v1087_v53 = vadd.f32 %v1086_v51, %v958_v40  ;;  %v1215_v54 = vpop.f32.mrf.mxu3  ;;  %v960_v58 = vpop.f32.mrf.mxu1  ;;  %v5971_v51 = vld [vmem:[%s9195_s1 + $0x204] sm:$0xf] }
 0x109   :  { %v961_v63 = vadd.f32 %v960_v58, %v831_v55  ;;  %v5972_v55 = vld [vmem:[%s9195_s1 + $0x20c] sm:$0xf]  ;;  %v4999_v58 = vor.u32 %v5973_v50, %v4998_v49 }
 0x10a   :  { %v7037_v61 = vadd.f32 %v1215_v54, %v1087_v53  ;;  %870 = vmatmul.bf16.gmra.mxu0 %v4967_v52  ;;  %v5000_v52 = vld [vmem:[%s9195_s1 + $0x210] sm:$0xf0]  ;;  %v5006_v53 = vld [vmem:[%s9195_s1 + $0x208] sm:$0xf]  ;;  %v5974_v54 = vld [vmem:[%s9195_s1 + $0x214] sm:$0xf0] }
 0x10b   :  { %999 = vmatmul.bf16.gmra.mxu1 %v4971_v56  ;;  %v5008_v56 = vld [vmem:[%s9195_s1 + $0x218] sm:$0xf0] }
 0x10c   :  { %v1323_v0 = vpack.c.bf16 %v7037_v61, %v7011_v37  ;;  %1128 = vmatmul.bf16.gmra.mxu2 %v4975_v57  ;;  %v2161_v37 = vld [vmem:[%s9198_s12 + $0x50] sm:$0xff] }
 0x10d   :  { %1257 = vmatmul.bf16.gmra.mxu3 %v4979_v59 }
 0x10f   :  { %v1089_v1 = vpop.f32.mrf.mxu2  ;;  %v833_v7 = vpop.f32.mrf.mxu0 }
 0x110   :  { %v1090_v3 = vadd.f32 %v1089_v1, %v961_v63  ;;  %v1218_v5 = vpop.f32.mrf.mxu3  ;;  %v962_v8 = vpop.f32.mrf.mxu1 }
 0x111   :  { %v963_v11 = vadd.f32 %v962_v8, %v833_v7  ;;  %v5011_v8 = vor.u32 %v5972_v55, %v5008_v56 }
 0x112   :  { %v7041_v9 = vadd.f32 %v1218_v5, %v1090_v3  ;;  %v5003_v3 = vor.u32 %v5971_v51, %v5000_v52  ;;  %v5007_v5 = vor.u32 %v5974_v54, %v5006_v53 }
 0x117   :  { %v1091_v21 = vpop.f32.mrf.mxu2  ;;  %v836_v25 = vpop.f32.mrf.mxu0 }
 0x118   :  { %v1092_v23 = vadd.f32 %v1091_v21, %v963_v11  ;;  %v1220_v24 = vpop.f32.mrf.mxu3  ;;  %v965_v31 = vpop.f32.mrf.mxu1 }
 0x119   :  { %v966_v35 = vadd.f32 %v965_v31, %v836_v25  ;;  %v5016_v25 = vld [vmem:[%s9195_s1 + $0x230] sm:$0xf0]  ;;  %v5976_v31 = vld [vmem:[%s9195_s1 + $0x22c] sm:$0xf] }
 0x11a   :  { %v7067_v34 = vadd.f32 %v1220_v24, %v1092_v23  ;;  %875 = vmatmul.bf16.gmra.mxu0 %v4983_v22  ;;  %v5014_v22 = vld [vmem:[%s9195_s1 + $0x220] sm:$0xf]  ;;  %v5977_v23 = vld [vmem:[%s9195_s1 + $0x22c] sm:$0xf0]  ;;  %v5975_v24 = vld [vmem:[%s9195_s1 + $0x224] sm:$0xf] }
 0x11b   :  { %1004 = vmatmul.bf16.gmra.mxu1 %v4987_v26  ;;  %v5022_v26 = vld [vmem:[%s9195_s1 + $0x228] sm:$0xf] }
 0x11c   :  { %1133 = vmatmul.bf16.gmra.mxu2 %v4991_v28  ;;  %v5978_v28 = vld [vmem:[%s9195_s1 + $0x234] sm:$0xf0] }
 0x11d   :  { %1262 = vmatmul.bf16.gmra.mxu3 %v4995_v33  ;;  %v5024_v33 = vld [vmem:[%s9195_s1 + $0x238] sm:$0xf0] }
 0x11e   :  { %v5027_v50 = vor.u32 %v5976_v31, %v5024_v33 }
 0x11f   :  { %v1094_v40 = vpop.f32.mrf.mxu2  ;;  %v838_v44 = vpop.f32.mrf.mxu0 }
 0x120   :  { %v1095_v42 = vadd.f32 %v1094_v40, %v966_v35  ;;  %v1223_v43 = vpop.f32.mrf.mxu3  ;;  %v967_v45 = vpop.f32.mrf.mxu1  ;;  %v5015_v40 = vor.u32 %v5977_v23, %v5014_v22 }
 0x121   :  { %v968_v48 = vadd.f32 %v967_v45, %v838_v44  ;;  %v5019_v45 = vor.u32 %v5975_v24, %v5016_v25 }
 0x122   :  { %v7071_v46 = vadd.f32 %v1223_v43, %v1095_v42 }
 0x127   :  { %v1096_v57 = vpop.f32.mrf.mxu2  ;;  %v841_v1 = vpop.f32.mrf.mxu0 }
 0x128   :  { %v1097_v59 = vadd.f32 %v1096_v57, %v968_v48  ;;  %v1225_v63 = vpop.f32.mrf.mxu3  ;;  %v970_v7 = vpop.f32.mrf.mxu1  ;;  %v5023_v48 = vor.u32 %v5978_v28, %v5022_v26 }
 0x129   :  { %v971_v12 = vadd.f32 %v970_v7, %v841_v1  ;;  %v5030_v1 = vld [vmem:[%s9195_s1 + $0x240] sm:$0xf]  ;;  %v5032_v7 = vld [vmem:[%s9195_s1 + $0x250] sm:$0xf0] }
 0x12a   :  { %v7097_v11 = vadd.f32 %v1225_v63, %v1097_v59  ;;  %880 = vmatmul.bf16.gmra.mxu0 %v4999_v58 }
 0x12b   :  { %1009 = vmatmul.bf16.gmra.mxu1 %v5003_v3  ;;  %v5981_v3 = vld [vmem:[%s9195_s1 + $0x24c] sm:$0xf0] }
 0x12c   :  { %1138 = vmatmul.bf16.gmra.mxu2 %v5007_v5  ;;  %v5979_v5 = vld [vmem:[%s9195_s1 + $0x244] sm:$0xf] }
 0x12d   :  { %1267 = vmatmul.bf16.gmra.mxu3 %v5011_v8  ;;  %v5038_v8 = vld [vmem:[%s9195_s1 + $0x248] sm:$0xf]  ;;  %v5035_v23 = vor.u32 %v5979_v5, %v5032_v7 }
 0x12f   :  { %v1099_v14 = vpop.f32.mrf.mxu2  ;;  %v843_v17 = vpop.f32.mrf.mxu0 }
 0x130   :  { %v1100_v15 = vadd.f32 %v1099_v14, %v971_v12  ;;  %v1228_v16 = vpop.f32.mrf.mxu3  ;;  %v972_v18 = vpop.f32.mrf.mxu1  ;;  %v5982_v12 = vld [vmem:[%s9195_s1 + $0x254] sm:$0xf0]  ;;  %v5980_v14 = vld [vmem:[%s9195_s1 + $0x24c] sm:$0xf] }
 0x131   :  { %v973_v21 = vadd.f32 %v972_v18, %v843_v17  ;;  %v5031_v17 = vor.u32 %v5981_v3, %v5030_v1  ;;  %v5039_v24 = vor.u32 %v5982_v12, %v5038_v8 }
 0x132   :  { %v7101_v19 = vadd.f32 %v1228_v16, %v1100_v15  ;;  %v5040_v15 = vld [vmem:[%s9195_s1 + $0x258] sm:$0xf0] }
 0x133   :  { %v5043_v26 = vor.u32 %v5980_v14, %v5040_v15 }
 0x137   :  { %v1101_v35 = vpop.f32.mrf.mxu2  ;;  %v846_v44 = vpop.f32.mrf.mxu0 }
 0x138   :  { %v1102_v42 = vadd.f32 %v1101_v35, %v973_v21  ;;  %v1230_v43 = vpop.f32.mrf.mxu3  ;;  %v975_v49 = vpop.f32.mrf.mxu1 }
 0x139   :  { %v976_v52 = vadd.f32 %v975_v49, %v846_v44  ;;  %v5046_v49 = vld [vmem:[%s9195_s1 + $0x260] sm:$0xf] }
 0x13a   :  { %v7127_v51 = vadd.f32 %v1230_v43, %v1102_v42  ;;  %885 = vmatmul.bf16.gmra.mxu0 %v5015_v40 }
 0x13b   :  { %1014 = vmatmul.bf16.gmra.mxu1 %v5019_v45 }
 0x13c   :  { %v1309_v53 = vpack.c.bf16 %v7127_v51, %v7101_v19  ;;  %1143 = vmatmul.bf16.gmra.mxu2 %v5023_v48 }
 0x13d   :  { %1272 = vmatmul.bf16.gmra.mxu3 %v5027_v50  ;;  %v5985_v50 = vld [vmem:[%s9195_s1 + $0x26c] sm:$0xf0] }
 0x13e   :  { %v5047_v1 = vor.u32 %v5985_v50, %v5046_v49  ;;  %v5988_v49 = vld [vmem:[%s9195_s1 + $0x28c] sm:$0xf]  ;;  %v5072_v50 = vld [vmem:[%s9195_s1 + $0x298] sm:$0xf0] }
 0x13f   :  { %v1104_v54 = vpop.f32.mrf.mxu2  ;;  %v848_v57 = vpop.f32.mrf.mxu0 }
 0x140   :  { %v1105_v55 = vadd.f32 %v1104_v54, %v976_v52  ;;  %v1233_v56 = vpop.f32.mrf.mxu3  ;;  %v977_v58 = vpop.f32.mrf.mxu1  ;;  %v5983_v52 = vld [vmem:[%s9195_s1 + $0x264] sm:$0xf]  ;;  %v5048_v54 = vld [vmem:[%s9195_s1 + $0x270] sm:$0xf0] }
 0x141   :  { %v978_v63 = vadd.f32 %v977_v58, %v848_v57  ;;  %v5984_v57 = vld [vmem:[%s9195_s1 + $0x26c] sm:$0xf]  ;;  %v5056_v58 = vld [vmem:[%s9195_s1 + $0x278] sm:$0xf0]  ;;  %v5051_v8 = vor.u32 %v5983_v52, %v5048_v54 }
 0x142   :  { %v7131_v59 = vadd.f32 %v1233_v56, %v1105_v55  ;;  %v5054_v55 = vld [vmem:[%s9195_s1 + $0x268] sm:$0xf]  ;;  %v5986_v56 = vld [vmem:[%s9195_s1 + $0x274] sm:$0xf0]  ;;  %v5059_v15 = vor.u32 %v5984_v57, %v5056_v58 }
 0x143   :  { %v5055_v12 = vor.u32 %v5986_v56, %v5054_v55 }
 0x147   :  { %v1106_v16 = vpop.f32.mrf.mxu2  ;;  %v851_v22 = vpop.f32.mrf.mxu0 }
 0x148   :  { %v1107_v18 = vadd.f32 %v1106_v16, %v978_v63  ;;  %v1235_v21 = vpop.f32.mrf.mxu3  ;;  %v980_v25 = vpop.f32.mrf.mxu1 }
 0x149   :  { %v981_v31 = vadd.f32 %v980_v25, %v851_v22 }
 0x14a   :  { %v7157_v28 = vadd.f32 %v1235_v21, %v1107_v18  ;;  %890 = vmatmul.bf16.gmra.mxu0 %v5031_v17 }
 0x14b   :  { %1019 = vmatmul.bf16.gmra.mxu1 %v5035_v23 }
 0x14c   :  { %v1312_v33 = vpack.c.bf16 %v7157_v28, %v7131_v59  ;;  %1148 = vmatmul.bf16.gmra.mxu2 %v5039_v24 }
 0x14d   :  { %1277 = vmatmul.bf16.gmra.mxu3 %v5043_v26 }
 0x14f   :  { %v1109_v35 = vpop.f32.mrf.mxu2  ;;  %v853_v43 = vpop.f32.mrf.mxu0 }
 0x150   :  { %v1110_v40 = vadd.f32 %v1109_v35, %v981_v31  ;;  %v1238_v42 = vpop.f32.mrf.mxu3  ;;  %v982_v44 = vpop.f32.mrf.mxu1  ;;  %v5062_v35 = vld [vmem:[%s9195_s1 + $0x280] sm:$0xf] }
 0x151   :  { %v983_v48 = vadd.f32 %v982_v44, %v853_v43  ;;  %v5064_v43 = vld [vmem:[%s9195_s1 + $0x290] sm:$0xf0]  ;;  %v5070_v44 = vld [vmem:[%s9195_s1 + $0x288] sm:$0xf] }
 0x152   :  { %v7161_v45 = vadd.f32 %v1238_v42, %v1110_v40  ;;  %v5989_v40 = vld [vmem:[%s9195_s1 + $0x28c] sm:$0xf0]  ;;  %v5987_v42 = vld [vmem:[%s9195_s1 + $0x284] sm:$0xf] }
 0x153   :  { %v5063_v54 = vor.u32 %v5989_v40, %v5062_v35  ;;  %v5067_v58 = vor.u32 %v5987_v42, %v5064_v43  ;;  %v6008_v40 = vld [vmem:[%s9196_s6 + $0x28] sm:$0xff]  ;;  %v278_v42 = vld [vmem:[%s9197_s11 + $0x70] sm:$0xff] }
 0x154   :  { %v6016_v43 = vld [vmem:[%s9196_s6 + $0x68] sm:$0xff] }
 0x157   :  { %v1111_v63 = vpop.f32.mrf.mxu2  ;;  %v856_v7 = vpop.f32.mrf.mxu0 }
 0x158   :  { %v1112_v3 = vadd.f32 %v1111_v63, %v983_v48  ;;  %v1240_v5 = vpop.f32.mrf.mxu3  ;;  %v985_v14 = vpop.f32.mrf.mxu1  ;;  %v5990_v48 = vld [vmem:[%s9195_s1 + $0x294] sm:$0xf0] }
 0x159   :  { %v986_v17 = vadd.f32 %v985_v14, %v856_v7  ;;  %v5071_v63 = vor.u32 %v5990_v48, %v5070_v44  ;;  %v6018_v14 = vld [vmem:[%s9196_s6 + $0x78] sm:$0xff]  ;;  %v6367_v44 = vmov 0   ;;  %v5078_v48 = vld [vmem:[%s9195_s1 + $0x2a0] sm:$0xf] }
 0x15a   :  { %v7187_v16 = vadd.f32 %v1240_v5, %v1112_v3  ;;  %895 = vmatmul.bf16.gmra.mxu0 %v5047_v1  ;;  %v5075_v3 = vor.u32 %v5988_v49, %v5072_v50  ;;  %1605 = vmatpush.bf16.msrb.mxu1 %v6018_v14  ;;  %v5993_v49 = vld [vmem:[%s9195_s1 + $0x2ac] sm:$0xf0]  ;;  %v5991_v50 = vld [vmem:[%s9195_s1 + $0x2a4] sm:$0xf] }
 0x15b   :  { %1024 = vmatmul.bf16.gmra.mxu1 %v5051_v8  ;;  %6196 = vset.pattern.permute.xlu0 %v6367_v44 }
 0x15c   :  { %v1315_v18 = vpack.c.bf16 %v7187_v16, %v7161_v45  ;;  %1153 = vmatmul.bf16.gmra.mxu2 %v5055_v12  ;;  %v6010_v12 = vld [vmem:[%s9196_s6 + $0x38] sm:$0xff]  ;;  %1404 = vperm.xlu0 %6196, %v278_v42  }
 0x15d   :  { %1282 = vmatmul.bf16.gmra.mxu3 %v5059_v15  ;;  %1556 = vmatpush.bf16.msrb.mxu0 %v6010_v12  ;;  %v279_v42 = vld [vmem:[%s9197_s11 + $0x78] sm:$0xff] }
 0x15e   :  { %6198 = vset.pattern.permute.xlu2 %v6367_v44  ;;  %6197 = vset.pattern.permute.xlu1 %v6367_v44 }
 0x15f   :  { %v1114_v21 = vpop.f32.mrf.mxu2  ;;  %v858_v24 = vpop.f32.mrf.mxu0 }
 0x160   :  { %v1115_v22 = vadd.f32 %v1114_v21, %v986_v17  ;;  %v1243_v23 = vpop.f32.mrf.mxu3  ;;  %v987_v25 = vpop.f32.mrf.mxu1 }
 0x161   :  { %v988_v31 = vadd.f32 %v987_v25, %v858_v24  ;;  %v6017_v24 = vld [vmem:[%s9196_s6 + $0x70] sm:$0xff] }
 0x162   :  { %v7191_v26 = vadd.f32 %v1243_v23, %v1115_v22  ;;  %v6009_v23 = vld [vmem:[%s9196_s6 + $0x30] sm:$0xff]  ;;  %1606 = vmatpush.bf16.msrb.mxu1 %v6017_v24 }
 0x163   :  { %1557 = vmatpush.bf16.msrb.mxu0 %v6009_v23 }
 0x164   :  { %1409 = vperm.xlu0 %6196, %v279_v42  }
 0x166   :  { %1607 = vmatpush.bf16.msrb.mxu1 %v6016_v43  ;;  %v6026_v43 = vld [vmem:[%s9196_s6 + $0xb8] sm:$0xff] }
 0x167   :  { %v1116_v52 = vpop.f32.mrf.mxu2  ;;  %v861_v57 = vpop.f32.mrf.mxu0  ;;  %1558 = vmatpush.bf16.msrb.mxu0 %v6008_v40  ;;  %v6014_v40 = vld [vmem:[%s9196_s6 + $0x58] sm:$0xff]  ;;  %1654 = vmatpush.bf16.msrb.mxu2 %v6026_v43 }
 0x168   :  { %v1117_v55 = vadd.f32 %v1116_v52, %v988_v31  ;;  %v1245_v56 = vpop.f32.mrf.mxu3  ;;  %v990_v1 = vpop.f32.mrf.mxu1  ;;  %v5080_v52 = vld [vmem:[%s9195_s1 + $0x2b0] sm:$0xf0] }
 0x169   :  { %v991_v7 = vadd.f32 %v990_v1, %v861_v57  ;;  %v5088_v57 = vld [vmem:[%s9195_s1 + $0x2b8] sm:$0xf0]  ;;  %v5083_v12 = vor.u32 %v5991_v50, %v5080_v52  ;;  %v6005_v52 = vld [vmem:[%s9196_s6 + $0x10] sm:$0xff] }
 0x16a   :  { %v7217_v5 = vadd.f32 %v1245_v56, %v1117_v55  ;;  %900 = vmatmul.bf16.gmra.mxu0 %v5063_v54  ;;  %v5086_v54 = vld [vmem:[%s9195_s1 + $0x2a8] sm:$0xf]  ;;  %v5994_v55 = vld [vmem:[%s9195_s1 + $0x2b4] sm:$0xf0]  ;;  %v5992_v56 = vld [vmem:[%s9195_s1 + $0x2ac] sm:$0xf] }
 0x16b   :  { %1029 = vmatmul.bf16.gmra.mxu1 %v5067_v58  ;;  %v5087_v14 = vor.u32 %v5994_v55, %v5086_v54  ;;  %v6013_v54 = vld [vmem:[%s9196_s6 + $0x50] sm:$0xff] }
 0x16c   :  { %v1318_v8 = vpack.c.bf16 %v7217_v5, %v7191_v26  ;;  %1158 = vmatmul.bf16.gmra.mxu2 %v5071_v63  ;;  %v5079_v63 = vor.u32 %v5993_v49, %v5078_v48 }
 0x16d   :  { %1287 = vmatmul.bf16.gmra.mxu3 %v5075_v3 }
 0x16f   :  { %v1119_v15 = vpop.f32.mrf.mxu2  ;;  %v863_v22 = vpop.f32.mrf.mxu0 }
 0x170   :  { %v1120_v17 = vadd.f32 %v1119_v15, %v991_v7  ;;  %v1248_v21 = vpop.f32.mrf.mxu3  ;;  %v992_v25 = vpop.f32.mrf.mxu1  ;;  %v6007_v15 = vld [vmem:[%s9196_s6 + $0x20] sm:$0xff] }
 0x171   :  { %v993_v35 = vadd.f32 %v992_v25, %v863_v22  ;;  %v5091_v22 = vor.u32 %v5992_v56, %v5088_v57  ;;  %1559 = vmatpush.bf16.msrb.mxu0 %v6007_v15  ;;  %v5096_v15 = vld [vmem:[%s9195_s1 + $0x2d0] sm:$0xf0] }
 0x172   :  { %v7233_v31 = vadd.f32 %v1248_v21, %v1120_v17  ;;  %v6015_v17 = vld [vmem:[%s9196_s6 + $0x60] sm:$0xff] }
 0x173   :  { %1608 = vmatpush.bf16.msrb.mxu1 %v6015_v17  ;;  %v5102_v17 = vld [vmem:[%s9195_s1 + $0x2c8] sm:$0xf] }
 0x177   :  { %v1121_v58 = vpop.f32.mrf.mxu2  ;;  %v866_v7 = vpop.f32.mrf.mxu0  ;;  %1609 = vmatpush.bf16.msrb.mxu1 %v6014_v40 }
 0x178   :  { %v1122_v1 = vadd.f32 %v1121_v58, %v993_v35  ;;  %v1250_v3 = vpop.f32.mrf.mxu3  ;;  %v995_v21 = vpop.f32.mrf.mxu1  ;;  %v6006_v35 = vld [vmem:[%s9196_s6 + $0x18] sm:$0xff]  ;;  %v6025_v58 = vld [vmem:[%s9196_s6 + $0xb0] sm:$0xff] }
 0x179   :  { %v996_v24 = vadd.f32 %v995_v21, %v866_v7  ;;  %1560 = vmatpush.bf16.msrb.mxu0 %v6006_v35  ;;  %v5094_v7 = vld [vmem:[%s9195_s1 + $0x2c0] sm:$0xf]  ;;  %1655 = vmatpush.bf16.msrb.mxu2 %v6025_v58  ;;  %v5998_v21 = vld [vmem:[%s9195_s1 + $0x2d4] sm:$0xf0]  ;;  %v6024_v35 = vld [vmem:[%s9196_s6 + $0xa8] sm:$0xff] }
 0x17a   :  { %v7274_v23 = vadd.f32 %v1250_v3, %v1122_v1  ;;  %905 = vmatmul.bf16.gmra.mxu0 %v5079_v63  ;;  %v6004_v63 = vld [vmem:[%s9196_s6 + $0x8] sm:$0xff]  ;;  %v272_v3 = vld [vmem:[%s9197_s11 + $0x40] sm:$0xff] }
 0x17b   :  { %1034 = vmatmul.bf16.gmra.mxu1 %v5083_v12  ;;  %v6012_v1 = vld [vmem:[%s9196_s6 + $0x48] sm:$0xff]  ;;  %v5997_v12 = vld [vmem:[%s9195_s1 + $0x2cc] sm:$0xf0]  ;;  %1374 = vperm.xlu0 %6196, %v272_v3  }
 0x17c   :  { %v1321_v25 = vpack.c.bf16 %v7274_v23, %v7233_v31  ;;  %1163 = vmatmul.bf16.gmra.mxu2 %v5087_v14  ;;  %1610 = vmatpush.bf16.msrb.mxu1 %v6013_v54  ;;  %v5995_v14 = vld [vmem:[%s9195_s1 + $0x2c4] sm:$0xf]  ;;  %v5095_v42 = vor.u32 %v5997_v12, %v5094_v7  ;;  %v274_v12 = vld [vmem:[%s9197_s11 + $0x50] sm:$0xff] }
 0x17d   :  { %1292 = vmatmul.bf16.gmra.mxu3 %v5091_v22  ;;  %1561 = vmatpush.bf16.msrb.mxu0 %v6005_v52  ;;  %v5996_v22 = vld [vmem:[%s9195_s1 + $0x2cc] sm:$0xf]  ;;  %v6003_v52 = vld [vmem:[%s9196_s6] sm:$0xff] }
 0x17e   :  { %1656 = vmatpush.bf16.msrb.mxu2 %v6024_v35  ;;  %v6011_v54 = vld [vmem:[%s9196_s6 + $0x40] sm:$0xff]  ;;  %1384 = vperm.xlu2 %6198, %v274_v12   ;;  %v6020_v12 = vld [vmem:[%s9196_s6 + $0x88] sm:$0xff] }
 0x17f   :  { %v1124_v44 = vpop.f32.mrf.mxu2  ;;  %v868_v50 = vpop.f32.mrf.mxu0  ;;  %v276_v7 = vld [vmem:[%s9197_s11 + $0x60] sm:$0xff] }
 0x180   :  { %v1125_v48 = vadd.f32 %v1124_v44, %v996_v24  ;;  %v1253_v49 = vpop.f32.mrf.mxu3  ;;  %v997_v55 = vpop.f32.mrf.mxu1  ;;  %v5104_v24 = vld [vmem:[%s9195_s1 + $0x2d8] sm:$0xf0]  ;;  %1611 = vmatpush.bf16.msrb.mxu1 %v6012_v1  ;;  %1394 = vperm.xlu1 %6197, %v276_v7  }
 0x181   :  { %v998_v57 = vadd.f32 %v997_v55, %v868_v50  ;;  %1562 = vmatpush.bf16.msrb.mxu0 %v6004_v63  ;;  %v5103_v50 = vor.u32 %v5998_v21, %v5102_v17  ;;  %v5107_v58 = vor.u32 %v5996_v22, %v5104_v24  ;;  %v5120_v7 = vld [vmem:[%s9195_s1 + $0x2f8] sm:$0xf0] }
 0x182   :  { %v7296_v56 = vadd.f32 %v1253_v49, %v1125_v48  ;;  %v5099_v49 = vor.u32 %v5995_v14, %v5096_v15  ;;  %v271_v14 = vld [vmem:[%s9197_s11 + $0x38] sm:$0xff] }
 0x183   :  { %v6022_v15 = vld [vmem:[%s9196_s6 + $0x98] sm:$0xff]  ;;  %1369 = vperm.xlu0 %6196, %v271_v14  }
 0x184   :  { %1612 = vmatpush.bf16.msrb.mxu1 %v6011_v54  ;;  %v266_v54 = vld [vmem:[%s9197_s11 + $0x10] sm:$0xff] }
 0x185   :  { %1563 = vmatpush.bf16.msrb.mxu0 %v6003_v52  ;;  %v5999_v52 = vld [vmem:[%s9195_s1 + $0x2e4] sm:$0xf] }
 0x187   :  { %v1126_v40 = vpop.f32.mrf.mxu2  ;;  %v871_v48 = vpop.f32.mrf.mxu0 }
 0x188   :  { %v1127_v43 = vadd.f32 %v1126_v40, %v998_v57  ;;  %v1255_v44 = vpop.f32.mrf.mxu3  ;;  %v1000_v55 = vpop.f32.mrf.mxu1  ;;  %v6023_v57 = vld [vmem:[%s9196_s6 + $0xa0] sm:$0xff] }
 0x189   :  { %v1001_v3 = vadd.f32 %v1000_v55, %v871_v48  ;;  %1657 = vmatpush.bf16.msrb.mxu2 %v6023_v57  ;;  %v277_v48 = vld [vmem:[%s9197_s11 + $0x68] sm:$0xff]  ;;  %v5112_v55 = vld [vmem:[%s9195_s1 + $0x2f0] sm:$0xf0] }
 0x18a   :  { %v7343_v63 = vadd.f32 %v1255_v44, %v1127_v43  ;;  %910 = vmatmul.bf16.gmra.mxu0 %v5095_v42  ;;  %v6021_v43 = vld [vmem:[%s9196_s6 + $0x90] sm:$0xff]  ;;  %v5110_v44 = vld [vmem:[%s9195_s1 + $0x2e0] sm:$0xf]  ;;  %v6000_v57 = vld [vmem:[%s9195_s1 + $0x2ec] sm:$0xf]  ;;  %1399 = vperm.xlu1 %6197, %v277_v48  }
 0x18b   :  { %1039 = vmatmul.bf16.gmra.mxu1 %v5099_v49  ;;  %v275_v49 = vld [vmem:[%s9197_s11 + $0x58] sm:$0xff]  ;;  %1344 = vperm.xlu0 %6196, %v266_v54   ;;  %v5123_v13 = vor.u32 %v6000_v57, %v5120_v7  ;;  %v6019_v48 = vld [vmem:[%s9196_s6 + $0x80] sm:$0xff]  ;;  %v269_v7 = vld [vmem:[%s9197_s11 + $0x28] sm:$0xff] }
 0x18c   :  { %1168 = vmatmul.bf16.gmra.mxu2 %v5103_v50  ;;  %v6001_v50 = vld [vmem:[%s9195_s1 + $0x2ec] sm:$0xf0]  ;;  %1389 = vperm.xlu2 %6198, %v275_v49  }
 0x18d   :  { %1297 = vmatmul.bf16.gmra.mxu3 %v5107_v58  ;;  %1658 = vmatpush.bf16.msrb.mxu2 %v6022_v15  ;;  %v5118_v58 = vld [vmem:[%s9195_s1 + $0x2e8] sm:$0xf]  ;;  %v5111_v15 = vor.u32 %v6001_v50, %v5110_v44  ;;  %v270_v49 = vld [vmem:[%s9197_s11 + $0x30] sm:$0xff] }
 0x18e   :  { %v265_v50 = vld [vmem:[%s9197_s11 + $0x8] sm:$0xff] }
 0x18f   :  { %v1129_v17 = vpop.f32.mrf.mxu2  ;;  %v873_v24 = vpop.f32.mrf.mxu0 }
 0x190   :  { %v1130_v21 = vadd.f32 %v1129_v17, %v1001_v3  ;;  %v1258_v22 = vpop.f32.mrf.mxu3  ;;  %v1002_v35 = vpop.f32.mrf.mxu1  ;;  %v6002_v3 = vld [vmem:[%s9195_s1 + $0x2f4] sm:$0xf0] }
 0x191   :  { %v1003_v42 = vadd.f32 %v1002_v35, %v873_v24  ;;  %1659 = vmatpush.bf16.msrb.mxu2 %v6021_v43  ;;  %v5115_v24 = vor.u32 %v5999_v52, %v5112_v55  ;;  %v5119_v35 = vor.u32 %v6002_v3, %v5118_v58 }
 0x192   :  { %v7362_v40 = vadd.f32 %v1258_v22, %v1130_v21 }
 0x193   :  { %1339 = vperm.xlu0 %6196, %v265_v50  }
 0x194   :  { %1364 = vperm.xlu2 %6198, %v270_v49  }
 0x195   :  { %1660 = vmatpush.bf16.msrb.mxu2 %v6020_v12  ;;  %v268_v12 = vld [vmem:[%s9197_s11 + $0x20] sm:$0xff] }
 0x197   :  { %v1131_v14 = vpop.f32.mrf.mxu2  ;;  %v876_v22 = vpop.f32.mrf.mxu0 }
 0x198   :  { %v1132_v17 = vadd.f32 %v1131_v14, %v1003_v42  ;;  %v1260_v21 = vpop.f32.mrf.mxu3  ;;  %v1005_v43 = vpop.f32.mrf.mxu1  ;;  %v273_v42 = vld [vmem:[%s9197_s11 + $0x48] sm:$0xff] }
 0x199   :  { %v1006_v1 = vadd.f32 %v1005_v43, %v876_v22  ;;  %1661 = vmatpush.bf16.msrb.mxu2 %v6019_v48  ;;  %1379 = vperm.xlu1 %6197, %v273_v42   ;;  %v264_v43 = vld [vmem:[%s9197_s11] sm:$0xff] }
 0x19a   :  { %v7403_v36 = vadd.f32 %v1260_v21, %v1132_v17  ;;  %915 = vmatmul.bf16.gmra.mxu0 %v5111_v15 }
 0x19b   :  { %1044 = vmatmul.bf16.gmra.mxu1 %v5115_v24 }
 0x19c   :  { %v1327_v44 = vpack.c.bf16 %v7403_v36, %v7362_v40  ;;  %1173 = vmatmul.bf16.gmra.mxu2 %v5119_v35  ;;  %1359 = vperm.xlu2 %6198, %v269_v7   ;;  %v267_v35 = vld [vmem:[%s9197_s11 + $0x18] sm:$0xff] }
 0x19d   :  { %1302 = vmatmul.bf16.gmra.mxu3 %v5123_v13 }
 0x19f   :  { %v1134_v52 = vpop.f32.mrf.mxu2  ;;  %v878_v58 = vpop.f32.mrf.mxu0 }
 0x1a0   :  { %v1135_v54 = vadd.f32 %v1134_v52, %v1006_v1  ;;  %v1263_v55 = vpop.f32.mrf.mxu3  ;;  %v1007_v13 = vpop.f32.mrf.mxu1 }
 0x1a1   :  { %v1008_v57 = vadd.f32 %v1007_v13, %v878_v58  ;;  %1354 = vperm.xlu1 %6197, %v268_v12  }
 0x1a2   :  { %v7419_v3 = vadd.f32 %v1263_v55, %v1135_v54 }
 0x1a4   :  { %1334 = vperm.xlu2 %6198, %v264_v43  }
 0x1a7   :  { %v1136_v14 = vpop.f32.mrf.mxu2  ;;  %v881_v17 = vpop.f32.mrf.mxu0 }
 0x1a8   :  { %v1137_v15 = vadd.f32 %v1136_v14, %v1008_v57  ;;  %v1265_v1 = vpop.f32.mrf.mxu3  ;;  %v1010_v21 = vpop.f32.mrf.mxu1 }
 0x1a9   :  { %1349 = vperm.xlu1 %6197, %v267_v35   ;;  %v1011_v42 = vadd.f32 %v1010_v21, %v881_v17 }
 0x1aa   :  { %v7427_v22 = vadd.f32 %v1265_v1, %v1137_v15  ;;  %1564 = vmatmul.bf16.vlgmr.msrb.gmra.mxu0 %v1308_v41 }
 0x1ab   :  { %1613 = vmatmul.bf16.vlgmr.msrb.gmra.mxu1 %v1309_v53 }
 0x1ac   :  { %v1330_v24 = vpack.c.bf16 %v7427_v22, %v7419_v3  ;;  %v3433_v22 = vld [vmem:[%s9199_s13 + $0x28] sm:$0xff] }
 0x1af   :  { %v1139_v48 = vpop.f32.mrf.mxu2  ;;  %v883_v39 = vpop.f32.mrf.mxu0 }
 0x1b0   :  { %v1268_v20 = vpop.f32.mrf.mxu3  ;;  %v1012_v41 = vpop.f32.mrf.mxu1  ;;  %v1140_v49 = vadd.f32 %v1139_v48, %v1011_v42 }
 0x1b1   :  { %v1013_v50 = vadd.f32 %v1012_v41, %v883_v39 }
 0x1b2   :  { %v1269_v55 = vadd.f32 %v1268_v20, %v1140_v49 }
 0x1b7   :  { %v1141_v52 = vpop.f32.mrf.mxu2  ;;  %v886_v53 = vpop.f32.mrf.mxu0 }
 0x1b8   :  { %v1142_v19 = vadd.f32 %v1141_v52, %v1013_v50  ;;  %v1270_v51 = vpop.f32.mrf.mxu3  ;;  %v1015_v54 = vpop.f32.mrf.mxu1  ;;  %v2163_v52 = vld [vmem:[%s9198_s12 + $0x60] sm:$0xff] }
 0x1b9   :  { %v1016_v15 = vadd.f32 %v1015_v54, %v886_v53  ;;  %2630 = vperm.xlu0 %6196, %v2163_v52   ;;  %v2162_v54 = vld [vmem:[%s9198_s12 + $0x58] sm:$0xff] }
 0x1ba   :  { %v1271_v58 = vadd.f32 %v1270_v51, %v1142_v19  ;;  %1569 = vmatmul.bf16.gmra.mxu0 %v1311_v4 }
 0x1bb   :  { %1618 = vmatmul.bf16.gmra.mxu1 %v1312_v33 }
 0x1bc   :  { %v1310_v13 = vpack.c.bf16 %v1271_v58, %v1269_v55 }
 0x1be   :  { %1662 = vmatmul.bf16.vlgmr.msrb.gmra.mxu2 %v1310_v13 }
 0x1bf   :  { %v1144_v57 = vpop.f32.mrf.mxu2  ;;  %v888_v12 = vpop.f32.mrf.mxu0 }
 0x1c0   :  { %v1273_v7 = vpop.f32.mrf.mxu3  ;;  %v1017_v14 = vpop.f32.mrf.mxu1  ;;  %v1145_v1 = vadd.f32 %v1144_v57, %v1016_v15 }
 0x1c1   :  { %v1018_v17 = vadd.f32 %v1017_v14, %v888_v12  ;;  %2625 = vperm.xlu0 %6196, %v2162_v54  }
 0x1c2   :  { %v1274_v47 = vadd.f32 %v1273_v7, %v1145_v1 }
 0x1c7   :  { %v1146_v21 = vpop.f32.mrf.mxu2  ;;  %v891_v48 = vpop.f32.mrf.mxu0 }
 0x1c8   :  { %v1147_v35 = vadd.f32 %v1146_v21, %v1018_v17  ;;  %v1275_v43 = vpop.f32.mrf.mxu3  ;;  %v1020_v20 = vpop.f32.mrf.mxu1  ;;  %v2159_v17 = vld [vmem:[%s9198_s12 + $0x40] sm:$0xff] }
 0x1c9   :  { %v1021_v41 = vadd.f32 %v1020_v20, %v891_v48 }
 0x1ca   :  { %v1276_v2 = vadd.f32 %v1275_v43, %v1147_v35  ;;  %1574 = vmatmul.bf16.gmra.mxu0 %v1314_v32  ;;  %v2156_v43 = vld [vmem:[%s9198_s12 + $0x28] sm:$0xff] }
 0x1cb   :  { %1623 = vmatmul.bf16.gmra.mxu1 %v1315_v18  ;;  %v2165_v18 = vld [vmem:[%s9198_s12 + $0x70] sm:$0xff] }
 0x1cc   :  { %v1313_v4 = vpack.c.bf16 %v1276_v2, %v1274_v47  ;;  %2640 = vperm.xlu1 %6197, %v2165_v18   ;;  %v2166_v2 = vld [vmem:[%s9198_s12 + $0x78] sm:$0xff] }
 0x1cd   :  { %2645 = vperm.xlu2 %6198, %v2166_v2  }
 0x1ce   :  { %1667 = vmatmul.bf16.gmra.mxu2 %v1313_v4 }
 0x1cf   :  { %v1149_v59 = vpop.f32.mrf.mxu2  ;;  %v893_v33 = vpop.f32.mrf.mxu0 }
 0x1d0   :  { %v1278_v28 = vpop.f32.mrf.mxu3  ;;  %v1022_v39 = vpop.f32.mrf.mxu1  ;;  %v1150_v42 = vadd.f32 %v1149_v59, %v1021_v41 }
 0x1d1   :  { %v1023_v49 = vadd.f32 %v1022_v39, %v893_v33 }
 0x1d2   :  { %v1279_v45 = vadd.f32 %v1278_v28, %v1150_v42  ;;  %v2153_v42 = vld [vmem:[%s9198_s12 + $0x10] sm:$0xff] }
 0x1d5   :  { %2620 = vperm.xlu2 %6198, %v2161_v37  }
 0x1d7   :  { %v1151_v50 = vpop.f32.mrf.mxu2  ;;  %v896_v32 = vpop.f32.mrf.mxu0 }
 0x1d8   :  { %v1152_v10 = vadd.f32 %v1151_v50, %v1023_v49  ;;  %v1280_v30 = vpop.f32.mrf.mxu3  ;;  %v1025_v19 = vpop.f32.mrf.mxu1  ;;  %v9225_v50 = vpack.c.bf16 %v7343_v63, %v7296_v56  ;;  %v2152_v63 = vld [vmem:[%s9198_s12 + $0x8] sm:$0xff] }
 0x1d9   :  { %v1026_v60 = vadd.f32 %v1025_v19, %v896_v32  ;;  %v7506_v52 = vpop.permute.xlu2 %1384 }
 0x1da   :  { %v1281_v16 = vadd.f32 %v1280_v30, %v1152_v10  ;;  %1579 = vmatmul.bf16.gmra.mxu0 %v1317_v62  ;;  %v2164_v62 = vld [vmem:[%s9198_s12 + $0x68] sm:$0xff]  ;;  %v3435_v30 = vld [vmem:[%s9199_s13 + $0x38] sm:$0xff] }
 0x1db   :  { %1628 = vmatmul.bf16.gmra.mxu1 %v1318_v8  ;;  %2635 = vperm.xlu1 %6197, %v2164_v62   ;;  %v2157_v8 = vld [vmem:[%s9198_s12 + $0x30] sm:$0xff] }
 0x1dc   :  { %v1316_v51 = vpack.c.bf16 %v1281_v16, %v1279_v45  ;;  %2600 = vperm.xlu0 %6196, %v2157_v8   ;;  %v7534_v8 = vpop.permute.xlu0 %1404 }
 0x1de   :  { %1672 = vmatmul.bf16.gmra.mxu2 %v1316_v51  ;;  %v3430_v51 = vld [vmem:[%s9199_s13 + $0x10] sm:$0xff] }
 0x1df   :  { %v1154_v53 = vpop.f32.mrf.mxu2  ;;  %v898_v58 = vpop.f32.mrf.mxu0 }
 0x1e0   :  { %v1283_v55 = vpop.f32.mrf.mxu3  ;;  %v1027_v38 = vpop.f32.mrf.mxu1  ;;  %v1155_v13 = vadd.f32 %v1154_v53, %v1026_v60  ;;  %v2160_v53 = vld [vmem:[%s9198_s12 + $0x48] sm:$0xff] }
 0x1e1   :  { %v1028_v26 = vadd.f32 %v1027_v38, %v898_v58  ;;  %2615 = vperm.xlu2 %6198, %v2160_v53  }
 0x1e2   :  { %v1284_v15 = vadd.f32 %v1283_v55, %v1155_v13  ;;  %v9226_v13 = vpack.c.bf16 %v7067_v34, %v7041_v9  ;;  %v21_v9 = vstv %s9200_s15  ;;  %v2155_v34 = vld [vmem:[%s9198_s12 + $0x20] sm:$0xff] }
 0x1e3   :  { %2610 = vperm.xlu1 %6197, %v2159_v17   ;;  %22 = vst [vmem:[#allocation2] sm:$0x1] %v21_v9 }
 0x1e4   :  { %2595 = vperm.xlu0 %6196, %v2156_v43   ;;  %v2154_v43 = vld [vmem:[%s9198_s12 + $0x18] sm:$0xff] }
 0x1e6   :  { %v7517_v18 = vpop.permute.xlu2 %1389 }
 0x1e7   :  { %v1156_v5 = vpop.f32.mrf.mxu2  ;;  %v901_v12 = vpop.f32.mrf.mxu0 }
 0x1e8   :  { %v1157_v57 = vadd.f32 %v1156_v5, %v1028_v26  ;;  %v1285_v7 = vpop.f32.mrf.mxu3  ;;  %v1030_v14 = vpop.f32.mrf.mxu1  ;;  %v3432_v26 = vld [vmem:[%s9199_s13 + $0x20] sm:$0xff] }
 0x1e9   :  { %v1031_v27 = vadd.f32 %v1030_v14, %v901_v12  ;;  %2590 = vperm.xlu2 %6198, %v2155_v34  }
 0x1ea   :  { %v1286_v1 = vadd.f32 %v1285_v7, %v1157_v57  ;;  %1584 = vmatmul.bf16.gmra.mxu0 %v1320_v29  ;;  %v2158_v29 = vld [vmem:[%s9198_s12 + $0x38] sm:$0xff]  ;;  %v3429_v7 = vld [vmem:[%s9199_s13 + $0x8] sm:$0xff] }
 0x1eb   :  { %1633 = vmatmul.bf16.gmra.mxu1 %v1321_v25  ;;  %2605 = vperm.xlu1 %6197, %v2158_v29   ;;  %v2151_v25 = vld [vmem:[%s9198_s12] sm:$0xff] }
 0x1ec   :  { %v1319_v21 = vpack.c.bf16 %v1286_v1, %v1284_v15  ;;  %2570 = vperm.xlu0 %6196, %v2151_v25   ;;  %v3431_v15 = vld [vmem:[%s9199_s13 + $0x18] sm:$0xff]  ;;  %v4100_v25 = vld [vmem:[%s9201_s14] sm:$0xff] }
 0x1ee   :  { %1677 = vmatmul.bf16.gmra.mxu2 %v1319_v21  ;;  %v7545_v14 = vpop.permute.xlu2 %1364 }
 0x1ef   :  { %v1159_v35 = vpop.f32.mrf.mxu2  ;;  %v903_v20 = vpop.f32.mrf.mxu0 }
 0x1f0   :  { %v1288_v48 = vpop.f32.mrf.mxu3  ;;  %v1032_v6 = vpop.f32.mrf.mxu1  ;;  %v1160_v47 = vadd.f32 %v1159_v35, %v1031_v27  ;;  %v4519_v35 = vld [vmem:[#allocation2] sm:$0x1] }
 0x1f1   :  { %v1033_v31 = vadd.f32 %v1032_v6, %v903_v20  ;;  %2585 = vperm.xlu2 %6198, %v2154_v43  }
 0x1f2   :  { %v1289_v39 = vadd.f32 %v1288_v48, %v1160_v47  ;;  %v7553_v47 = vpop.permute.xlu0 %1409 }
 0x1f3   :  { %2580 = vperm.xlu1 %6197, %v2153_v42  }
 0x1f4   :  { %3634 = vperm.xlu0 %6196, %v3435_v30  }
 0x1f7   :  { %v1161_v23 = vpop.f32.mrf.mxu2  ;;  %v906_v28 = vpop.f32.mrf.mxu0 }
 0x1f8   :  { %v1162_v4 = vadd.f32 %v1161_v23, %v1033_v31  ;;  %v1290_v59 = vpop.f32.mrf.mxu3  ;;  %v1035_v33 = vpop.f32.mrf.mxu1  ;;  %v9227_v23 = vpack.c.bf16 %v7097_v11, %v7071_v46 }
 0x1f9   :  { %v1036_v56 = vadd.f32 %v1035_v33, %v906_v28  ;;  %v3434_v28 = vld [vmem:[%s9199_s13 + $0x30] sm:$0xff] }
 0x1fa   :  { %v1291_v41 = vadd.f32 %v1290_v59, %v1162_v4  ;;  %1589 = vmatmul.bf16.gmra.mxu0 %v1323_v0  ;;  %v7564_v4 = vpop.permute.xlu2 %1359  ;;  %3629 = vperm.xlu2 %6198, %v3434_v28  }
 0x1fb   :  { %1638 = vmatmul.bf16.gmra.mxu1 %v9225_v50  ;;  %2575 = vperm.xlu1 %6197, %v2152_v63  }
 0x1fc   :  { %v1322_v49 = vpack.c.bf16 %v1291_v41, %v1289_v39  ;;  %3609 = vperm.xlu0 %6196, %v3430_v51   ;;  %v1375_v41 = vpop.permute.xlu0 %1374 }
 0x1fe   :  { %1682 = vmatmul.bf16.gmra.mxu2 %v1322_v49 }
 0x1ff   :  { %v1164_v10 = vpop.f32.mrf.mxu2  ;;  %v908_v0 = vpop.f32.mrf.mxu0 }
 0x200   :  { %v1293_v61 = vpop.f32.mrf.mxu3  ;;  %v1037_v32 = vpop.f32.mrf.mxu1  ;;  %v1165_v19 = vadd.f32 %v1164_v10, %v1036_v56 }
 0x201   :  { %v1038_v45 = vadd.f32 %v1037_v32, %v908_v0  ;;  %v7572_v32 = vpop.permute.xlu1 %1394 }
 0x202   :  { %v1294_v60 = vadd.f32 %v1293_v61, %v1165_v19  ;;  %v1335_v50 = vpop.permute.xlu2 %1334  ;;  %3624 = vperm.xlu2 %6198, %v3433_v22  }
 0x203   :  { %3619 = vperm.xlu1 %6197, %v3432_v26  }
 0x204   :  { %3604 = vperm.xlu0 %6196, %v3429_v7  }
 0x207   :  { %v1166_v16 = vpop.f32.mrf.mxu2  ;;  %v911_v58 = vpop.f32.mrf.mxu0 }
 0x208   :  { %v1167_v54 = vadd.f32 %v1166_v16, %v1038_v45  ;;  %v1295_v55 = vpop.f32.mrf.mxu3  ;;  %v1040_v38 = vpop.f32.mrf.mxu1  ;;  %v3428_v16 = vld [vmem:[%s9199_s13] sm:$0xff] }
 0x209   :  { %v7574_v45 = vpop.permute.xlu0 %1369 }
 0x20a   :  { %v1296_v62 = vadd.f32 %v1295_v55, %v1167_v54  ;;  %1594 = vmatmul.bf16.gmra.mxu0 %v9226_v13  ;;  %3599 = vperm.xlu2 %6198, %v3428_v16   ;;  %v7579_v54 = vpop.permute.xlu1 %1399  ;;  %v4101_v55 = vld [vmem:[%s9201_s14 + $0x8] sm:$0xff] }
 0x20b   :  { %1643 = vmatmul.bf16.gmra.mxu1 %v1327_v44  ;;  %v1041_v44 = vadd.f32 %v1040_v38, %v911_v58  ;;  %3614 = vperm.xlu1 %6197, %v3431_v15  }
 0x20c   :  { %v1325_v5 = vpack.c.bf16 %v1296_v62, %v1294_v60  ;;  %4548 = vperm.xlu0 %6196, %v4519_v35  }
 0x20e   :  { %1687 = vmatmul.bf16.gmra.mxu2 %v1325_v5 }
 0x20f   :  { %v1169_v57 = vpop.f32.mrf.mxu2  ;;  %v913_v36 = vpop.f32.mrf.mxu0 }
 0x210   :  { %v1298_v12 = vpop.f32.mrf.mxu3  ;;  %v1042_v40 = vpop.f32.mrf.mxu1  ;;  %v1170_v1 = vadd.f32 %v1169_v57, %v1041_v44 }
 0x211   :  { %v1043_v17 = vadd.f32 %v1042_v40, %v913_v36  ;;  %v1345_v58 = vpop.permute.xlu0 %1344 }
 0x212   :  { %v1299_v29 = vadd.f32 %v1298_v12, %v1170_v1  ;;  %4179 = vperm.xlu2 %6198, %v4101_v55   ;;  %v1380_v26 = vpop.permute.xlu1 %1379 }
 0x213   :  { %4174 = vperm.xlu1 %6197, %v4100_v25  }
 0x217   :  { %v1171_v21 = vpop.f32.mrf.mxu2  ;;  %v916_v6 = vpop.f32.mrf.mxu0 }
 0x218   :  { %v1172_v48 = vadd.f32 %v1171_v21, %v1043_v17  ;;  %v1300_v20 = vpop.f32.mrf.mxu3  ;;  %v1045_v27 = vpop.f32.mrf.mxu1 }
 0x219   :  { %v1046_v39 = vadd.f32 %v1045_v27, %v916_v6 }
 0x21a   :  { %v1301_v31 = vadd.f32 %v1300_v20, %v1172_v48  ;;  %1599 = vmatmul.bf16.gmra.mxu0 %v9227_v23  ;;  %v1355_v34 = vpop.permute.xlu1 %1354 }
 0x21b   :  { %1648 = vmatmul.bf16.gmra.mxu1 %v1330_v24 }
 0x21c   :  { %v1328_v2 = vpack.c.bf16 %v1301_v31, %v1299_v29 }
 0x21e   :  { %1692 = vmatmul.bf16.gmra.mxu2 %v1328_v2 }
 0x21f   :  { %v1174_v59 = vpop.f32.mrf.mxu2  ;;  %v918_v11 = vpop.f32.mrf.mxu0 }
 0x220   :  { %v1303_v46 = vpop.f32.mrf.mxu3  ;;  %v1047_v33 = vpop.f32.mrf.mxu1  ;;  %v1175_v42 = vadd.f32 %v1174_v59, %v1046_v39 }
 0x221   :  { %v1048_v49 = vadd.f32 %v1047_v33, %v918_v11 }
 0x222   :  { %v1304_v0 = vadd.f32 %v1303_v46, %v1175_v42  ;;  %v1350_v16 = vpop.permute.xlu1 %1349 }
 0x227   :  { %v1176_v3 = vpop.f32.mrf.mxu2  ;;  %v1565_v10 = vpop.f32.mrf.mxu0 }
 0x228   :  { %v1177_v24 = vadd.f32 %v1176_v3, %v1048_v49  ;;  %v1305_v30 = vpop.f32.mrf.mxu3  ;;  %v1566_v37 = vadd.f32 %v1565_v10, %v1335_v50  ;;  %v1614_v61 = vpop.f32.mrf.mxu1 }
 0x22a   :  { %v1306_v56 = vadd.f32 %v1305_v30, %v1177_v24  ;;  %v1615_v63 = vadd.f32 %v1614_v61, %v1566_v37  ;;  %v1340_v37 = vpop.permute.xlu0 %1339 }
 0x22c   :  { %v1331_v19 = vpack.c.bf16 %v1306_v56, %v1304_v0 }
 0x22e   :  { %1697 = vmatmul.bf16.gmra.mxu2 %v1331_v19 }
 0x22f   :  { %v1567_v51 = vpop.f32.mrf.mxu0 }
 0x230   :  { %v1616_v53 = vpop.f32.mrf.mxu1  ;;  %v1568_v61 = vadd.f32 %v1567_v51, %v1340_v37 }
 0x232   :  { %v1617_v56 = vadd.f32 %v1616_v53, %v1568_v61 }
 0x237   :  { %v1570_v38 = vpop.f32.mrf.mxu0 }
 0x238   :  { %v1571_v60 = vadd.f32 %v1570_v38, %v1345_v58  ;;  %v1619_v62 = vpop.f32.mrf.mxu1 }
 0x23a   :  { %v1620_v13 = vadd.f32 %v1619_v62, %v1571_v60 }
 0x23f   :  { %v1572_v5 = vpop.f32.mrf.mxu0 }
 0x240   :  { %v1621_v57 = vpop.f32.mrf.mxu1  ;;  %v1573_v58 = vadd.f32 %v1572_v5, %v1350_v16 }
 0x241   :  { %v1663_v7 = vpop.f32.mrf.mxu2 }
 0x242   :  { %v7584_v9 = vadd.f32 %v1663_v7, %v1615_v63  ;;  %v1622_v7 = vadd.f32 %v1621_v57, %v1573_v58 }
 0x244   :  { %9228 = vst [vmem:[#allocation3_spill] sm:$0xff] %v7584_v9  ;;  %v5220_v63 = vmul.f32 -1.442695, %v7584_v9 }
 0x246   :  { %6199 = vpow2.f32 %v5220_v63 }
 0x247   :  { %v1575_v12 = vpop.f32.mrf.mxu0 }
 0x248   :  { %v1576_v36 = vadd.f32 %v1575_v12, %v1355_v34  ;;  %v1624_v40 = vpop.f32.mrf.mxu1 }
 0x249   :  { %v1665_v44 = vpop.f32.mrf.mxu2 }
 0x24a   :  { %v1625_v15 = vadd.f32 %v1624_v40, %v1576_v36  ;;  %v7596_v55 = vadd.f32 %v1665_v44, %v1617_v56 }
 0x24c   :  { %9232 = vst [vmem:[#allocation7_spill] sm:$0xff] %v7596_v55  ;;  %v5221_v38 = vmul.f32 -1.442695, %v7596_v55  ;;  %v6200_v34 = vpop.eup %6199 }
 0x24d   :  { %v7603_v44 = vadd.f32 1.0, %v6200_v34 }
 0x24e   :  { %6201 = vpow2.f32 %v5221_v38 }
 0x24f   :  { %v1577_v1 = vpop.f32.mrf.mxu0  ;;  %9234 = vst [vmem:[#allocation9_spill] sm:$0xff] %v7603_v44  ;;  %6203 = vrcp.f32 %v7603_v44 }
 0x250   :  { %v1626_v17 = vpop.f32.mrf.mxu1  ;;  %v1578_v60 = vadd.f32 %v1577_v1, %v7564_v4 }
 0x251   :  { %v1668_v21 = vpop.f32.mrf.mxu2 }
 0x252   :  { %v7586_v35 = vadd.f32 %v1668_v21, %v1620_v13  ;;  %v1627_v53 = vadd.f32 %v1626_v17, %v1578_v60 }
 0x254   :  { %9229 = vst [vmem:[#allocation4_spill] sm:$0xff] %v7586_v35  ;;  %v5222_v4 = vmul.f32 -1.442695, %v7586_v35 }
 0x256   :  { %6205 = vpow2.f32 %v5222_v4 }
 0x257   :  { %v1580_v43 = vpop.f32.mrf.mxu0 }
 0x258   :  { %v1581_v48 = vadd.f32 %v1580_v43, %v7545_v14  ;;  %v1629_v20 = vpop.f32.mrf.mxu1 }
 0x259   :  { %v1670_v6 = vpop.f32.mrf.mxu2 }
 0x25a   :  { %v1630_v27 = vadd.f32 %v1629_v20, %v1581_v48  ;;  %v7601_v12 = vadd.f32 %v1670_v6, %v1622_v7 }
 0x25c   :  { %9233 = vst [vmem:[#allocation8_spill] sm:$0xff] %v7601_v12  ;;  %v5223_v57 = vmul.f32 -1.442695, %v7601_v12 }
 0x25e   :  { %6207 = vpow2.f32 %v5223_v57 }
 0x25f   :  { %v1582_v29 = vpop.f32.mrf.mxu0 }
 0x260   :  { %v1631_v31 = vpop.f32.mrf.mxu1  ;;  %v1583_v51 = vadd.f32 %v1582_v29, %v7574_v45  ;;  %v6202_v45 = vpop.eup %6201 }
 0x261   :  { %v1673_v23 = vpop.f32.mrf.mxu2 }
 0x262   :  { %v7589_v25 = vadd.f32 %v1673_v23, %v1625_v15  ;;  %v1632_v1 = vadd.f32 %v1631_v31, %v1583_v51  ;;  %v7621_v23 = vadd.f32 1.0, %v6202_v45 }
 0x264   :  { %9230 = vst [vmem:[#allocation5_spill] sm:$0xff] %v7589_v25  ;;  %v5224_v17 = vmul.f32 -1.442695, %v7589_v25 }
 0x266   :  { %6209 = vpow2.f32 %v5224_v17 }
 0x267   :  { %v1585_v2 = vpop.f32.mrf.mxu0 }
 0x268   :  { %v1586_v59 = vadd.f32 %v1585_v2, %v1375_v41  ;;  %v1634_v46 = vpop.f32.mrf.mxu1 }
 0x269   :  { %v1675_v28 = vpop.f32.mrf.mxu2 }
 0x26a   :  { %v1635_v11 = vadd.f32 %v1634_v46, %v1586_v59  ;;  %v7605_v15 = vadd.f32 %v1675_v28, %v1627_v53 }
 0x26c   :  { %9235 = vst [vmem:[#allocation10_spill] sm:$0xff] %v7605_v15 }
 0x26f   :  { %v1587_v42 = vpop.f32.mrf.mxu0 }
 0x270   :  { %v1636_v50 = vpop.f32.mrf.mxu1  ;;  %v1588_v40 = vadd.f32 %v1587_v42, %v1380_v26 }
 0x271   :  { %v1678_v33 = vpop.f32.mrf.mxu2 }
 0x272   :  { %v7591_v39 = vadd.f32 %v1678_v33, %v1630_v27  ;;  %v1637_v48 = vadd.f32 %v1636_v50, %v1588_v40  ;;  %v7632_v50 = vpop.eup %6203 }
 0x274   :  { %9231 = vst [vmem:[#allocation6_spill] sm:$0xff] %v7591_v39  ;;  %v5226_v29 = vmul.f32 -1.442695, %v7591_v39 }
 0x277   :  { %v1590_v14 = vpop.f32.mrf.mxu0 }
 0x278   :  { %v1639_v24 = vpop.f32.mrf.mxu1  ;;  %v1591_v5 = vadd.f32 %v1590_v14, %v7506_v52  ;;  %v5225_v52 = vmul.f32 -1.442695, %v7605_v15 }
 0x279   :  { %v1680_v49 = vpop.f32.mrf.mxu2 }
 0x27a   :  { %v7612_v20 = vadd.f32 %v1680_v49, %v1632_v1  ;;  %v1640_v6 = vadd.f32 %v1639_v24, %v1591_v5  ;;  %6211 = vpow2.f32 %v5225_v52  ;;  %v6206_v24 = vpop.eup %6205 }
 0x27b   :  { %6213 = vpow2.f32 %v5226_v29 }
 0x27c   :  { %9236 = vst [vmem:[#allocation11_spill] sm:$0xff] %v7612_v20  ;;  %6215 = vrcp.f32 %v7621_v23 }
 0x27f   :  { %v1592_v10 = vpop.f32.mrf.mxu0 }
 0x280   :  { %v1641_v0 = vpop.f32.mrf.mxu1  ;;  %v1593_v26 = vadd.f32 %v1592_v10, %v7517_v18  ;;  %v5227_v18 = vmul.f32 -1.442695, %v7612_v20 }
 0x281   :  { %v1683_v3 = vpop.f32.mrf.mxu2 }
 0x282   :  { %v7593_v22 = vadd.f32 %v1683_v3, %v1635_v11  ;;  %v1642_v28 = vadd.f32 %v1641_v0, %v1593_v26  ;;  %6217 = vpow2.f32 %v5227_v18 }
 0x284   :  { %v5228_v46 = vmul.f32 -1.442695, %v7593_v22 }
 0x286   :  { %6219 = vpow2.f32 %v5228_v46 }
 0x287   :  { %v1595_v19 = vpop.f32.mrf.mxu0 }
 0x288   :  { %v1644_v62 = vpop.f32.mrf.mxu1  ;;  %v1596_v21 = vadd.f32 %v1595_v19, %v7572_v32  ;;  %v7642_v19 = vadd.f32 1.0, %v6206_v24 }
 0x289   :  { %v1685_v30 = vpop.f32.mrf.mxu2 }
 0x28a   :  { %v7618_v31 = vadd.f32 %v1685_v30, %v1637_v48  ;;  %v1645_v2 = vadd.f32 %v1644_v62, %v1596_v21  ;;  %v6208_v30 = vpop.eup %6207 }
 0x28b   :  { %v6210_v61 = vpop.eup %6209  ;;  %v7644_v38 = vadd.f32 1.0, %v6208_v30 }
 0x28c   :  { %v5229_v42 = vmul.f32 -1.442695, %v7618_v31  ;;  %v6212_v63 = vpop.eup %6211  ;;  %v7648_v62 = vadd.f32 1.0, %v6210_v61 }
 0x28d   :  { %v6214_v58 = vpop.eup %6213 }
 0x28e   :  { %6221 = vpow2.f32 %v5229_v42  ;;  %v7646_v60 = vpop.eup %6215  ;;  %v7653_v51 = vadd.f32 1.0, %v6214_v58  ;;  %v1768_v42 = vmul.f32 %v7632_v50, %v7603_v44 }
 0x28f   :  { %v1597_v36 = vpop.f32.mrf.mxu0 }
 0x290   :  { %v1646_v27 = vpop.f32.mrf.mxu1  ;;  %v1598_v32 = vadd.f32 %v1597_v36, %v7579_v54 }
 0x291   :  { %v1688_v41 = vpop.f32.mrf.mxu2 }
 0x292   :  { %v7623_v59 = vadd.f32 %v1688_v41, %v1640_v6  ;;  %v1647_v54 = vadd.f32 %v1646_v27, %v1598_v32 }
 0x294   :  { %v5230_v14 = vmul.f32 -1.442695, %v7623_v59 }
 0x296   :  { %6223 = vpow2.f32 %v5230_v14 }
 0x297   :  { %v1600_v11 = vpop.f32.mrf.mxu0 }
 0x298   :  { %v1601_v0 = vadd.f32 %v1600_v11, %v7534_v8  ;;  %v1649_v16 = vpop.f32.mrf.mxu1  ;;  %v7650_v8 = vadd.f32 1.0, %v6212_v63 }
 0x299   :  { %v1690_v13 = vpop.f32.mrf.mxu2 }
 0x29a   :  { %v7630_v49 = vadd.f32 %v1690_v13, %v1642_v28  ;;  %v6218_v13 = vpop.eup %6217  ;;  %v1650_v7 = vadd.f32 %v1649_v16, %v1601_v0 }
 0x29b   :  { %v6220_v34 = vpop.eup %6219  ;;  %v7659_v1 = vadd.f32 1.0, %v6218_v13 }
 0x29c   :  { %v5231_v41 = vmul.f32 -1.442695, %v7630_v49  ;;  %v6222_v40 = vpop.eup %6221  ;;  %v7662_v21 = vadd.f32 1.0, %v6220_v34 }
 0x29d   :  { %v6224_v4 = vpop.eup %6223  ;;  %v7667_v48 = vadd.f32 1.0, %v6222_v40 }
 0x29e   :  { %v7669_v52 = vadd.f32 1.0, %v6224_v4 }
 0x29f   :  { %v1602_v53 = vpop.f32.mrf.mxu0  ;;  %vm1907_vm14 = vweird.f32 %v7667_v48 }
 0x2a0   :  { %v1651_v27 = vpop.f32.mrf.mxu1  ;;  %vm1922_vm8 = vweird.f32 %v7669_v52 }
 0x2a1   :  { %v1693_v43 = vpop.f32.mrf.mxu2 }
 0x2a2   :  { %v7627_v33 = vadd.f32 %v1693_v43, %v1645_v2  ;;  %v1603_v43 = vadd.f32 %v1602_v53, %v7553_v47 }
 0x2a4   :  { %v5232_v37 = vmul.f32 -1.442695, %v7627_v33  ;;  %v1652_v47 = vadd.f32 %v1651_v27, %v1603_v43 }
 0x2a9   :  { %v1695_v3 = vpop.f32.mrf.mxu2 }
 0x2aa   :  { %v7636_v10 = vadd.f32 %v1695_v3, %v1647_v54  ;;  %v1783_v3 = vmul.f32 %v7646_v60, %v7621_v23 }
 0x2ac   :  { %v5233_v56 = vmul.f32 -1.442695, %v7636_v10  ;;  %v1784_v58 = vsub.f32 1.0, %v1783_v3 }
 0x2ae   :  { %6225 = vpow2.f32 %v5233_v56  ;;  %v1769_v56 = vsub.f32 1.0, %v1768_v42 }
 0x2af   :  { %6227 = vpow2.f32 %v5232_v37 }
 0x2b0   :  { %6229 = vpow2.f32 %v5231_v41  ;;  %v7725_v4 = vmul.f32 %v7632_v50, %v1769_v56 }
 0x2b1   :  { %6231 = vrcp.f32 %v7642_v19  ;;  %v1698_v36 = vpop.f32.mrf.mxu2 }
 0x2b2   :  { %6233 = vrcp.f32 %v7644_v38  ;;  %v7656_v5 = vadd.f32 %v1698_v36, %v1650_v7  ;;  %9237 = vst [vmem:[#allocation12_spill] sm:$0xff] %v7725_v4 }
 0x2b3   :  { %6235 = vrcp.f32 %v7648_v62 }
 0x2b4   :  { %v6226_v57 = vpop.eup %6225  ;;  %6237 = vrcp.f32 %v7650_v8  ;;  %v5234_v45 = vmul.f32 -1.442695, %v7656_v5 }
 0x2b5   :  { %v6228_v17 = vpop.eup %6227  ;;  %6239 = vrcp.f32 %v7653_v51  ;;  %v7674_v29 = vadd.f32 1.0, %v6226_v57 }
 0x2b6   :  { %v6230_v26 = vpop.eup %6229  ;;  %6241 = vpow2.f32 %v5234_v45  ;;  %v7679_v2 = vadd.f32 1.0, %v6228_v17 }
 0x2b7   :  { %v7671_v6 = vpop.eup %6231  ;;  %6243 = vrcp.f32 %v7659_v1  ;;  %v7684_v28 = vadd.f32 1.0, %v6230_v26  ;;  %vm1967_vm6 = vweird.f32 %v7674_v29 }
 0x2b8   :  { %v7676_v32 = vpop.eup %6233  ;;  %6245 = vrcp.f32 %v7662_v21  ;;  %v1798_v30 = vmul.f32 %v7671_v6, %v7642_v19  ;;  %vm1952_vm0 = vweird.f32 %v7679_v2 }
 0x2b9   :  { %v7681_v18 = vpop.eup %6235  ;;  %6247 = vrcp.f32 %v7667_v48  ;;  %v1700_v46 = vpop.f32.mrf.mxu2  ;;  %v1813_v16 = vmul.f32 %v7676_v32, %v7644_v38  ;;  %vm1937_vm4 = vweird.f32 %v7684_v28 }
 0x2ba   :  { %v7686_v11 = vpop.eup %6237  ;;  %6249 = vrcp.f32 %v7669_v52  ;;  %v7691_v54 = vadd.f32 %v1700_v46, %v1652_v47  ;;  %v1799_v7 = vsub.f32 1.0, %v1798_v30  ;;  %v1828_v34 = vmul.f32 %v7681_v18, %v7648_v62 }
 0x2bb   :  { %v7693_v14 = vpop.eup %6239  ;;  %6251 = vrcp.f32 %v7674_v29  ;;  %v1843_v36 = vmul.f32 %v7686_v11, %v7650_v8  ;;  %v1814_v27 = vsub.f32 1.0, %v1813_v16  ;;  %v7738_v46 = vmul.f32 %v7646_v60, %v1784_v58 }
 0x2bc   :  { %v6242_v24 = vpop.eup %6241  ;;  %6253 = vrcp.f32 %v7679_v2  ;;  %v5235_v37 = vmul.f32 -1.442695, %v7691_v54  ;;  %v1858_v57 = vmul.f32 %v7693_v14, %v7653_v51  ;;  %v7741_v3 = vmul.f32 %v7671_v6, %v1799_v7 }
 0x2bd   :  { %v7702_v61 = vpop.eup %6243  ;;  %6255 = vrcp.f32 %v7684_v28  ;;  %v7705_v0 = vadd.f32 1.0, %v6242_v24  ;;  %9238 = vst [vmem:[#allocation13_spill] sm:$0xff] %v7738_v46  ;;  %v1829_v24 = vsub.f32 1.0, %v1828_v34  ;;  %v1844_v47 = vsub.f32 1.0, %v1843_v36 }
 0x2be   :  { %v7707_v41 = vpop.eup %6245  ;;  %6257 = vpow2.f32 %v5235_v37  ;;  %v1873_v43 = vmul.f32 %v7702_v61, %v7659_v1  ;;  %9239 = vst [vmem:[#allocation14_spill] sm:$0xff] %v7741_v3  ;;  %v1859_v7 = vsub.f32 1.0, %v1858_v57  ;;  %v7762_v25 = vmul.f32 %v7676_v32, %v1814_v27 }
 0x2bf   :  { %v7709_v63 = vpop.eup %6247  ;;  %6259 = vrcp.f32 %v7705_v0  ;;  %v1888_v26 = vmul.f32 %v7707_v41, %v7662_v21  ;;  %vm1982_vm9 = vweird.f32 %v7705_v0 }
 0x2c0   :  { %v7714_v13 = vpop.eup %6249  ;;  %v1903_v37 = vmul.f32 %v7709_v63, %v7667_v48  ;;  %v1874_v55 = vsub.f32 1.0, %v1873_v43  ;;  %v7769_v43 = vmul.f32 %v7686_v11, %v1844_v47  ;;  %vm1908_vm10 = vweird.f32 %v7709_v63 }
 0x2c1   :  { %v7718_v53 = vpop.eup %6251  ;;  %v1918_v16 = vmul.f32 %v7714_v13, %v7669_v52  ;;  %v1889_v35 = vsub.f32 1.0, %v1888_v26  ;;  %v7772_v26 = vmul.f32 %v7693_v14, %v1859_v7  ;;  %vm1923_vm2 = vweird.f32 %v7714_v13 }
 0x2c2   :  { %v7722_v40 = vpop.eup %6253  ;;  %v1963_v30 = vmul.f32 %v7718_v53, %v7674_v29  ;;  %v1904_v44 = vsub.f32 1.0, %v1903_v37  ;;  %v7776_v39 = vmul.f32 %v7702_v61, %v1874_v55  ;;  %vm1968_vm7 = vweird.f32 %v7718_v53 }
 0x2c3   :  { %v7732_v17 = vpop.eup %6255  ;;  %v1948_v58 = vmul.f32 %v7722_v40, %v7679_v2  ;;  %v1919_v15 = vsub.f32 1.0, %v1918_v16  ;;  %vm1953_vm5 = vweird.f32 %v7722_v40  ;;  %v1971_v37 = vand.u32 2147483647, %v7674_v29  ;;  %vm7829_vm15 = vmor %vm1967_vm6, %vm1968_vm7 }
 0x2c4   :  { %v6258_v42 = vpop.eup %6257  ;;  %v1933_v9 = vmul.f32 %v7732_v17, %v7684_v28  ;;  %v1964_v57 = vsub.f32 1.0, %v1963_v30  ;;  %vm1938_vm1 = vweird.f32 %v7732_v17  ;;  %v1958_v7 = vand.u32 2147483648, %v7679_v2 }
 0x2c5   :  { %v7747_v56 = vpop.eup %6259  ;;  %v7753_v45 = vadd.f32 1.0, %v6258_v42  ;;  %v7765_v42 = vmul.f32 %v7681_v18, %v1829_v24  ;;  %v1949_v4 = vsub.f32 1.0, %v1948_v58  ;;  %v7779_v24 = vmul.f32 %v7707_v41, %v1889_v35 }
 0x2c6   :  { %v1978_v34 = vmul.f32 %v7747_v56, %v7705_v0  ;;  %v1934_v27 = vsub.f32 1.0, %v1933_v9  ;;  %v1965_v47 = vmul.f32 %v7718_v53, %v1964_v57  ;;  %v1905_v9 = vmul.f32 %v7709_v63, %v1904_v44 }
 0x2c7   :  { %6261 = vrcp.f32 %v7753_v45  ;;  %v1920_v55 = vmul.f32 %v7714_v13, %v1919_v15  ;;  %v1950_v35 = vmul.f32 %v7722_v40, %v1949_v4  ;;  %vm1983_vm3 = vweird.f32 %v7747_v56 }
 0x2c8   :  { %v1979_v36 = vsub.f32 1.0, %v1978_v34  ;;  %v1935_v46 = vmul.f32 %v7732_v17, %v1934_v27  ;;  %v1988_v44 = vand.u32 2147483648, %v7705_v0  ;;  %v1966_v4 = vadd.f32 %v7718_v53, %v1965_v47  ;;  %vm7810_vm11 = vmor %vm1982_vm9, %vm1983_vm3 }
 0x2c9   :  { %v1951_v27 = vadd.f32 %v7722_v40, %v1950_v35  ;;  %v2003_v30 = vand.u32 2147483648, %v7753_v45  ;;  %v1973_v58 = vand.u32 2147483648, %v7674_v29  ;;  %v2001_v35 = vand.u32 2147483647, %v7753_v45  ;;  %vm7839_vm9 = vmor %vm1952_vm0, %vm1953_vm5 }
 0x2ca   :  { %v1980_v12 = vmul.f32 %v7747_v56, %v1979_v36  ;;  %v1989_v20 = vor.u32 1.1754944e-38, %v1988_v44  ;;  %vm1997_vm12 = vweird.f32 %v7753_v45  ;;  %v1970_v29 = vsel %vm7829_vm15, %v7718_v53, %v1966_v4 }
 0x2cb   :  { %vm1878_vm6 = vweird.f32 %v7702_v61  ;;  %vm1863_vm0 = vweird.f32 %v7693_v14  ;;  %vm2002_vm5 = vcmp.eq.f32.partialorder %v2001_v35, 8.507059e+37  ;;  %vm1972_vm3 = vcmp.eq.f32.partialorder %v1971_v37, 8.507059e+37 }
 0x2cc   :  { %v1981_v36 = vadd.f32 %v7747_v56, %v1980_v12  ;;  %v1986_v12 = vand.u32 2147483647, %v7705_v0  ;;  %vm1877_vm15 = vweird.f32 %v7659_v1  ;;  %v1959_v53 = vor.u32 1.1754944e-38, %v1958_v7 }
 0x2cd   :  { %v6262_v34 = vpop.eup %6261  ;;  %v1891_v7 = vadd.f32 %v7707_v41, %v7779_v24  ;;  %v1898_v35 = vand.u32 2147483648, %v7662_v21 }
 0x2ce   :  { %v1993_v57 = vmul.f32 %v6262_v34, %v7753_v45  ;;  %v1985_v0 = vsel %vm7810_vm11, %v7747_v56, %v1981_v36  ;;  %vm1998_vm13 = vweird.f32 %v6262_v34  ;;  %v1936_v56 = vadd.f32 %v7732_v17, %v1935_v46 }
 0x2cf   :  { %vm1987_vm11 = vcmp.eq.f32.partialorder %v1986_v12, 8.507059e+37  ;;  %v1921_v46 = vadd.f32 %v7714_v13, %v1920_v55  ;;  %vm1999_vm7 = vmor %vm1997_vm12, %vm1998_vm13  ;;  %v1955_v12 = vsel %vm7839_vm9, %v7722_v40, %v1951_v27  ;;  %vm1862_vm13 = vweird.f32 %v7653_v51 }
 0x2d0   :  { %v1994_v15 = vsub.f32 1.0, %v1993_v57  ;;  %v1956_v57 = vand.u32 2147483647, %v7679_v2  ;;  %v1990_v44 = vsel %vm1987_vm11, %v1989_v20, %v1985_v0  ;;  %v2004_v2 = vor.u32 1.1754944e-38, %v2003_v30  ;;  %vm7859_vm12 = vmor %vm1937_vm4, %vm1938_vm1 }
 0x2d1   :  { %v1906_v30 = vadd.f32 %v7709_v63, %v1905_v9  ;;  %v2021_v40 = vmul.f32 %v1990_v44, %v7656_v5  ;;  %vm7877_vm1 = vmor %vm1922_vm8, %vm1923_vm2  ;;  %v1913_v55 = vand.u32 2147483648, %v7667_v48  ;;  %vm1833_vm4 = vweird.f32 %v7681_v18 }
 0x2d2   :  { %v1995_v47 = vmul.f32 %v6262_v34, %v1994_v15  ;;  %v1974_v15 = vor.u32 1.1754944e-38, %v1973_v58  ;;  %vm1957_vm9 = vcmp.eq.f32.partialorder %v1956_v57, 8.507059e+37  ;;  %v1940_v58 = vsel %vm7859_vm12, %v7732_v17, %v1936_v56  ;;  %vm7900_vm11 = vmor %vm1907_vm14, %vm1908_vm10 }
 0x2d3   :  { %v1960_v5 = vsel %vm1957_vm9, %v1959_v53, %v1955_v12  ;;  %v1925_v17 = vsel %vm7877_vm1, %v7714_v13, %v1921_v46  ;;  %v9251_v0 = vand.u32 2147483647, %v7684_v28  ;;  %vm1847_vm8 = vweird.f32 %v7650_v8 }
 0x2d4   :  { %v1996_v36 = vadd.f32 %v6262_v34, %v1995_v47  ;;  %v1975_v4 = vsel %vm1972_vm3, %v1974_v15, %v1970_v29  ;;  %vm1848_vm3 = vweird.f32 %v7686_v11  ;;  %v1896_v47 = vand.u32 2147483647, %v7662_v21 }
 0x2d5   :  { %v2020_v27 = vmul.f32 %v1975_v4, %v7636_v10  ;;  %vm1942_vm2 = vcmp.eq.f32.partialorder %v9251_v0, 8.507059e+37  ;;  %v9252_v57 = vand.u32 2147483648, %v7669_v52  ;;  %v9255_v10 = vand.u32 2147483647, %v7669_v52 }
 0x2d6   :  { %v2000_v45 = vsel %vm1999_vm7, %v6262_v34, %v1996_v36  ;;  %vm1832_vm7 = vweird.f32 %v7648_v62  ;;  %v1910_v36 = vsel %vm7900_vm11, %v7709_v63, %v1906_v30  ;;  %v1876_v29 = vadd.f32 %v7702_v61, %v7776_v39 }
 0x2d7   :  { %v2005_v3 = vsel %vm2002_vm5, %v2004_v2, %v2000_v45  ;;  %v1929_v56 = vor.u32 1.1754944e-38, %v9252_v57  ;;  %vm1927_vm5 = vcmp.eq.f32.partialorder %v9255_v10, 8.507059e+37  ;;  %vm1818_vm10 = vweird.f32 %v7676_v32  ;;  %v9276_v10 = vld [vmem:[#allocation13_spill] sm:$0xff] }
 0x2d8   :  { %v2022_v37 = vmul.f32 %v2005_v3, %v7691_v54  ;;  %v9250_v54 = vand.u32 2147483648, %v7684_v28  ;;  %v2019_v28 = vmul.f32 %v1960_v5, %v7627_v33  ;;  %v1861_v46 = vadd.f32 %v7693_v14, %v7772_v26 }
 0x2d9   :  { %vm9256_vm14 = vweird.f32 %v7707_v41  ;;  %vm9257_vm12 = vweird.f32 %v7662_v21  ;;  %v1930_v33 = vsel %vm1927_vm5, %v1929_v56, %v1925_v17  ;;  %v1914_v44 = vor.u32 1.1754944e-38, %v1913_v55  ;;  %vm7939_vm5 = vmor %vm1877_vm15, %vm1878_vm6  ;;  %v6064_v55 = vld [vmem:[%s9203_s7 + $0x28] sm:$0xff] }
 0x2da   :  { %v1944_v34 = vor.u32 1.1754944e-38, %v9250_v54  ;;  %v2174_v24 = vpack.c.bf16 %v2022_v37, %v2021_v40  ;;  %vm7920_vm9 = vmor %vm9257_vm12, %vm9256_vm14  ;;  %v1883_v63 = vand.u32 2147483648, %v7659_v1  ;;  %vm1803_vm1 = vweird.f32 %v7671_v6  ;;  %v9268_v54 = vld [vmem:[#allocation14_spill] sm:$0xff] }
 0x2db   :  { %v1895_v39 = vsel %vm7920_vm9, %v7707_v41, %v1891_v7  ;;  %v2173_v2 = vpack.c.bf16 %v2020_v27, %v2019_v28  ;;  %v9260_v15 = vand.u32 2147483647, %v7667_v48  ;;  %vm1817_vm11 = vweird.f32 %v7644_v38  ;;  %vm7957_vm6 = vmor %vm1862_vm13, %vm1863_vm0  ;;  %v9271_v27 = vld [vmem:[#allocation11_spill] sm:$0xff] }
 0x2dc   :  { %v1945_v16 = vsel %vm1942_vm2, %v1944_v34, %v1940_v58  ;;  %2367 = vmatpush.bf16.msrb.mxu3 %v2174_v24  ;;  %v1866_v21 = vand.u32 2147483647, %v7653_v51  ;;  %v1868_v12 = vand.u32 2147483648, %v7653_v51  ;;  %v1899_v45 = vor.u32 1.1754944e-38, %v1898_v35  ;;  %vm7976_vm13 = vmor %vm1847_vm8, %vm1848_vm3 }
 0x2dd   :  { %v2018_v26 = vmul.f32 %v1945_v16, %v7630_v49  ;;  %vm1912_vm2 = vcmp.eq.f32.partialorder %v9260_v15, 8.507059e+37  ;;  %vm1802_vm14 = vweird.f32 %v7642_v19  ;;  %vm1897_vm12 = vcmp.eq.f32.partialorder %v1896_v47, 8.507059e+37  ;;  %vm7992_vm3 = vmor %vm1832_vm7, %vm1833_vm4  ;;  %v9282_v15 = vld [vmem:[#allocation9_spill] sm:$0xff] }
 0x2de   :  { %v1915_v53 = vsel %vm1912_vm2, %v1914_v44, %v1910_v36  ;;  %v2017_v49 = vmul.f32 %v1930_v33, %v7623_v59  ;;  %v1880_v48 = vsel %vm7939_vm5, %v7702_v61, %v1876_v29  ;;  %v1846_v3 = vadd.f32 %v7686_v11, %v7769_v43  ;;  %vm8009_vm4 = vmor %vm1817_vm11, %vm1818_vm10  ;;  %v9277_v36 = vld [vmem:[#allocation12_spill] sm:$0xff] }
 0x2df   :  { %vm1788_vm9 = vweird.f32 %v7646_v60  ;;  %v1831_v4 = vadd.f32 %v7681_v18, %v7765_v42  ;;  %v1900_v59 = vsel %vm1897_vm12, %v1899_v45, %v1895_v39  ;;  %v1884_v30 = vor.u32 1.1754944e-38, %v1883_v63  ;;  %vm8025_vm10 = vmor %vm1802_vm14, %vm1803_vm1  ;;  %v9280_v39 = vld [vmem:[#allocation10_spill] sm:$0xff] }
 0x2e0   :  { %2368 = vmatpush.bf16.msrb.mxu3 %v2173_v2  ;;  %v1853_v61 = vand.u32 2147483648, %v7650_v8  ;;  %vm1773_vm15 = vweird.f32 %v7632_v50  ;;  %v1865_v43 = vsel %vm7957_vm6, %v7693_v14, %v1861_v46  ;;  %v2172_v40 = vpack.c.bf16 %v2018_v26, %v2017_v49  ;;  %v6029_v14 = vld [vmem:[%s9202_s2 + $0x10] sm:$0xff] }
 0x2e1   :  { %v2016_v42 = vmul.f32 %v1915_v53, %v7618_v31  ;;  %v9265_v37 = vand.u32 2147483647, %v7659_v1  ;;  %vm1787_vm0 = vweird.f32 %v7621_v23  ;;  %v1836_v51 = vand.u32 2147483647, %v7648_v62 }
 0x2e2   :  { %v1838_v58 = vand.u32 2147483648, %v7648_v62  ;;  %v1869_v7 = vor.u32 1.1754944e-38, %v1868_v12  ;;  %vm1867_vm5 = vcmp.eq.f32.partialorder %v1866_v21, 8.507059e+37  ;;  %v2015_v31 = vmul.f32 %v1900_v59, %v7593_v22  ;;  %vm1789_vm1 = vmor %vm1787_vm0, %vm1788_vm9 }
 0x2e3   :  { %vm1882_vm2 = vcmp.eq.f32.partialorder %v9265_v37, 8.507059e+37  ;;  %v1850_v1 = vsel %vm7976_vm13, %v7686_v11, %v1846_v3  ;;  %v1816_v5 = vadd.f32 %v7676_v32, %v7762_v25  ;;  %v1801_v34 = vadd.f32 %v7671_v6, %v9268_v54  ;;  %v9287_v37 = vld [vmem:[#allocation7_spill] sm:$0xff] }
 0x2e4   :  { %v1885_v9 = vsel %vm1882_vm2, %v1884_v30, %v1880_v48  ;;  %2369 = vmatpush.bf16.msrb.mxu3 %v2172_v40  ;;  %v1870_v22 = vsel %vm1867_vm5, %v1869_v7, %v1865_v43  ;;  %v1854_v17 = vor.u32 1.1754944e-38, %v1853_v61  ;;  %v1823_v24 = vand.u32 2147483648, %v7644_v38  ;;  %v9286_v43 = vld [vmem:[#allocation4_spill] sm:$0xff] }
 0x2e5   :  { %v1835_v11 = vsel %vm7992_vm3, %v7681_v18, %v1831_v4  ;;  %v2171_v25 = vpack.c.bf16 %v2016_v42, %v2015_v31  ;;  %v2014_v0 = vmul.f32 %v1885_v9, %v9271_v27  ;;  %v9272_v47 = vand.u32 2147483647, %v7650_v8  ;;  %v9275_v18 = vld [vmem:[#allocation6_spill] sm:$0xff]  ;;  %v9284_v4 = vld [vmem:[#allocation8_spill] sm:$0xff] }
 0x2e6   :  { %v1806_v62 = vand.u32 2147483647, %v7642_v19  ;;  %v1808_v35 = vand.u32 2147483648, %v7642_v19  ;;  %v1839_v57 = vor.u32 1.1754944e-38, %v1838_v58  ;;  %vm1837_vm7 = vcmp.eq.f32.partialorder %v1836_v51, 8.507059e+37  ;;  %v9288_v58 = vld [vmem:[#allocation3_spill] sm:$0xff] }
 0x2e7   :  { %vm1852_vm8 = vcmp.eq.f32.partialorder %v9272_v47, 8.507059e+37  ;;  %v2013_v13 = vmul.f32 %v1870_v22, %v9275_v18  ;;  %v1820_v8 = vsel %vm8009_vm4, %v7676_v32, %v1816_v5  ;;  %v1786_v28 = vadd.f32 %v7646_v60, %v9276_v10  ;;  %v6027_v9 = vld [vmem:[%s9202_s2] sm:$0xff]  ;;  %v6030_v31 = vld [vmem:[%s9202_s2 + $0x18] sm:$0xff]  ;;  %v6032_v54 = vld [vmem:[%s9202_s2 + $0x28] sm:$0xff] }
 0x2e8   :  { %v1855_v56 = vsel %vm1852_vm8, %v1854_v17, %v1850_v1  ;;  %2370 = vmatpush.bf16.msrb.mxu3 %v2171_v25  ;;  %v1771_v29 = vadd.f32 %v7632_v50, %v9277_v36  ;;  %v1840_v52 = vsel %vm1837_vm7, %v1839_v57, %v1835_v11  ;;  %v1824_v33 = vor.u32 1.1754944e-38, %v1823_v24  ;;  %v6031_v1 = vld [vmem:[%s9202_s2 + $0x20] sm:$0xff]  ;;  %v6066_v5 = vld [vmem:[%s9203_s7 + $0x38] sm:$0xff]  ;;  %v6033_v24 = vld [vmem:[%s9202_s2 + $0x30] sm:$0xff] }
 0x2e9   :  { %v1793_v44 = vand.u32 2147483648, %v7621_v23  ;;  %v1805_v32 = vsel %vm8025_vm10, %v7671_v6, %v1801_v34  ;;  %v2170_v63 = vpack.c.bf16 %v2014_v0, %v2013_v13  ;;  %v2012_v2 = vmul.f32 %v1855_v56, %v9280_v39  ;;  %v9283_v6 = vld [vmem:[#allocation5_spill] sm:$0xff]  ;;  %2840 = vmatpush.bf16.msra.mxu0 %v6066_v5  ;;  %v6063_v22 = vld [vmem:[%s9203_s7 + $0x20] sm:$0xff]  ;;  %v6060_v25 = vld [vmem:[%s9203_s7 + $0x8] sm:$0xff] }
 0x2ea   :  { %v9281_v26 = vand.u32 2147483647, %v7644_v38  ;;  %vm1772_vm12 = vweird.f32 %v9282_v15  ;;  %v1778_v19 = vand.u32 2147483648, %v9282_v15  ;;  %v1809_v21 = vor.u32 1.1754944e-38, %v1808_v35  ;;  %v6065_v34 = vld [vmem:[%s9203_s7 + $0x30] sm:$0xff]  ;;  %v6062_v17 = vld [vmem:[%s9203_s7 + $0x18] sm:$0xff] }
 0x2eb   :  { %v1776_v45 = vand.u32 2147483647, %v9282_v15  ;;  %vm1807_vm14 = vcmp.eq.f32.partialorder %v1806_v62, 8.507059e+37  ;;  %v2011_v53 = vmul.f32 %v1840_v52, %v9283_v6  ;;  %v1790_v38 = vsel %vm1789_vm1, %v7646_v60, %v1786_v28  ;;  %vm1774_vm6 = vmor %vm1772_vm12, %vm1773_vm15  ;;  %v6061_v11 = vld [vmem:[%s9203_s7 + $0x10] sm:$0xff]  ;;  %v6059_v27 = vld [vmem:[%s9203_s7] sm:$0xff] }
 0x2ec   :  { %vm1822_vm11 = vcmp.eq.f32.partialorder %v9281_v26, 8.507059e+37  ;;  %2371 = vmatpush.bf16.msrb.mxu3 %v2170_v63  ;;  %v1810_v41 = vsel %vm1807_vm14, %v1809_v21, %v1805_v32  ;;  %v1794_v49 = vor.u32 1.1754944e-38, %v1793_v44  ;;  %v1775_v48 = vsel %vm1774_vm6, %v7632_v50, %v1771_v29  ;;  %v6034_v0 = vld [vmem:[%s9202_s2 + $0x38] sm:$0xff]  ;;  %v6035_v47 = vld [vmem:[%s9202_s2 + $0x40] sm:$0xff]  ;;  %v6036_v56 = vld [vmem:[%s9202_s2 + $0x48] sm:$0xff] }
 0x2ed   :  { %v1825_v12 = vsel %vm1822_vm11, %v1824_v33, %v1820_v8  ;;  %v2169_v3 = vpack.c.bf16 %v2012_v2, %v2011_v53  ;;  %v9285_v59 = vand.u32 2147483647, %v7621_v23  ;;  %v1779_v30 = vor.u32 1.1754944e-38, %v1778_v19  ;;  %v6028_v23 = vld [vmem:[%s9202_s2 + $0x8] sm:$0xff]  ;;  %2841 = vmatpush.bf16.msra.mxu0 %v6065_v34  ;;  %v6037_v8 = vld [vmem:[%s9202_s2 + $0x50] sm:$0xff]  ;;  %v6038_v29 = vld [vmem:[%s9202_s2 + $0x58] sm:$0xff] }
 0x2ee   :  { %v2010_v20 = vmul.f32 %v1825_v12, %v9284_v4  ;;  %vm1777_vm2 = vcmp.eq.f32.partialorder %v1776_v45, 8.507059e+37  ;;  %v2009_v40 = vmul.f32 %v1810_v41, %v9286_v43  ;;  %v6039_v44 = vld [vmem:[%s9202_s2 + $0x60] sm:$0xff]  ;;  %v6040_v2 = vld [vmem:[%s9202_s2 + $0x68] sm:$0xff]  ;;  %v6074_v26 = vld [vmem:[%s9203_s7 + $0x78] sm:$0xff] }
 0x2ef   :  { %vm1792_vm9 = vcmp.eq.f32.partialorder %v9285_v59, 8.507059e+37  ;;  %v1780_v60 = vsel %vm1777_vm2, %v1779_v30, %v1775_v48  ;;  %2889 = vmatpush.bf16.msra.mxu1 %v6074_v26  ;;  %v6073_v15 = vld [vmem:[%s9203_s7 + $0x70] sm:$0xff]  ;;  %v6072_v21 = vld [vmem:[%s9203_s7 + $0x68] sm:$0xff]  ;;  %v6071_v12 = vld [vmem:[%s9203_s7 + $0x60] sm:$0xff] }
 0x2f0   :  { %v1795_v61 = vsel %vm1792_vm9, %v1794_v49, %v1790_v38  ;;  %2372 = vmatpush.bf16.msrb.mxu3 %v2169_v3  ;;  %v2168_v42 = vpack.c.bf16 %v2010_v20, %v2009_v40  ;;  %v2007_v7 = vmul.f32 %v1780_v60, %v9288_v58  ;;  %v6041_v53 = vld [vmem:[%s9202_s2 + $0x70] sm:$0xff]  ;;  %v6070_v38 = vld [vmem:[%s9203_s7 + $0x58] sm:$0xff]  ;;  %v6068_v48 = vld [vmem:[%s9203_s7 + $0x48] sm:$0xff] }
 0x2f1   :  { %v2008_v51 = vmul.f32 %v1795_v61, %v9287_v37  ;;  %2842 = vmatpush.bf16.msra.mxu0 %v6064_v55  ;;  %v6069_v41 = vld [vmem:[%s9203_s7 + $0x50] sm:$0xff]  ;;  %v6067_v3 = vld [vmem:[%s9203_s7 + $0x40] sm:$0xff]  ;;  %v6042_v59 = vld [vmem:[%s9202_s2 + $0x78] sm:$0xff] }
 0x2f2   :  { %v6043_v40 = vld [vmem:[%s9202_s2 + $0x80] sm:$0xff] }
 0x2f3   :  { %v2167_v50 = vpack.c.bf16 %v2008_v51, %v2007_v7  ;;  %2890 = vmatpush.bf16.msra.mxu1 %v6073_v15  ;;  %v6044_v51 = vld [vmem:[%s9202_s2 + $0x88] sm:$0xff]  ;;  %v6047_v55 = vld [vmem:[%s9202_s2 + $0xa0] sm:$0xff] }
 0x2f4   :  { %2373 = vmatpush.bf16.msrb.mxu3 %v2168_v42  ;;  %v6051_v15 = vld [vmem:[%s9202_s2 + $0xc0] sm:$0xff] }
 0x2f5   :  { %2843 = vmatpush.bf16.msra.mxu0 %v6063_v22 }
 0x2f7   :  { %2891 = vmatpush.bf16.msra.mxu1 %v6072_v21 }
 0x2f8   :  { %2374 = vmatpush.bf16.msrb.mxu3 %v2167_v50 }
 0x2f9   :  { %2844 = vmatpush.bf16.msra.mxu0 %v6062_v17 }
 0x2fb   :  { %2375 = vmatmul.bf16.vlgmr.msrb.gmra.mxu3 %v6027_v9  ;;  %2892 = vmatpush.bf16.msra.mxu1 %v6071_v12  ;;  %v6045_v9 = vld [vmem:[%s9202_s2 + $0x90] sm:$0xff] }
 0x2fd   :  { %2845 = vmatpush.bf16.msra.mxu0 %v6061_v11  ;;  %v6048_v11 = vld [vmem:[%s9202_s2 + $0xa8] sm:$0xff] }
 0x2ff   :  { %2893 = vmatpush.bf16.msra.mxu1 %v6070_v38 }
 0x301   :  { %2846 = vmatpush.bf16.msra.mxu0 %v6060_v25  ;;  %v6082_v25 = vld [vmem:[%s9203_s7 + $0xb8] sm:$0xff] }
 0x302   :  { %2938 = vmatpush.bf16.msra.mxu2 %v6082_v25 }
 0x303   :  { %2894 = vmatpush.bf16.msra.mxu1 %v6069_v41 }
 0x305   :  { %2847 = vmatpush.bf16.msra.mxu0 %v6059_v27  ;;  %v6081_v27 = vld [vmem:[%s9203_s7 + $0xb0] sm:$0xff] }
 0x306   :  { %2939 = vmatpush.bf16.msra.mxu2 %v6081_v27 }
 0x307   :  { %2895 = vmatpush.bf16.msra.mxu1 %v6068_v48 }
 0x30b   :  { %2380 = vmatmul.bf16.gmra.mxu3 %v6028_v23  ;;  %2896 = vmatpush.bf16.msra.mxu1 %v6067_v3 }
 0x31b   :  { %2385 = vmatmul.bf16.gmra.mxu3 %v6029_v14 }
 0x32b   :  { %2390 = vmatmul.bf16.gmra.mxu3 %v6030_v31 }
 0x33b   :  { %2395 = vmatmul.bf16.gmra.mxu3 %v6031_v1  ;;  %v6046_v1 = vld [vmem:[%s9202_s2 + $0x98] sm:$0xff] }
 0x34b   :  { %2400 = vmatmul.bf16.gmra.mxu3 %v6032_v54 }
 0x35b   :  { %2405 = vmatmul.bf16.gmra.mxu3 %v6033_v24 }
 0x36b   :  { %2410 = vmatmul.bf16.gmra.mxu3 %v6034_v0 }
 0x37b   :  { %2415 = vmatmul.bf16.gmra.mxu3 %v6035_v47  ;;  %v6080_v47 = vld [vmem:[%s9203_s7 + $0xa8] sm:$0xff] }
 0x37c   :  { %2940 = vmatpush.bf16.msra.mxu2 %v6080_v47 }
 0x37e   :  { %v2376_v62 = vpop.f32.mrf.mxu3 }
 0x386   :  { %v2378_v35 = vpop.f32.mrf.mxu3 }
 0x387   :  { %v2536_v57 = vpack.c.bf16 %v2378_v35, %v2376_v62  ;;  %v6079_v62 = vld [vmem:[%s9203_s7 + $0xa0] sm:$0xff] }
 0x388   :  { %2941 = vmatpush.bf16.msra.mxu2 %v6079_v62 }
 0x389   :  { %2848 = vmatmul.bf16.vlgmr.msra.gmra.mxu0 %v2536_v57 }
 0x38b   :  { %2420 = vmatmul.bf16.gmra.mxu3 %v6036_v56  ;;  %v6049_v56 = vld [vmem:[%s9202_s2 + $0xb0] sm:$0xff] }
 0x38e   :  { %v2381_v16 = vpop.f32.mrf.mxu3 }
 0x396   :  { %v2383_v18 = vpop.f32.mrf.mxu3 }
 0x397   :  { %v2540_v13 = vpack.c.bf16 %v2383_v18, %v2381_v16  ;;  %v6078_v16 = vld [vmem:[%s9203_s7 + $0x98] sm:$0xff]  ;;  %v8186_v18 = vpop.permute.xlu0 %2630 }
 0x398   :  { %2942 = vmatpush.bf16.msra.mxu2 %v6078_v16 }
 0x399   :  { %2853 = vmatmul.bf16.gmra.mxu0 %v2540_v13  ;;  %v6077_v13 = vld [vmem:[%s9203_s7 + $0x90] sm:$0xff] }
 0x39b   :  { %2425 = vmatmul.bf16.gmra.mxu3 %v6037_v8 }
 0x39c   :  { %2943 = vmatpush.bf16.msra.mxu2 %v6077_v13 }
 0x39e   :  { %v2386_v10 = vpop.f32.mrf.mxu3 }
 0x3a6   :  { %v2388_v28 = vpop.f32.mrf.mxu3 }
 0x3a7   :  { %v2544_v36 = vpack.c.bf16 %v2388_v28, %v2386_v10  ;;  %v6076_v10 = vld [vmem:[%s9203_s7 + $0x88] sm:$0xff]  ;;  %v6075_v28 = vld [vmem:[%s9203_s7 + $0x80] sm:$0xff] }
 0x3a8   :  { %2944 = vmatpush.bf16.msra.mxu2 %v6076_v10 }
 0x3a9   :  { %2858 = vmatmul.bf16.gmra.mxu0 %v2544_v36  ;;  %v8197_v36 = vpop.permute.xlu0 %2625 }
 0x3ab   :  { %2430 = vmatmul.bf16.gmra.mxu3 %v6038_v29 }
 0x3ac   :  { %2945 = vmatpush.bf16.msra.mxu2 %v6075_v28 }
 0x3ae   :  { %v2391_v46 = vpop.f32.mrf.mxu3 }
 0x3b6   :  { %v2393_v52 = vpop.f32.mrf.mxu3 }
 0x3b7   :  { %v2548_v33 = vpack.c.bf16 %v2393_v52, %v2391_v46  ;;  %v6050_v52 = vld [vmem:[%s9202_s2 + $0xb8] sm:$0xff] }
 0x3b9   :  { %2863 = vmatmul.bf16.gmra.mxu0 %v2548_v33  ;;  %v8202_v33 = vpop.permute.xlu1 %2640 }
 0x3bb   :  { %2435 = vmatmul.bf16.gmra.mxu3 %v6039_v44 }
 0x3be   :  { %v2396_v32 = vpop.f32.mrf.mxu3 }
 0x3c6   :  { %v2398_v63 = vpop.f32.mrf.mxu3 }
 0x3c7   :  { %v2552_v39 = vpack.c.bf16 %v2398_v63, %v2396_v32  ;;  %v2601_v32 = vpop.permute.xlu0 %2600 }
 0x3c9   :  { %2868 = vmatmul.bf16.gmra.mxu0 %v2552_v39  ;;  %v8204_v39 = vpop.permute.xlu1 %2635 }
 0x3cb   :  { %2440 = vmatmul.bf16.gmra.mxu3 %v6040_v2 }
 0x3ce   :  { %v2401_v19 = vpop.f32.mrf.mxu3 }
 0x3d6   :  { %v2403_v45 = vpop.f32.mrf.mxu3 }
 0x3d7   :  { %v2556_v6 = vpack.c.bf16 %v2403_v45, %v2401_v19  ;;  %v8209_v19 = vpop.permute.xlu0 %2595  ;;  %v2611_v45 = vpop.permute.xlu1 %2610 }
 0x3d9   :  { %2873 = vmatmul.bf16.gmra.mxu0 %v2556_v6 }
 0x3db   :  { %2445 = vmatmul.bf16.gmra.mxu3 %v6041_v53  ;;  %v8213_v53 = vpop.permute.xlu2 %2645 }
 0x3de   :  { %v2406_v49 = vpop.f32.mrf.mxu3 }
 0x3df   :  { %v2571_v6 = vpop.permute.xlu0 %2570 }
 0x3e6   :  { %v2408_v4 = vpop.f32.mrf.mxu3 }
 0x3e7   :  { %v2560_v20 = vpack.c.bf16 %v2408_v4, %v2406_v49 }
 0x3e9   :  { %2878 = vmatmul.bf16.gmra.mxu0 %v2560_v20  ;;  %v6052_v20 = vld [vmem:[%s9202_s2 + $0xc8] sm:$0xff] }
 0x3eb   :  { %2450 = vmatmul.bf16.gmra.mxu3 %v6042_v59  ;;  %v8220_v59 = vpop.permute.xlu1 %2605 }
 0x3ee   :  { %v2411_v30 = vpop.f32.mrf.mxu3 }
 0x3f6   :  { %v2413_v61 = vpop.f32.mrf.mxu3 }
 0x3f7   :  { %v2564_v43 = vpack.c.bf16 %v2413_v61, %v2411_v30 }
 0x3f9   :  { %2883 = vmatmul.bf16.gmra.mxu0 %v2564_v43 }
 0x3fb   :  { %2455 = vmatmul.bf16.gmra.mxu3 %v6043_v40  ;;  %v8226_v40 = vpop.permute.xlu2 %2620 }
 0x3fe   :  { %v2416_v60 = vpop.f32.mrf.mxu3 }
 0x406   :  { %v2418_v42 = vpop.f32.mrf.mxu3  ;;  %v2849_v63 = vpop.f32.mrf.mxu0 }
 0x407   :  { %v2537_v37 = vpack.c.bf16 %v2418_v42, %v2416_v60  ;;  %v2850_v38 = vadd.f32 %v2849_v63, %v2571_v6  ;;  %v2581_v60 = vpop.permute.xlu1 %2580  ;;  %v6090_v63 = vld [vmem:[%s9203_s7 + $0xf8] sm:$0xff] }
 0x408   :  { %2987 = vmatpush.bf16.msrb.mxu0 %v6090_v63 }
 0x409   :  { %2897 = vmatmul.bf16.vlgmr.msra.gmra.mxu1 %v2537_v37 }
 0x40b   :  { %2460 = vmatmul.bf16.gmra.mxu3 %v6044_v51 }
 0x40e   :  { %v2421_v58 = vpop.f32.mrf.mxu3  ;;  %v8211_v21 = vpop.f32.mrf.mxu0 }
 0x416   :  { %v2423_v7 = vpop.f32.mrf.mxu3  ;;  %v2854_v41 = vpop.f32.mrf.mxu0 }
 0x417   :  { %v2541_v50 = vpack.c.bf16 %v2423_v7, %v2421_v58  ;;  %v2855_v42 = vadd.f32 %v2854_v41, %v2581_v60  ;;  %v6086_v41 = vld [vmem:[%s9203_s7 + $0xd8] sm:$0xff] }
 0x419   :  { %2902 = vmatmul.bf16.gmra.mxu1 %v2541_v50  ;;  %v6053_v50 = vld [vmem:[%s9202_s2 + $0xd0] sm:$0xff] }
 0x41b   :  { %2465 = vmatmul.bf16.gmra.mxu3 %v6045_v9 }
 0x41e   :  { %v2426_v23 = vpop.f32.mrf.mxu3  ;;  %v8224_v43 = vpop.f32.mrf.mxu0 }
 0x426   :  { %v2428_v14 = vpop.f32.mrf.mxu3  ;;  %v2859_v9 = vpop.f32.mrf.mxu0 }
 0x427   :  { %v2545_v31 = vpack.c.bf16 %v2428_v14, %v2426_v23  ;;  %v8233_v23 = vpop.permute.xlu2 %2615 }
 0x429   :  { %2907 = vmatmul.bf16.gmra.mxu1 %v2545_v31 }
 0x42b   :  { %2470 = vmatmul.bf16.gmra.mxu3 %v6046_v1 }
 0x42e   :  { %v2431_v5 = vpop.f32.mrf.mxu3  ;;  %v8237_v1 = vpop.f32.mrf.mxu0 }
 0x436   :  { %v2433_v54 = vpop.f32.mrf.mxu3 }
 0x437   :  { %v2549_v34 = vpack.c.bf16 %v2433_v54, %v2431_v5  ;;  %v2591_v5 = vpop.permute.xlu2 %2590 }
 0x438   :  { %v2860_v54 = vadd.f32 %v2859_v9, %v2591_v5 }
 0x439   :  { %2912 = vmatmul.bf16.gmra.mxu1 %v2549_v34 }
 0x43b   :  { %2475 = vmatmul.bf16.gmra.mxu3 %v6047_v55 }
 0x43e   :  { %v2436_v22 = vpop.f32.mrf.mxu3 }
 0x446   :  { %v2438_v17 = vpop.f32.mrf.mxu3 }
 0x447   :  { %v2553_v24 = vpack.c.bf16 %v2438_v17, %v2436_v22 }
 0x449   :  { %2917 = vmatmul.bf16.gmra.mxu1 %v2553_v24  ;;  %v6054_v24 = vld [vmem:[%s9202_s2 + $0xd8] sm:$0xff] }
 0x44b   :  { %2480 = vmatmul.bf16.gmra.mxu3 %v6048_v11  ;;  %v2864_v11 = vpop.f32.mrf.mxu0 }
 0x44e   :  { %v2441_v0 = vpop.f32.mrf.mxu3 }
 0x453   :  { %v8251_v16 = vpop.f32.mrf.mxu0 }
 0x456   :  { %v2443_v35 = vpop.f32.mrf.mxu3 }
 0x457   :  { %v2557_v57 = vpack.c.bf16 %v2443_v35, %v2441_v0  ;;  %v2865_v0 = vadd.f32 %v2864_v11, %v2601_v32  ;;  %v6056_v32 = vld [vmem:[%s9202_s2 + $0xe8] sm:$0xff] }
 0x459   :  { %2922 = vmatmul.bf16.gmra.mxu1 %v2557_v57 }
 0x45b   :  { %2485 = vmatmul.bf16.gmra.mxu3 %v6049_v56  ;;  %v6055_v56 = vld [vmem:[%s9202_s2 + $0xe0] sm:$0xff]  ;;  %v2869_v10 = vpop.f32.mrf.mxu0 }
 0x45c   :  { %v2870_v28 = vadd.f32 %v2869_v10, %v2611_v45 }
 0x45e   :  { %v2446_v8 = vpop.f32.mrf.mxu3 }
 0x463   :  { %v8298_v63 = vpop.f32.mrf.mxu0 }
 0x466   :  { %v2448_v29 = vpop.f32.mrf.mxu3 }
 0x467   :  { %v2561_v46 = vpack.c.bf16 %v2448_v29, %v2446_v8 }
 0x469   :  { %2927 = vmatmul.bf16.gmra.mxu1 %v2561_v46 }
 0x46b   :  { %2490 = vmatmul.bf16.gmra.mxu3 %v6050_v52 }
 0x46e   :  { %v2451_v44 = vpop.f32.mrf.mxu3 }
 0x476   :  { %v2453_v2 = vpop.f32.mrf.mxu3 }
 0x477   :  { %v2565_v26 = vpack.c.bf16 %v2453_v2, %v2451_v44  ;;  %v6089_v2 = vld [vmem:[%s9203_s7 + $0xf0] sm:$0xff] }
 0x478   :  { %2988 = vmatpush.bf16.msrb.mxu0 %v6089_v2 }
 0x479   :  { %2932 = vmatmul.bf16.gmra.mxu1 %v2565_v26 }
 0x47b   :  { %2495 = vmatmul.bf16.gmra.mxu3 %v6051_v15  ;;  %v6088_v15 = vld [vmem:[%s9203_s7 + $0xe8] sm:$0xff] }
 0x47c   :  { %2989 = vmatpush.bf16.msrb.mxu0 %v6088_v15  ;;  %v8300_v15 = vpop.f32.mrf.mxu0 }
 0x47e   :  { %v2456_v12 = vpop.f32.mrf.mxu3 }
 0x486   :  { %v2458_v49 = vpop.f32.mrf.mxu3  ;;  %v2898_v48 = vpop.f32.mrf.mxu1 }
 0x487   :  { %v2538_v3 = vpack.c.bf16 %v2458_v49, %v2456_v12  ;;  %v8215_v4 = vadd.f32 %v2898_v48, %v2850_v38  ;;  %v6087_v12 = vld [vmem:[%s9203_s7 + $0xe0] sm:$0xff]  ;;  %v6057_v38 = vld [vmem:[%s9202_s2 + $0xf0] sm:$0xff] }
 0x488   :  { %2990 = vmatpush.bf16.msrb.mxu0 %v6087_v12  ;;  %v6085_v49 = vld [vmem:[%s9203_s7 + $0xd0] sm:$0xff] }
 0x489   :  { %2946 = vmatmul.bf16.vlgmr.msra.gmra.mxu2 %v2538_v3  ;;  %v6084_v3 = vld [vmem:[%s9203_s7 + $0xc8] sm:$0xff] }
 0x48b   :  { %2500 = vmatmul.bf16.gmra.mxu3 %v6052_v20  ;;  %v6083_v20 = vld [vmem:[%s9203_s7 + $0xc0] sm:$0xff] }
 0x48c   :  { %2991 = vmatpush.bf16.msrb.mxu0 %v6086_v41 }
 0x48e   :  { %v2461_v30 = vpop.f32.mrf.mxu3  ;;  %v8222_v61 = vpop.f32.mrf.mxu1 }
 0x490   :  { %2992 = vmatpush.bf16.msrb.mxu0 %v6085_v49 }
 0x494   :  { %2993 = vmatpush.bf16.msrb.mxu0 %v6084_v3 }
 0x496   :  { %v2463_v37 = vpop.f32.mrf.mxu3  ;;  %v2903_v51 = vpop.f32.mrf.mxu1 }
 0x497   :  { %v2542_v58 = vpack.c.bf16 %v2463_v37, %v2461_v30  ;;  %v8228_v7 = vadd.f32 %v2903_v51, %v2855_v42  ;;  %v6058_v42 = vld [vmem:[%s9202_s2 + $0xf8] sm:$0xff] }
 0x498   :  { %2994 = vmatpush.bf16.msrb.mxu0 %v6083_v20 }
 0x499   :  { %2951 = vmatmul.bf16.gmra.mxu2 %v2542_v58 }
 0x49b   :  { %2505 = vmatmul.bf16.gmra.mxu3 %v6053_v50 }
 0x49e   :  { %v2466_v14 = vpop.f32.mrf.mxu3  ;;  %v8235_v31 = vpop.f32.mrf.mxu1 }
 0x4a6   :  { %v2468_v34 = vpop.f32.mrf.mxu3  ;;  %v2908_v55 = vpop.f32.mrf.mxu1 }
 0x4a7   :  { %v2546_v22 = vpack.c.bf16 %v2468_v34, %v2466_v14  ;;  %v8239_v17 = vadd.f32 %v2908_v55, %v2860_v54 }
 0x4a9   :  { %2956 = vmatmul.bf16.gmra.mxu2 %v2546_v22 }
 0x4ab   :  { %2510 = vmatmul.bf16.gmra.mxu3 %v6054_v24 }
 0x4ae   :  { %v2471_v25 = vpop.f32.mrf.mxu3  ;;  %v8244_v27 = vpop.f32.mrf.mxu1 }
 0x4b6   :  { %v2473_v47 = vpop.f32.mrf.mxu3  ;;  %v2913_v62 = vpop.f32.mrf.mxu1 }
 0x4b7   :  { %v2550_v35 = vpack.c.bf16 %v2473_v47, %v2471_v25  ;;  %v8246_v57 = vadd.f32 %v2913_v62, %v2865_v0 }
 0x4b9   :  { %2961 = vmatmul.bf16.gmra.mxu2 %v2550_v35 }
 0x4bb   :  { %2515 = vmatmul.bf16.gmra.mxu3 %v6055_v56 }
 0x4be   :  { %v2476_v13 = vpop.f32.mrf.mxu3  ;;  %v8253_v8 = vpop.f32.mrf.mxu1 }
 0x4c6   :  { %v2478_v29 = vpop.f32.mrf.mxu3  ;;  %v2918_v46 = vpop.f32.mrf.mxu1 }
 0x4c7   :  { %v2554_v52 = vpack.c.bf16 %v2478_v29, %v2476_v13  ;;  %v8255_v44 = vadd.f32 %v2918_v46, %v2870_v28 }
 0x4c9   :  { %2966 = vmatmul.bf16.gmra.mxu2 %v2554_v52 }
 0x4cb   :  { %2520 = vmatmul.bf16.gmra.mxu3 %v6056_v32 }
 0x4ce   :  { %v2481_v26 = vpop.f32.mrf.mxu3 }
 0x4d6   :  { %v2483_v45 = vpop.f32.mrf.mxu3 }
 0x4d7   :  { %v2558_v6 = vpack.c.bf16 %v2483_v45, %v2481_v26 }
 0x4d9   :  { %2971 = vmatmul.bf16.gmra.mxu2 %v2558_v6  ;;  %v8305_v6 = vpop.f32.mrf.mxu0 }
 0x4db   :  { %2525 = vmatmul.bf16.gmra.mxu3 %v6057_v38 }
 0x4de   :  { %v2486_v48 = vpop.f32.mrf.mxu3 }
 0x4e1   :  { %v8307_v49 = vpop.f32.mrf.mxu0 }
 0x4e6   :  { %v2488_v30 = vpop.f32.mrf.mxu3 }
 0x4e7   :  { %v2562_v60 = vpack.c.bf16 %v2488_v30, %v2486_v48 }
 0x4e9   :  { %2976 = vmatmul.bf16.gmra.mxu2 %v2562_v60  ;;  %v8309_v20 = vpop.f32.mrf.mxu0 }
 0x4eb   :  { %2530 = vmatmul.bf16.gmra.mxu3 %v6058_v42 }
 0x4ee   :  { %v2491_v37 = vpop.f32.mrf.mxu3 }
 0x4f1   :  { %v8311_v60 = vpop.f32.mrf.mxu0 }
 0x4f6   :  { %v2493_v51 = vpop.f32.mrf.mxu3 }
 0x4f7   :  { %v2566_v58 = vpack.c.bf16 %v2493_v51, %v2491_v37 }
 0x4f9   :  { %2981 = vmatmul.bf16.gmra.mxu2 %v2566_v58  ;;  %v8313_v37 = vpop.f32.mrf.mxu0 }
 0x4fe   :  { %v2496_v50 = vpop.f32.mrf.mxu3 }
 0x506   :  { %v2498_v9 = vpop.f32.mrf.mxu3 }
 0x507   :  { %v2539_v14 = vpack.c.bf16 %v2498_v9, %v2496_v50 }
 0x509   :  { %2995 = vmatmul.bf16.vlgmr.msrb.gmra.mxu0 %v2539_v14 }
 0x50c   :  { %v2947_v5 = vpop.f32.mrf.mxu2 }
 0x50d   :  { %v2948_v54 = vadd.f32 %v2947_v5, %v8215_v4 }
 0x50e   :  { %v2501_v34 = vpop.f32.mrf.mxu3 }
 0x514   :  { %v8291_v55 = vpop.f32.mrf.mxu2 }
 0x516   :  { %v2503_v22 = vpop.f32.mrf.mxu3 }
 0x517   :  { %v2543_v24 = vpack.c.bf16 %v2503_v22, %v2501_v34 }
 0x519   :  { %3000 = vmatmul.bf16.gmra.mxu0 %v2543_v24  ;;  %v2862_v24 = vadd.f32 %v8237_v1, %v8209_v19  ;;  %v2867_v19 = vadd.f32 %v8251_v16, %v8220_v59 }
 0x51c   :  { %v2952_v11 = vpop.f32.mrf.mxu2 }
 0x51d   :  { %v2953_v25 = vadd.f32 %v2952_v11, %v8228_v7 }
 0x51e   :  { %v2506_v0 = vpop.f32.mrf.mxu3 }
 0x524   :  { %v8294_v47 = vpop.f32.mrf.mxu2 }
 0x526   :  { %v2508_v62 = vpop.f32.mrf.mxu3 }
 0x527   :  { %v2547_v35 = vpack.c.bf16 %v2508_v62, %v2506_v0  ;;  %v2911_v0 = vadd.f32 %v8244_v27, %v2862_v24 }
 0x529   :  { %3005 = vmatmul.bf16.gmra.mxu0 %v2547_v35 }
 0x52c   :  { %v2957_v56 = vpop.f32.mrf.mxu2 }
 0x52d   :  { %v2958_v13 = vadd.f32 %v2957_v56, %v8239_v17 }
 0x52e   :  { %v2511_v10 = vpop.f32.mrf.mxu3 }
 0x534   :  { %v2959_v4 = vpop.f32.mrf.mxu2 }
 0x536   :  { %v2513_v28 = vpop.f32.mrf.mxu3 }
 0x537   :  { %v2551_v29 = vpack.c.bf16 %v2513_v28, %v2511_v10 }
 0x539   :  { %3010 = vmatmul.bf16.gmra.mxu0 %v2551_v29 }
 0x53c   :  { %v2962_v46 = vpop.f32.mrf.mxu2 }
 0x53d   :  { %v2963_v52 = vadd.f32 %v2962_v46, %v8246_v57  ;;  %v2916_v46 = vadd.f32 %v8253_v8, %v2867_v19 }
 0x53e   :  { %v2516_v32 = vpop.f32.mrf.mxu3 }
 0x544   :  { %v2964_v7 = vpop.f32.mrf.mxu2 }
 0x546   :  { %v2518_v2 = vpop.f32.mrf.mxu3 }
 0x547   :  { %v2555_v26 = vpack.c.bf16 %v2518_v2, %v2516_v32  ;;  %v8338_v2 = vpop.f32.mrf.mxu1 }
 0x549   :  { %3015 = vmatmul.bf16.gmra.mxu0 %v2555_v26  ;;  %v2965_v26 = vadd.f32 %v2964_v7, %v2916_v46 }
 0x54c   :  { %v2967_v12 = vpop.f32.mrf.mxu2 }
 0x54d   :  { %v8303_v17 = vadd.f32 %v2967_v12, %v8255_v44 }
 0x54e   :  { %v2521_v45 = vpop.f32.mrf.mxu3 }
 0x556   :  { %v2523_v38 = vpop.f32.mrf.mxu3 }
 0x557   :  { %v2559_v41 = vpack.c.bf16 %v2523_v38, %v2521_v45  ;;  %v8340_v45 = vpop.f32.mrf.mxu2 }
 0x559   :  { %3020 = vmatmul.bf16.gmra.mxu0 %v2559_v41 }
 0x55e   :  { %v2526_v57 = vpop.f32.mrf.mxu3 }
 0x566   :  { %v2528_v48 = vpop.f32.mrf.mxu3 }
 0x567   :  { %v2563_v3 = vpack.c.bf16 %v2528_v48, %v2526_v57 }
 0x569   :  { %3025 = vmatmul.bf16.gmra.mxu0 %v2563_v3 }
 0x56e   :  { %v2531_v30 = vpop.f32.mrf.mxu3 }
 0x576   :  { %v2533_v42 = vpop.f32.mrf.mxu3 }
 0x577   :  { %v2567_v44 = vpack.c.bf16 %v2533_v42, %v2531_v30 }
 0x579   :  { %3030 = vmatmul.bf16.gmra.mxu0 %v2567_v44  ;;  %v8345_v44 = vpop.f32.mrf.mxu1 }
 0x586   :  { %v2996_v51 = vpop.f32.mrf.mxu0 }
 0x587   :  { %v8315_v58 = vadd.f32 %v2996_v51, %v2948_v54  ;;  %v2960_v54 = vadd.f32 %v2959_v4, %v2911_v0 }
 0x589   :  { %9289 = vst [vmem:[#allocation14_spill] sm:$0xff] %v8315_v58 }
 0x58e   :  { %v8317_v50 = vpop.f32.mrf.mxu0 }
 0x596   :  { %v3001_v9 = vpop.f32.mrf.mxu0 }
 0x597   :  { %v8319_v14 = vadd.f32 %v3001_v9, %v2953_v25 }
 0x59e   :  { %v8321_v5 = vpop.f32.mrf.mxu0 }
 0x5a6   :  { %v3006_v34 = vpop.f32.mrf.mxu0 }
 0x5a7   :  { %v8323_v22 = vadd.f32 %v3006_v34, %v2958_v13 }
 0x5a9   :  { %v5496_v11 = vmul.f32 -1.442695, %v8323_v22 }
 0x5ab   :  { %6263 = vpow2.f32 %v5496_v11 }
 0x5ae   :  { %v3008_v62 = vpop.f32.mrf.mxu0 }
 0x5af   :  { %v8329_v35 = vadd.f32 %v3008_v62, %v2960_v54  ;;  %v8356_v62 = vpop.f32.mrf.mxu2 }
 0x5b1   :  { %v6264_v56 = vpop.eup %6263  ;;  %v5497_v25 = vmul.f32 -1.442695, %v8329_v35 }
 0x5b2   :  { %v3088_v10 = vadd.f32 1.0, %v6264_v56 }
 0x5b3   :  { %6265 = vpow2.f32 %v5497_v25 }
 0x5b4   :  { %6267 = vrcp.f32 %v3088_v10  ;;  %v3171_v30 = vand.u32 2147483648, %v3088_v10  ;;  %vm3165_vm0 = vweird.f32 %v3088_v10  ;;  %v3169_v7 = vand.u32 2147483647, %v3088_v10 }
 0x5b6   :  { %v3011_v13 = vpop.f32.mrf.mxu0  ;;  %v3172_v56 = vor.u32 1.1754944e-38, %v3171_v30  ;;  %vm3170_vm3 = vcmp.eq.f32.partialorder %v3169_v7, 8.507059e+37 }
 0x5b7   :  { %v8332_v28 = vadd.f32 %v3011_v13, %v2963_v52 }
 0x5b9   :  { %v6266_v29 = vpop.eup %6265  ;;  %v5498_v1 = vmul.f32 -1.442695, %v8332_v28 }
 0x5ba   :  { %v6268_v27 = vpop.eup %6267  ;;  %v3089_v4 = vadd.f32 1.0, %v6266_v29 }
 0x5bb   :  { %v3161_v32 = vmul.f32 %v6268_v27, %v3088_v10  ;;  %6269 = vpow2.f32 %v5498_v1  ;;  %vm3166_vm15 = vweird.f32 %v6268_v27 }
 0x5bc   :  { %6271 = vrcp.f32 %v3089_v4  ;;  %vm8347_vm13 = vmor %vm3165_vm0, %vm3166_vm15  ;;  %v3184_v9 = vand.u32 2147483647, %v3089_v4  ;;  %v3186_v34 = vand.u32 2147483648, %v3089_v4  ;;  %vm3180_vm8 = vweird.f32 %v3089_v4 }
 0x5bd   :  { %v3162_v12 = vsub.f32 1.0, %v3161_v32 }
 0x5be   :  { %v3013_v52 = vpop.f32.mrf.mxu0  ;;  %v3187_v19 = vor.u32 1.1754944e-38, %v3186_v34  ;;  %vm3185_vm7 = vcmp.eq.f32.partialorder %v3184_v9, 8.507059e+37 }
 0x5bf   :  { %v3163_v38 = vmul.f32 %v6268_v27, %v3162_v12  ;;  %v8342_v41 = vadd.f32 %v3013_v52, %v2965_v26 }
 0x5c1   :  { %v6270_v59 = vpop.eup %6269  ;;  %v5499_v16 = vmul.f32 -1.442695, %v8342_v41  ;;  %v3164_v3 = vadd.f32 %v6268_v27, %v3163_v38 }
 0x5c2   :  { %v6272_v57 = vpop.eup %6271  ;;  %v3090_v48 = vadd.f32 1.0, %v6270_v59  ;;  %v2925_v59 = vpop.f32.mrf.mxu1 }
 0x5c3   :  { %v3176_v8 = vmul.f32 %v6272_v57, %v3089_v4  ;;  %6273 = vpow2.f32 %v5499_v16  ;;  %v3168_v11 = vsel %vm8347_vm13, %v6268_v27, %v3164_v3  ;;  %vm3181_vm5 = vweird.f32 %v6272_v57  ;;  %v2974_v3 = vpop.f32.mrf.mxu2 }
 0x5c4   :  { %6275 = vrcp.f32 %v3090_v48  ;;  %v3173_v29 = vsel %vm3170_vm3, %v3172_v56, %v3168_v11  ;;  %vm3182_vm4 = vmor %vm3180_vm8, %vm3181_vm5  ;;  %v3201_v30 = vand.u32 2147483648, %v3090_v48  ;;  %vm3195_vm11 = vweird.f32 %v3090_v48 }
 0x5c5   :  { %v3177_v42 = vsub.f32 1.0, %v3176_v8  ;;  %v3199_v7 = vand.u32 2147483647, %v3090_v48 }
 0x5c6   :  { %v3016_v24 = vpop.f32.mrf.mxu0 }
 0x5c7   :  { %v3178_v0 = vmul.f32 %v6272_v57, %v3177_v42  ;;  %v8354_v54 = vadd.f32 %v3016_v24, %v8303_v17  ;;  %v8359_v17 = vmul.f32 %v3173_v29, %v8323_v22  ;;  %v3202_v24 = vor.u32 1.1754944e-38, %v3201_v30 }
 0x5c8   :  { %vm3200_vm14 = vcmp.eq.f32.partialorder %v3199_v7, 8.507059e+37 }
 0x5c9   :  { %v6274_v25 = vpop.eup %6273  ;;  %v3179_v10 = vadd.f32 %v6272_v57, %v3178_v0 }
 0x5ca   :  { %v6276_v13 = vpop.eup %6275  ;;  %v3091_v1 = vadd.f32 1.0, %v6274_v25  ;;  %v2928_v0 = vpop.f32.mrf.mxu1 }
 0x5cb   :  { %v3183_v46 = vsel %vm3182_vm4, %v6272_v57, %v3179_v10  ;;  %v3191_v27 = vmul.f32 %v6276_v13, %v3090_v48  ;;  %vm3196_vm10 = vweird.f32 %v6276_v13  ;;  %v2977_v29 = vpop.f32.mrf.mxu2 }
 0x5cc   :  { %v3188_v32 = vsel %vm3185_vm7, %v3187_v19, %v3183_v46  ;;  %6277 = vrcp.f32 %v3091_v1  ;;  %vm3197_vm12 = vmor %vm3195_vm11, %vm3196_vm10  ;;  %v3216_v42 = vand.u32 2147483648, %v3091_v1  ;;  %v3214_v34 = vand.u32 2147483647, %v3091_v1 }
 0x5cd   :  { %v8362_v26 = vmul.f32 %v3188_v32, %v8329_v35  ;;  %v3192_v12 = vsub.f32 1.0, %v3191_v27  ;;  %vm3210_vm6 = vweird.f32 %v3091_v1  ;;  %v2586_v32 = vpop.permute.xlu2 %2585 }
 0x5ce   :  { %v3018_v52 = vpop.f32.mrf.mxu0  ;;  %v3217_v25 = vor.u32 1.1754944e-38, %v3216_v42  ;;  %vm3215_vm2 = vcmp.eq.f32.partialorder %v3214_v34, 8.507059e+37 }
 0x5cf   :  { %v3193_v38 = vmul.f32 %v6276_v13, %v3192_v12  ;;  %v2872_v12 = vadd.f32 %v8298_v63, %v8233_v23  ;;  %v2877_v23 = vadd.f32 %v8305_v6, %v8197_v36 }
 0x5d1   :  { %v3194_v57 = vadd.f32 %v6276_v13, %v3193_v38 }
 0x5d2   :  { %v6278_v16 = vpop.eup %6277 }
 0x5d3   :  { %v3206_v8 = vmul.f32 %v6278_v16, %v3091_v1  ;;  %v3198_v51 = vsel %vm3197_vm12, %v6276_v13, %v3194_v57  ;;  %vm3211_vm1 = vweird.f32 %v6278_v16  ;;  %v2857_v1 = vadd.f32 %v8224_v43, %v2586_v32  ;;  %v2979_v7 = vpop.f32.mrf.mxu2 }
 0x5d4   :  { %v3203_v56 = vsel %vm3200_vm14, %v3202_v24, %v3198_v51  ;;  %vm3212_vm9 = vmor %vm3210_vm6, %vm3211_vm1  ;;  %v2921_v57 = vadd.f32 %v8338_v2, %v2872_v12  ;;  %v2576_v2 = vpop.permute.xlu1 %2575 }
 0x5d5   :  { %v3207_v22 = vsub.f32 1.0, %v3206_v8  ;;  %v8367_v19 = vmul.f32 %v3203_v56, %v8332_v28  ;;  %v2906_v38 = vadd.f32 %v8235_v31, %v2857_v1  ;;  %v2930_v28 = vpop.f32.mrf.mxu1  ;;  %v2880_v8 = vadd.f32 %v8307_v49, %v8186_v18 }
 0x5d6   :  { %v3021_v35 = vpop.f32.mrf.mxu0  ;;  %v2970_v31 = vadd.f32 %v8340_v45, %v2921_v57  ;;  %v2926_v18 = vadd.f32 %v2925_v59, %v2877_v23 }
 0x5d7   :  { %v3208_v9 = vmul.f32 %v6278_v16, %v3207_v22 }
 0x5d8   :  { %v8394_v49 = vadd.f32 %v3018_v52, %v2970_v31  ;;  %v2975_v6 = vadd.f32 %v2974_v3, %v2926_v18 }
 0x5d9   :  { %v3209_v11 = vadd.f32 %v6278_v16, %v3208_v9 }
 0x5db   :  { %v3213_v10 = vsel %vm3212_vm9, %v6278_v16, %v3209_v11  ;;  %v2875_v16 = vadd.f32 %v8300_v15, %v8226_v40  ;;  %v2929_v40 = vadd.f32 %v2928_v0, %v2880_v8  ;;  %v2982_v34 = vpop.f32.mrf.mxu2  ;;  %v2885_v11 = vadd.f32 %v8311_v60, %v8202_v33 }
 0x5dc   :  { %v3218_v48 = vsel %vm3215_vm2, %v3217_v25, %v3213_v10 }
 0x5dd   :  { %v8370_v13 = vmul.f32 %v3218_v48, %v8342_v41  ;;  %v2955_v41 = vadd.f32 %v8294_v47, %v2906_v38  ;;  %v2924_v30 = vadd.f32 %v8345_v44, %v2875_v16  ;;  %v2882_v47 = vadd.f32 %v8309_v20, %v8204_v39  ;;  %v2933_v52 = vpop.f32.mrf.mxu1 }
 0x5de   :  { %v3023_v46 = vpop.f32.mrf.mxu0  ;;  %v2852_v44 = vadd.f32 %v8211_v21, %v2576_v2  ;;  %v2978_v22 = vadd.f32 %v2977_v29, %v2929_v40  ;;  %v5501_v39 = vmul.f32 -1.442695, %v8394_v49  ;;  %v2934_v56 = vadd.f32 %v2933_v52, %v2885_v11 }
 0x5df   :  { %v8389_v63 = vadd.f32 %v8321_v5, %v2955_v41  ;;  %v2973_v15 = vadd.f32 %v8356_v62, %v2924_v30  ;;  %v2931_v36 = vadd.f32 %v2930_v28, %v2882_v47  ;;  %v5500_v62 = vmul.f32 -1.442695, %v8354_v54 }
 0x5e0   :  { %v2901_v45 = vadd.f32 %v8222_v61, %v2852_v44  ;;  %v8405_v20 = vadd.f32 %v3023_v46, %v2975_v6  ;;  %v5494_v29 = vmul.f32 -1.442695, %v8319_v14  ;;  %v5492_v46 = vmul.f32 -1.442695, %v8315_v58 }
 0x5e1   :  { %v8397_v42 = vadd.f32 %v3021_v35, %v2973_v15  ;;  %v5495_v5 = vmul.f32 -1.442695, %v8389_v63  ;;  %v2980_v9 = vadd.f32 %v2979_v7, %v2931_v36  ;;  %v2887_v28 = vadd.f32 %v8313_v37, %v8213_v53 }
 0x5e2   :  { %v2950_v21 = vadd.f32 %v8291_v55, %v2901_v45  ;;  %v5503_v0 = vmul.f32 -1.442695, %v8405_v20 }
 0x5e3   :  { %v5502_v59 = vmul.f32 -1.442695, %v8397_v42  ;;  %6279 = vpow2.f32 %v5495_v5  ;;  %v2984_v30 = vpop.f32.mrf.mxu2 }
 0x5e4   :  { %v8412_v61 = vadd.f32 %v8317_v50, %v2950_v21  ;;  %6281 = vpow2.f32 %v5500_v62  ;;  %v2983_v50 = vadd.f32 %v2982_v34, %v2934_v56 }
 0x5e5   :  { %6283 = vpow2.f32 %v5501_v39  ;;  %v2935_v12 = vpop.f32.mrf.mxu1 }
 0x5e6   :  { %v3026_v43 = vpop.f32.mrf.mxu0  ;;  %6285 = vpow2.f32 %v5502_v59  ;;  %v5493_v25 = vmul.f32 -1.442695, %v8412_v61  ;;  %v2936_v23 = vadd.f32 %v2935_v12, %v2887_v28 }
 0x5e7   :  { %v8402_v51 = vadd.f32 %v3026_v43, %v2978_v22 }
 0x5e8   :  { %v2985_v53 = vadd.f32 %v2984_v30, %v2936_v23 }
 0x5e9   :  { %v5504_v24 = vmul.f32 -1.442695, %v8402_v51  ;;  %v6280_v10 = vpop.eup %6279 }
 0x5ea   :  { %v6282_v48 = vpop.eup %6281  ;;  %v8424_v38 = vadd.f32 1.0, %v6280_v10 }
 0x5eb   :  { %v6284_v60 = vpop.eup %6283  ;;  %v8428_v57 = vadd.f32 1.0, %v6282_v48 }
 0x5ec   :  { %v6286_v1 = vpop.eup %6285  ;;  %v8431_v7 = vadd.f32 1.0, %v6284_v60 }
 0x5ed   :  { %v8433_v31 = vadd.f32 1.0, %v6286_v1 }
 0x5ee   :  { %v3028_v35 = vpop.f32.mrf.mxu0  ;;  %vm3240_vm6 = vweird.f32 %v8431_v7 }
 0x5ef   :  { %v8409_v3 = vadd.f32 %v3028_v35, %v2980_v9  ;;  %vm3255_vm11 = vweird.f32 %v8433_v31 }
 0x5f1   :  { %v5505_v55 = vmul.f32 -1.442695, %v8409_v3 }
 0x5f3   :  { %6287 = vpow2.f32 %v5505_v55 }
 0x5f4   :  { %6289 = vpow2.f32 %v5504_v24 }
 0x5f5   :  { %6291 = vpow2.f32 %v5503_v0 }
 0x5f6   :  { %v3031_v33 = vpop.f32.mrf.mxu0  ;;  %6293 = vpow2.f32 %v5493_v25 }
 0x5f7   :  { %v8422_v32 = vadd.f32 %v3031_v33, %v2983_v50  ;;  %6295 = vpow2.f32 %v5494_v29 }
 0x5f8   :  { %6297 = vpow2.f32 %v5492_v46 }
 0x5f9   :  { %v6288_v16 = vpop.eup %6287  ;;  %v5506_v41 = vmul.f32 -1.442695, %v8422_v32 }
 0x5fa   :  { %v6290_v8 = vpop.eup %6289  ;;  %v8436_v40 = vadd.f32 1.0, %v6288_v16 }
 0x5fb   :  { %v6292_v43 = vpop.eup %6291  ;;  %6299 = vpow2.f32 %v5506_v41  ;;  %v8439_v37 = vadd.f32 1.0, %v6290_v8 }
 0x5fc   :  { %6301 = vrcp.f32 %v8424_v38  ;;  %v6294_v15 = vpop.eup %6293  ;;  %v8442_v2 = vadd.f32 1.0, %v6292_v43  ;;  %vm3300_vm4 = vweird.f32 %v8436_v40  ;;  %v3304_v4 = vand.u32 2147483647, %v8436_v40 }
 0x5fd   :  { %6303 = vrcp.f32 %v8428_v57  ;;  %v6296_v18 = vpop.eup %6295  ;;  %v8448_v6 = vadd.f32 1.0, %v6294_v15  ;;  %vm3285_vm0 = vweird.f32 %v8439_v37  ;;  %v3306_v27 = vand.u32 2147483648, %v8436_v40 }
 0x5fe   :  { %6305 = vrcp.f32 %v8431_v7  ;;  %v3033_v47 = vpop.f32.mrf.mxu0  ;;  %v6298_v22 = vpop.eup %6297  ;;  %v8454_v62 = vadd.f32 1.0, %v6296_v18  ;;  %vm3270_vm5 = vweird.f32 %v8442_v2 }
 0x5ff   :  { %6307 = vrcp.f32 %v8433_v31  ;;  %v8445_v44 = vadd.f32 %v3033_v47, %v2985_v53  ;;  %v8482_v25 = vadd.f32 1.0, %v6298_v22 }
 0x600   :  { %6309 = vrcp.f32 %v8436_v40 }
 0x601   :  { %v6300_v36 = vpop.eup %6299  ;;  %6311 = vrcp.f32 %v8439_v37  ;;  %v5507_v5 = vmul.f32 -1.442695, %v8445_v44 }
 0x602   :  { %v8452_v45 = vpop.eup %6301  ;;  %6313 = vrcp.f32 %v8442_v2  ;;  %v8457_v9 = vadd.f32 1.0, %v6300_v36  ;;  %v3289_v36 = vand.u32 2147483647, %v8439_v37 }
 0x603   :  { %v8459_v39 = vpop.eup %6303  ;;  %6315 = vpow2.f32 %v5507_v5  ;;  %v8494_v46 = vmul.f32 %v8452_v45, %v8424_v38  ;;  %v3291_v5 = vand.u32 2147483648, %v8439_v37 }
 0x604   :  { %v8461_v52 = vpop.eup %6305  ;;  %6317 = vrcp.f32 %v8457_v9  ;;  %v3221_v24 = vmul.f32 %v8459_v39, %v8428_v57  ;;  %vm3315_vm12 = vweird.f32 %v8457_v9  ;;  %vm3226_vm14 = vweird.f32 %v8459_v39 }
 0x605   :  { %v8464_v21 = vpop.eup %6307  ;;  %6319 = vrcp.f32 %v8448_v6  ;;  %v3236_v0 = vmul.f32 %v8461_v52, %v8431_v7  ;;  %vm3241_vm10 = vweird.f32 %v8461_v52 }
 0x606   :  { %v8467_v59 = vpop.eup %6309  ;;  %6321 = vrcp.f32 %v8454_v62  ;;  %v3251_v10 = vmul.f32 %v8464_v21, %v8433_v31  ;;  %v3222_v12 = vsub.f32 1.0, %v3221_v24  ;;  %vm3256_vm13 = vweird.f32 %v8464_v21 }
 0x607   :  { %v8470_v35 = vpop.eup %6311  ;;  %v3296_v55 = vmul.f32 %v8467_v59, %v8436_v40  ;;  %v3237_v16 = vsub.f32 1.0, %v3236_v0  ;;  %vm3301_vm7 = vweird.f32 %v8467_v59 }
 0x608   :  { %v8472_v34 = vpop.eup %6313  ;;  %v3281_v50 = vmul.f32 %v8470_v35, %v8439_v37  ;;  %v3252_v30 = vsub.f32 1.0, %v3251_v10  ;;  %v8515_v18 = vmul.f32 %v8459_v39, %v3222_v12  ;;  %vm3286_vm8 = vweird.f32 %v8470_v35  ;;  %vm8568_vm2 = vmor %vm3300_vm4, %vm3301_vm7 }
 0x609   :  { %v6316_v11 = vpop.eup %6315  ;;  %v3266_v33 = vmul.f32 %v8472_v34, %v8442_v2  ;;  %v3297_v28 = vsub.f32 1.0, %v3296_v55  ;;  %v3238_v24 = vmul.f32 %v8461_v52, %v3237_v16  ;;  %vm3271_vm15 = vweird.f32 %v8472_v34 }
 0x60a   :  { %v8480_v56 = vpop.eup %6317  ;;  %v8488_v29 = vadd.f32 1.0, %v6316_v11  ;;  %v3282_v43 = vsub.f32 1.0, %v3281_v50  ;;  %v3253_v50 = vmul.f32 %v8464_v21, %v3252_v30 }
 0x60b   :  { %v8490_v48 = vpop.eup %6319  ;;  %v3311_v60 = vmul.f32 %v8480_v56, %v8457_v9  ;;  %v3267_v15 = vsub.f32 1.0, %v3266_v33  ;;  %v3298_v55 = vmul.f32 %v8467_v59, %v3297_v28  ;;  %vm3316_vm3 = vweird.f32 %v8480_v56 }
 0x60c   :  { %v8500_v1 = vpop.eup %6321  ;;  %6323 = vrcp.f32 %v8488_v29  ;;  %v8506_v8 = vmul.f32 %v8490_v48, %v8448_v6  ;;  %v3283_v33 = vmul.f32 %v8470_v35, %v3282_v43  ;;  %v3319_v43 = vand.u32 2147483647, %v8457_v9  ;;  %vm8550_vm1 = vmor %vm3315_vm12, %vm3316_vm3 }
 0x60d   :  { %v3312_v41 = vsub.f32 1.0, %v3311_v60  ;;  %6325 = vrcp.f32 %v8482_v25  ;;  %v8510_v23 = vmul.f32 %v8500_v1, %v8454_v62  ;;  %v3268_v60 = vmul.f32 %v8472_v34, %v3267_v15  ;;  %vm8576_vm3 = vmor %vm3285_vm0, %vm3286_vm8 }
 0x60e   :  { %v3299_v30 = vadd.f32 %v8467_v59, %v3298_v55  ;;  %v3336_v22 = vand.u32 2147483648, %v8488_v29  ;;  %vm3320_vm12 = vcmp.eq.f32.partialorder %v3319_v43, 8.507059e+37  ;;  %vm3330_vm4 = vweird.f32 %v8488_v29 }
 0x60f   :  { %v3313_v47 = vmul.f32 %v8480_v56, %v3312_v41  ;;  %v3321_v41 = vand.u32 2147483648, %v8457_v9  ;;  %v3254_v40 = vadd.f32 %v8464_v21, %v3253_v50  ;;  %vm3305_vm0 = vcmp.eq.f32.partialorder %v3304_v4, 8.507059e+37 }
 0x610   :  { %v3337_v0 = vor.u32 1.1754944e-38, %v3336_v22  ;;  %v3246_v50 = vand.u32 2147483648, %v8431_v7 }
 0x611   :  { %v3314_v12 = vadd.f32 %v8480_v56, %v3313_v47  ;;  %v3284_v47 = vadd.f32 %v8470_v35, %v3283_v33  ;;  %v3334_v33 = vand.u32 2147483647, %v8488_v29  ;;  %v3322_v53 = vor.u32 1.1754944e-38, %v3321_v41 }
 0x612   :  { %v6324_v10 = vpop.eup %6323 }
 0x613   :  { %v3326_v16 = vmul.f32 %v6324_v10, %v8488_v29  ;;  %v8534_v28 = vpop.eup %6325  ;;  %v3318_v9 = vsel %vm8550_vm1, %v8480_v56, %v3314_v12  ;;  %vm3331_vm9 = vweird.f32 %v6324_v10  ;;  %v3288_v37 = vsel %vm8576_vm3, %v8470_v35, %v3284_v47  ;;  %vm8594_vm1 = vmor %vm3270_vm5, %vm3271_vm15  ;;  %v6109_v56 = vld [vmem:[%s9205_s8 + $0x30] sm:$0xff] }
 0x614   :  { %v3323_v41 = vsel %vm3320_vm12, %v3322_v53, %v3318_v9  ;;  %vm3332_vm7 = vmor %vm3330_vm4, %vm3331_vm9  ;;  %vm3335_vm8 = vcmp.eq.f32.partialorder %v3334_v33, 8.507059e+37  ;;  %vm3290_vm9 = vcmp.eq.f32.partialorder %v3289_v36, 8.507059e+37  ;;  %v3229_v9 = vand.u32 2147483647, %v8428_v57 }
 0x615   :  { %v3327_v15 = vsub.f32 1.0, %v3326_v16  ;;  %v3269_v16 = vadd.f32 %v8472_v34, %v3268_v60  ;;  %v3303_v60 = vsel %vm8568_vm2, %v8467_v59, %v3299_v30  ;;  %v3239_v59 = vadd.f32 %v8461_v52, %v3238_v24  ;;  %vm8610_vm15 = vmor %vm3255_vm11, %vm3256_vm13 }
 0x616   :  { %v3354_v4 = vmul.f32 %v3323_v41, %v8422_v32  ;;  %v3258_v32 = vsel %vm8610_vm15, %v8464_v21, %v3254_v40  ;;  %vm3225_vm2 = vweird.f32 %v8428_v57  ;;  %v3231_v30 = vand.u32 2147483648, %v8428_v57  ;;  %vm8628_vm13 = vmor %vm3240_vm6, %vm3241_vm10 }
 0x617   :  { %v3328_v55 = vmul.f32 %v6324_v10, %v3327_v15  ;;  %v3307_v15 = vor.u32 1.1754944e-38, %v3306_v27  ;;  %v3292_v27 = vor.u32 1.1754944e-38, %v3291_v5  ;;  %v3273_v35 = vsel %vm8594_vm1, %v8472_v34, %v3269_v16  ;;  %vm8646_vm10 = vmor %vm3225_vm2, %vm3226_vm14 }
 0x618   :  { %v9302_v34 = vand.u32 2147483648, %v8442_v2  ;;  %v9306_v21 = vand.u32 2147483648, %v8433_v31  ;;  %v3101_v16 = vmul.f32 %v8534_v28, %v8482_v25  ;;  %v3132_v53 = vsub.f32 1.0, %v8510_v23 }
 0x619   :  { %v3329_v12 = vadd.f32 %v6324_v10, %v3328_v55  ;;  %v3308_v11 = vsel %vm3305_vm0, %v3307_v15, %v3303_v60  ;;  %v3293_v5 = vsel %vm3290_vm9, %v3292_v27, %v3288_v37  ;;  %v9307_v55 = vand.u32 2147483647, %v8433_v31 }
 0x61a   :  { %v3277_v36 = vor.u32 1.1754944e-38, %v9302_v34  ;;  %v3262_v47 = vor.u32 1.1754944e-38, %v9306_v21  ;;  %v3352_v33 = vmul.f32 %v3293_v5, %v8402_v51  ;;  %v3247_v57 = vor.u32 1.1754944e-38, %v3246_v50 }
 0x61b   :  { %v3333_v58 = vsel %vm3332_vm7, %v6324_v10, %v3329_v12  ;;  %v3224_v10 = vadd.f32 %v8459_v39, %v8515_v18  ;;  %v3353_v18 = vmul.f32 %v3308_v11, %v8409_v3  ;;  %v3243_v3 = vsel %vm8628_vm13, %v8461_v52, %v3239_v59 }
 0x61c   :  { %v3338_v22 = vsel %vm3335_vm8, %v3337_v0, %v3333_v58  ;;  %vm3260_vm11 = vcmp.eq.f32.partialorder %v9307_v55, 8.507059e+37  ;;  %v9310_v51 = vand.u32 2147483647, %v8431_v7  ;;  %v3232_v40 = vor.u32 1.1754944e-38, %v3231_v30 }
 0x61d   :  { %v3355_v24 = vmul.f32 %v3338_v22, %v8445_v44  ;;  %v9303_v44 = vand.u32 2147483647, %v8442_v2  ;;  %v3263_v60 = vsel %vm3260_vm11, %v3262_v47, %v3258_v32  ;;  %v3228_v31 = vsel %vm8646_vm10, %v8459_v39, %v3224_v10 }
 0x61e   :  { %vm3245_vm6 = vcmp.eq.f32.partialorder %v9310_v51, 8.507059e+37  ;;  %v3442_v12 = vpack.c.bf16 %v3353_v18, %v3352_v33  ;;  %v3117_v15 = vsub.f32 1.0, %v8506_v8  ;;  %v9311_v41 = vsub.f32 1.0, %v8494_v46  ;;  %v9320_v33 = vld [vmem:[#allocation14_spill] sm:$0xff] }
 0x61f   :  { %vm3275_vm5 = vcmp.eq.f32.partialorder %v9303_v44, 8.507059e+37  ;;  %v3443_v0 = vpack.c.bf16 %v3355_v24, %v3354_v4  ;;  %v3248_v23 = vsel %vm3245_vm6, %v3247_v57, %v3243_v3  ;;  %vm3230_vm14 = vcmp.eq.f32.partialorder %v3229_v9, 8.507059e+37  ;;  %v6096_v57 = vld [vmem:[%s9204_s3 + $0x28] sm:$0xff]  ;;  %v6106_v51 = vld [vmem:[%s9205_s8 + $0x18] sm:$0xff]  ;;  %v6125_v44 = vld [vmem:[%s9205_s8 + $0xb0] sm:$0xff] }
 0x620   :  { %v3278_v2 = vsel %vm3275_vm5, %v3277_v36, %v3273_v35  ;;  %v3148_v37 = vmul.f32 %v8452_v45, %v9311_v41  ;;  %v3350_v59 = vmul.f32 %v3263_v60, %v8397_v42  ;;  %v3102_v29 = vsub.f32 1.0, %v3101_v16  ;;  %v6108_v60 = vld [vmem:[%s9205_s8 + $0x28] sm:$0xff]  ;;  %v6099_v41 = vld [vmem:[%s9204_s3 + $0x40] sm:$0xff] }
 0x621   :  { %3516 = vmatpush.bf16.msrb.mxu1 %v3443_v0  ;;  %v3351_v52 = vmul.f32 %v3278_v2, %v8405_v20  ;;  %v3233_v39 = vsel %vm3230_vm14, %v3232_v40, %v3228_v31  ;;  %v3133_v7 = vmul.f32 %v8500_v1, %v3132_v53  ;;  %v3349_v27 = vmul.f32 %v3248_v23, %v8394_v49  ;;  %v6110_v53 = vld [vmem:[%s9205_s8 + $0x38] sm:$0xff]  ;;  %v6107_v31 = vld [vmem:[%s9205_s8 + $0x20] sm:$0xff]  ;;  %v6104_v40 = vld [vmem:[%s9205_s8 + $0x8] sm:$0xff] }
 0x622   :  { %v3118_v11 = vmul.f32 %v8490_v48, %v3117_v15  ;;  %v3149_v22 = vadd.f32 %v8452_v45, %v3148_v37  ;;  %vm3151_vm3 = vweird.f32 %v8452_v45  ;;  %v3348_v46 = vmul.f32 %v3233_v39, %v8354_v54  ;;  %3781 = vmatpush.bf16.msrb.mxu2 %v6110_v53  ;;  %v6103_v23 = vld [vmem:[%s9205_s8] sm:$0xff]  ;;  %v6098_v15 = vld [vmem:[%s9204_s3 + $0x38] sm:$0xff] }
 0x623   :  { %v3441_v20 = vpack.c.bf16 %v3351_v52, %v3350_v59  ;;  %v3103_v8 = vmul.f32 %v8534_v28, %v3102_v29  ;;  %vm3136_vm12 = vweird.f32 %v8500_v1  ;;  %v3156_v42 = vand.u32 2147483648, %v8424_v38  ;;  %v6097_v52 = vld [vmem:[%s9204_s3 + $0x30] sm:$0xff]  ;;  %v6118_v39 = vld [vmem:[%s9205_s8 + $0x78] sm:$0xff]  ;;  %v6111_v54 = vld [vmem:[%s9205_s8 + $0x40] sm:$0xff] }
 0x624   :  { %v3134_v35 = vadd.f32 %v8500_v1, %v3133_v7  ;;  %vm3150_vm4 = vweird.f32 %v8424_v38  ;;  %v3154_v49 = vand.u32 2147483647, %v8424_v38  ;;  %v3440_v4 = vpack.c.bf16 %v3349_v27, %v3348_v46  ;;  %v6100_v7 = vld [vmem:[%s9204_s3 + $0x48] sm:$0xff]  ;;  %v6117_v27 = vld [vmem:[%s9205_s8 + $0x70] sm:$0xff] }
 0x625   :  { %3517 = vmatpush.bf16.msrb.mxu1 %v3442_v12  ;;  %vm3121_vm7 = vweird.f32 %v8490_v48  ;;  %v3141_v24 = vand.u32 2147483648, %v8454_v62  ;;  %vm8675_vm0 = vmor %vm3150_vm4, %vm3151_vm3  ;;  %v3119_v10 = vadd.f32 %v8490_v48, %v3118_v11  ;;  %vm3135_vm8 = vweird.f32 %v8454_v62  ;;  %v6105_v12 = vld [vmem:[%s9205_s8 + $0x10] sm:$0xff]  ;;  %v6116_v11 = vld [vmem:[%s9205_s8 + $0x68] sm:$0xff] }
 0x626   :  { %v3139_v50 = vand.u32 2147483647, %v8454_v62  ;;  %v3153_v58 = vsel %vm8675_vm0, %v8452_v45, %v3149_v22  ;;  %vm3106_vm1 = vweird.f32 %v8534_v28  ;;  %vm3120_vm9 = vweird.f32 %v8448_v6  ;;  %vm8690_vm15 = vmor %vm3135_vm8, %vm3136_vm12  ;;  %3782 = vmatpush.bf16.msrb.mxu2 %v6109_v56  ;;  %v6115_v22 = vld [vmem:[%s9205_s8 + $0x60] sm:$0xff] }
 0x627   :  { %v3126_v38 = vand.u32 2147483648, %v8448_v6  ;;  %v3157_v36 = vor.u32 1.1754944e-38, %v3156_v42  ;;  %v3104_v62 = vadd.f32 %v8534_v28, %v3103_v8  ;;  %v3124_v5 = vand.u32 2147483647, %v8448_v6  ;;  %vm8702_vm2 = vmor %vm3120_vm9, %vm3121_vm7  ;;  %v6114_v42 = vld [vmem:[%s9205_s8 + $0x58] sm:$0xff] }
 0x628   :  { %v3138_v45 = vsel %vm8690_vm15, %v8500_v1, %v3134_v35  ;;  %vm3155_vm5 = vcmp.eq.f32.partialorder %v3154_v49, 8.507059e+37  ;;  %v3111_v32 = vand.u32 2147483648, %v8482_v25  ;;  %v3142_v18 = vor.u32 1.1754944e-38, %v3141_v24  ;;  %v6101_v35 = vld [vmem:[%s9204_s3 + $0x50] sm:$0xff]  ;;  %v6112_v24 = vld [vmem:[%s9205_s8 + $0x48] sm:$0xff] }
 0x629   :  { %3518 = vmatpush.bf16.msrb.mxu1 %v3441_v20  ;;  %v3158_v0 = vsel %vm3155_vm5, %v3157_v36, %v3153_v58  ;;  %vm3105_vm13 = vweird.f32 %v8482_v25  ;;  %v3109_v30 = vand.u32 2147483647, %v8482_v25  ;;  %v3123_v6 = vsel %vm8702_vm2, %v8490_v48, %v3119_v10  ;;  %v6113_v49 = vld [vmem:[%s9205_s8 + $0x50] sm:$0xff]  ;;  %v6102_v58 = vld [vmem:[%s9204_s3 + $0x58] sm:$0xff] }
 0x62a   :  { %vm3140_vm11 = vcmp.eq.f32.partialorder %v3139_v50, 8.507059e+37  ;;  %v9318_v1 = vpack.c.bf16 %v8370_v13, %v8367_v19  ;;  %vm3107_vm10 = vmor %vm3105_vm13, %vm3106_vm1  ;;  %v3127_v43 = vor.u32 1.1754944e-38, %v3126_v38  ;;  %vm3125_vm6 = vcmp.eq.f32.partialorder %v3124_v5, 8.507059e+37  ;;  %3783 = vmatpush.bf16.msrb.mxu2 %v6108_v60 }
 0x62b   :  { %v3143_v21 = vsel %vm3140_vm11, %v3142_v18, %v3138_v45  ;;  %v3108_v47 = vsel %vm3107_vm10, %v8534_v28, %v3104_v62  ;;  %v3343_v2 = vmul.f32 %v3158_v0, %v8389_v63  ;;  %v3112_v25 = vor.u32 1.1754944e-38, %v3111_v32  ;;  %v6091_v63 = vld [vmem:[%s9204_s3] sm:$0xff]  ;;  %v6126_v32 = vld [vmem:[%s9205_s8 + $0xb8] sm:$0xff]  ;;  %v6124_v0 = vld [vmem:[%s9205_s8 + $0xa8] sm:$0xff] }
 0x62c   :  { %v3128_v9 = vsel %vm3125_vm6, %v3127_v43, %v3123_v6  ;;  %vm3110_vm14 = vcmp.eq.f32.partialorder %v3109_v30, 8.507059e+37  ;;  %v3342_v48 = vmul.f32 %v3143_v21, %v8319_v14  ;;  %v9319_v3 = vpack.c.bf16 %v8362_v26, %v8359_v17  ;;  %v6092_v14 = vld [vmem:[%s9204_s3 + $0x8] sm:$0xff]  ;;  %v6093_v17 = vld [vmem:[%s9204_s3 + $0x10] sm:$0xff]  ;;  %v6094_v26 = vld [vmem:[%s9204_s3 + $0x18] sm:$0xff]  ;;  %3839 = vmatpush.bf16.msra.mxu0 %v6126_v32 }
 0x62d   :  { %3519 = vmatpush.bf16.msrb.mxu1 %v3440_v4  ;;  %v3113_v19 = vsel %vm3110_vm14, %v3112_v25, %v3108_v47  ;;  %v3341_v13 = vmul.f32 %v3128_v9, %v8412_v61  ;;  %v6095_v61 = vld [vmem:[%s9204_s3 + $0x20] sm:$0xff]  ;;  %v6122_v43 = vld [vmem:[%s9205_s8 + $0x98] sm:$0xff]  ;;  %v6121_v21 = vld [vmem:[%s9205_s8 + $0x90] sm:$0xff] }
 0x62e   :  { %v3437_v55 = vpack.c.bf16 %v3343_v2, %v3342_v48  ;;  %v3340_v16 = vmul.f32 %v3113_v19, %v9320_v33  ;;  %3784 = vmatpush.bf16.msrb.mxu2 %v6107_v31  ;;  %v6123_v30 = vld [vmem:[%s9205_s8 + $0xa0] sm:$0xff]  ;;  %v6120_v2 = vld [vmem:[%s9205_s8 + $0x88] sm:$0xff] }
 0x62f   :  { %v6119_v25 = vld [vmem:[%s9205_s8 + $0x80] sm:$0xff] }
 0x630   :  { %v3436_v28 = vpack.c.bf16 %v3341_v13, %v3340_v16  ;;  %3840 = vmatpush.bf16.msra.mxu0 %v6125_v44 }
 0x631   :  { %3520 = vmatpush.bf16.msrb.mxu1 %v9318_v1 }
 0x632   :  { %3785 = vmatpush.bf16.msrb.mxu2 %v6106_v51 }
 0x634   :  { %3841 = vmatpush.bf16.msra.mxu0 %v6124_v0 }
 0x635   :  { %3521 = vmatpush.bf16.msrb.mxu1 %v9319_v3 }
 0x636   :  { %3786 = vmatpush.bf16.msrb.mxu2 %v6105_v12  ;;  %v8840_v12 = vpop.permute.xlu2 %3629 }
 0x638   :  { %3842 = vmatpush.bf16.msra.mxu0 %v6123_v30 }
 0x639   :  { %3522 = vmatpush.bf16.msrb.mxu1 %v3437_v55 }
 0x63a   :  { %3787 = vmatpush.bf16.msrb.mxu2 %v6104_v40 }
 0x63c   :  { %3843 = vmatpush.bf16.msra.mxu0 %v6122_v43 }
 0x63d   :  { %3523 = vmatpush.bf16.msrb.mxu1 %v3436_v28 }
 0x63e   :  { %3788 = vmatpush.bf16.msrb.mxu2 %v6103_v23 }
 0x640   :  { %3524 = vmatmul.bf16.vlgmr.msrb.gmra.mxu1 %v6091_v63  ;;  %3844 = vmatpush.bf16.msra.mxu0 %v6121_v21 }
 0x642   :  { %3810 = vmatpush.bf16.msra.mxu2 %v6118_v39 }
 0x644   :  { %3845 = vmatpush.bf16.msra.mxu0 %v6120_v2 }
 0x646   :  { %3811 = vmatpush.bf16.msra.mxu2 %v6117_v27  ;;  %v8848_v27 = vpop.permute.xlu0 %3634 }
 0x648   :  { %3846 = vmatpush.bf16.msra.mxu0 %v6119_v25 }
 0x64a   :  { %3812 = vmatpush.bf16.msra.mxu2 %v6116_v11 }
 0x64e   :  { %3813 = vmatpush.bf16.msra.mxu2 %v6115_v22  ;;  %v3610_v11 = vpop.permute.xlu0 %3609 }
 0x650   :  { %3529 = vmatmul.bf16.gmra.mxu1 %v6092_v14 }
 0x652   :  { %3814 = vmatpush.bf16.msra.mxu2 %v6114_v42 }
 0x656   :  { %3815 = vmatpush.bf16.msra.mxu2 %v6113_v49 }
 0x65a   :  { %3816 = vmatpush.bf16.msra.mxu2 %v6112_v24 }
 0x65e   :  { %3817 = vmatpush.bf16.msra.mxu2 %v6111_v54 }
 0x660   :  { %3534 = vmatmul.bf16.gmra.mxu1 %v6093_v17 }
 0x670   :  { %3539 = vmatmul.bf16.gmra.mxu1 %v6094_v26 }
 0x680   :  { %3544 = vmatmul.bf16.gmra.mxu1 %v6095_v61 }
 0x690   :  { %3549 = vmatmul.bf16.gmra.mxu1 %v6096_v57 }
 0x6a0   :  { %3554 = vmatmul.bf16.gmra.mxu1 %v6097_v52 }
 0x6b0   :  { %3559 = vmatmul.bf16.gmra.mxu1 %v6098_v15 }
 0x6bd   :  { %v3525_v37 = vpop.f32.mrf.mxu1 }
 0x6c0   :  { %3564 = vmatmul.bf16.gmra.mxu1 %v6099_v41  ;;  %v8844_v41 = vpop.permute.xlu2 %3624 }
 0x6c5   :  { %v3527_v59 = vpop.f32.mrf.mxu1 }
 0x6c6   :  { %v3585_v29 = vpack.c.bf16 %v3527_v59, %v3525_v37 }
 0x6c8   :  { %3789 = vmatmul.bf16.vlgmr.msrb.gmra.mxu2 %v3585_v29  ;;  %v3600_v59 = vpop.permute.xlu2 %3599 }
 0x6c9   :  { %6187 = vmatpush.bf16.msrb.mxu2 %v6126_v32 }
 0x6cd   :  { %v3530_v20 = vpop.f32.mrf.mxu1  ;;  %6188 = vmatpush.bf16.msrb.mxu2 %v6125_v44 }
 0x6d0   :  { %3569 = vmatmul.bf16.gmra.mxu1 %v6100_v7 }
 0x6d1   :  { %6189 = vmatpush.bf16.msrb.mxu2 %v6124_v0 }
 0x6d5   :  { %v3532_v46 = vpop.f32.mrf.mxu1  ;;  %6190 = vmatpush.bf16.msrb.mxu2 %v6123_v30 }
 0x6d6   :  { %v3588_v8 = vpack.c.bf16 %v3532_v46, %v3530_v20 }
 0x6d8   :  { %3794 = vmatmul.bf16.gmra.mxu2 %v3588_v8 }
 0x6d9   :  { %6191 = vmatpush.bf16.msrb.mxu2 %v6122_v43 }
 0x6dd   :  { %v3535_v4 = vpop.f32.mrf.mxu1  ;;  %6192 = vmatpush.bf16.msrb.mxu2 %v6121_v21  ;;  %v3620_v21 = vpop.permute.xlu1 %3619 }
 0x6e0   :  { %3574 = vmatmul.bf16.gmra.mxu1 %v6101_v35  ;;  %v3605_v35 = vpop.permute.xlu0 %3604 }
 0x6e1   :  { %6193 = vmatpush.bf16.msrb.mxu2 %v6120_v2 }
 0x6e5   :  { %v3537_v10 = vpop.f32.mrf.mxu1  ;;  %6194 = vmatpush.bf16.msrb.mxu2 %v6119_v25 }
 0x6e6   :  { %v3591_v50 = vpack.c.bf16 %v3537_v10, %v3535_v4 }
 0x6e8   :  { %3799 = vmatmul.bf16.gmra.mxu2 %v3591_v50 }
 0x6ed   :  { %v3540_v38 = vpop.f32.mrf.mxu1 }
 0x6f0   :  { %3579 = vmatmul.bf16.gmra.mxu1 %v6102_v58 }
 0x6f5   :  { %v3542_v34 = vpop.f32.mrf.mxu1 }
 0x6f6   :  { %v3594_v36 = vpack.c.bf16 %v3542_v34, %v3540_v38 }
 0x6f8   :  { %3804 = vmatmul.bf16.gmra.mxu2 %v3594_v36 }
 0x6fd   :  { %v3545_v62 = vpop.f32.mrf.mxu1 }
 0x705   :  { %v3547_v5 = vpop.f32.mrf.mxu1 }
 0x706   :  { %v3586_v45 = vpack.c.bf16 %v3547_v5, %v3545_v62 }
 0x708   :  { %3818 = vmatmul.bf16.vlgmr.msra.gmra.mxu2 %v3586_v45 }
 0x70d   :  { %v3550_v18 = vpop.f32.mrf.mxu1 }
 0x715   :  { %v3552_v6 = vpop.f32.mrf.mxu1 }
 0x716   :  { %v3589_v1 = vpack.c.bf16 %v3552_v6, %v3550_v18 }
 0x718   :  { %3823 = vmatmul.bf16.gmra.mxu2 %v3589_v1 }
 0x71d   :  { %v3555_v47 = vpop.f32.mrf.mxu1 }
 0x725   :  { %v3557_v9 = vpop.f32.mrf.mxu1 }
 0x726   :  { %v3592_v48 = vpack.c.bf16 %v3557_v9, %v3555_v47 }
 0x728   :  { %3828 = vmatmul.bf16.gmra.mxu2 %v3592_v48 }
 0x72d   :  { %v3560_v3 = vpop.f32.mrf.mxu1 }
 0x735   :  { %v3562_v19 = vpop.f32.mrf.mxu1 }
 0x736   :  { %v3595_v13 = vpack.c.bf16 %v3562_v19, %v3560_v3 }
 0x738   :  { %3833 = vmatmul.bf16.gmra.mxu2 %v3595_v13 }
 0x73d   :  { %v3565_v55 = vpop.f32.mrf.mxu1 }
 0x745   :  { %v3567_v33 = vpop.f32.mrf.mxu1 }
 0x746   :  { %v3587_v16 = vpack.c.bf16 %v3567_v33, %v3565_v55 }
 0x748   :  { %3847 = vmatmul.bf16.vlgmr.msra.gmra.mxu0 %v3587_v16 }
 0x74b   :  { %v3790_v28 = vpop.f32.mrf.mxu2 }
 0x74c   :  { %v3791_v29 = vadd.f32 %v3790_v28, %v3600_v59 }
 0x74d   :  { %v3570_v63 = vpop.f32.mrf.mxu1 }
 0x753   :  { %v3792_v14 = vpop.f32.mrf.mxu2 }
 0x754   :  { %v3793_v49 = vadd.f32 %v3792_v14, %v3605_v35 }
 0x755   :  { %v3572_v17 = vpop.f32.mrf.mxu1 }
 0x756   :  { %v3590_v26 = vpack.c.bf16 %v3572_v17, %v3570_v63 }
 0x758   :  { %3852 = vmatmul.bf16.gmra.mxu0 %v3590_v26 }
 0x75b   :  { %v8832_v61 = vpop.f32.mrf.mxu2 }
 0x75c   :  { %v3796_v17 = vadd.f32 %v8832_v61, %v3610_v11 }
 0x75d   :  { %v3575_v53 = vpop.f32.mrf.mxu1 }
 0x763   :  { %v8834_v56 = vpop.f32.mrf.mxu2 }
 0x765   :  { %v3577_v57 = vpop.f32.mrf.mxu1 }
 0x766   :  { %v3593_v60 = vpack.c.bf16 %v3577_v57, %v3575_v53 }
 0x768   :  { %3857 = vmatmul.bf16.gmra.mxu0 %v3593_v60 }
 0x76b   :  { %v8836_v31 = vpop.f32.mrf.mxu2 }
 0x76d   :  { %v3580_v51 = vpop.f32.mrf.mxu1 }
 0x773   :  { %v8838_v52 = vpop.f32.mrf.mxu2 }
 0x774   :  { %v3803_v53 = vadd.f32 %v8838_v52, %v8844_v41 }
 0x775   :  { %v3582_v40 = vpop.f32.mrf.mxu1 }
 0x776   :  { %v3596_v23 = vpack.c.bf16 %v3582_v40, %v3580_v51  ;;  %v3615_v51 = vpop.permute.xlu1 %3614  ;;  %v3801_v40 = vadd.f32 %v8836_v31, %v3620_v21 }
 0x778   :  { %3862 = vmatmul.bf16.vlgmr.msrb.gmra.mxu2 %v3596_v23 }
 0x77b   :  { %v8842_v15 = vpop.f32.mrf.mxu2 }
 0x77c   :  { %v3806_v35 = vadd.f32 %v8842_v15, %v8840_v12 }
 0x783   :  { %v8846_v37 = vpop.f32.mrf.mxu2 }
 0x78b   :  { %v3819_v39 = vpop.f32.mrf.mxu2 }
 0x78c   :  { %v3820_v7 = vadd.f32 %v3819_v39, %v3791_v29  ;;  %v3798_v29 = vadd.f32 %v8834_v56, %v3615_v51 }
 0x793   :  { %v3821_v20 = vpop.f32.mrf.mxu2 }
 0x794   :  { %v3822_v24 = vadd.f32 %v3821_v20, %v3793_v49 }
 0x79b   :  { %v3824_v22 = vpop.f32.mrf.mxu2 }
 0x79c   :  { %v3825_v23 = vadd.f32 %v3824_v22, %v3796_v17 }
 0x7a3   :  { %v3826_v4 = vpop.f32.mrf.mxu2 }
 0x7a4   :  { %v3827_v11 = vadd.f32 %v3826_v4, %v3798_v29 }
 0x7ab   :  { %v3829_v34 = vpop.f32.mrf.mxu2 }
 0x7ac   :  { %v3830_v61 = vadd.f32 %v3829_v34, %v3801_v40  ;;  %v3808_v34 = vadd.f32 %v8846_v37, %v8848_v27 }
 0x7b3   :  { %v3831_v30 = vpop.f32.mrf.mxu2 }
 0x7b4   :  { %v3832_v39 = vadd.f32 %v3831_v30, %v3803_v53 }
 0x7bb   :  { %v3834_v16 = vpop.f32.mrf.mxu2 }
 0x7bc   :  { %v3835_v49 = vadd.f32 %v3834_v16, %v3806_v35 }
 0x7c5   :  { %v3848_v46 = vpop.f32.mrf.mxu0 }
 0x7c6   :  { %v3849_v8 = vadd.f32 %v3848_v46, %v3820_v7 }
 0x7c8   :  { %v5652_v42 = vmul.f32 -1.442695, %v3849_v8 }
 0x7ca   :  { %6327 = vpow2.f32 %v5652_v42 }
 0x7cd   :  { %v3850_v54 = vpop.f32.mrf.mxu0 }
 0x7ce   :  { %v3851_v10 = vadd.f32 %v3850_v54, %v3822_v24 }
 0x7d0   :  { %v6328_v50 = vpop.eup %6327  ;;  %v5653_v58 = vmul.f32 -1.442695, %v3851_v10 }
 0x7d1   :  { %v3892_v38 = vadd.f32 1.0, %v6328_v50 }
 0x7d2   :  { %6329 = vpow2.f32 %v5653_v58 }
 0x7d3   :  { %6331 = vrcp.f32 %v3892_v38  ;;  %v3911_v47 = vand.u32 2147483648, %v3892_v38  ;;  %vm3905_vm12 = vweird.f32 %v3892_v38  ;;  %v3909_v2 = vand.u32 2147483647, %v3892_v38 }
 0x7d5   :  { %v3853_v36 = vpop.f32.mrf.mxu0  ;;  %v3912_v55 = vor.u32 1.1754944e-38, %v3911_v47  ;;  %vm3910_vm0 = vcmp.eq.f32.partialorder %v3909_v2, 8.507059e+37 }
 0x7d6   :  { %v8861_v20 = vadd.f32 %v3853_v36, %v3825_v23 }
 0x7d8   :  { %v6330_v62 = vpop.eup %6329  ;;  %v5654_v31 = vmul.f32 -1.442695, %v8861_v20 }
 0x7d9   :  { %v6332_v5 = vpop.eup %6331  ;;  %v3893_v45 = vadd.f32 1.0, %v6330_v62 }
 0x7da   :  { %v3901_v32 = vmul.f32 %v6332_v5, %v3892_v38  ;;  %vm3906_vm3 = vweird.f32 %v6332_v5 }
 0x7db   :  { %6333 = vrcp.f32 %v3893_v45  ;;  %vm3907_vm4 = vmor %vm3905_vm12, %vm3906_vm3  ;;  %v3926_v9 = vand.u32 2147483648, %v3893_v45  ;;  %v3924_v13 = vand.u32 2147483647, %v3893_v45  ;;  %vm3920_vm8 = vweird.f32 %v3893_v45 }
 0x7dc   :  { %v3902_v44 = vsub.f32 1.0, %v3901_v32  ;;  %6335 = vpow2.f32 %v5654_v31 }
 0x7dd   :  { %v3855_v18 = vpop.f32.mrf.mxu0  ;;  %v3927_v63 = vor.u32 1.1754944e-38, %v3926_v9  ;;  %vm3925_vm9 = vcmp.eq.f32.partialorder %v3924_v13, 8.507059e+37 }
 0x7de   :  { %v3903_v0 = vmul.f32 %v6332_v5, %v3902_v44  ;;  %v8867_v46 = vadd.f32 %v3855_v18, %v3827_v11 }
 0x7e0   :  { %v3904_v1 = vadd.f32 %v6332_v5, %v3903_v0  ;;  %v5655_v42 = vmul.f32 -1.442695, %v8867_v46 }
 0x7e1   :  { %v6334_v6 = vpop.eup %6333 }
 0x7e2   :  { %v3916_v43 = vmul.f32 %v6334_v6, %v3893_v45  ;;  %v3908_v3 = vsel %vm3907_vm4, %v6332_v5, %v3904_v1  ;;  %vm3921_vm7 = vweird.f32 %v6334_v6  ;;  %v6336_v54 = vpop.eup %6335 }
 0x7e3   :  { %v3913_v28 = vsel %vm3910_vm0, %v3912_v55, %v3908_v3  ;;  %vm3922_vm1 = vmor %vm3920_vm8, %vm3921_vm7  ;;  %v8880_v36 = vadd.f32 1.0, %v6336_v54 }
 0x7e4   :  { %v3917_v25 = vsub.f32 1.0, %v3916_v43  ;;  %v8853_v57 = vmul.f32 %v3913_v28, %v3849_v8  ;;  %v3836_v8 = vpop.f32.mrf.mxu2 }
 0x7e5   :  { %v3858_v48 = vpop.f32.mrf.mxu0  ;;  %v3837_v15 = vadd.f32 %v3836_v8, %v3808_v34  ;;  %v3939_v28 = vand.u32 2147483647, %v8880_v36  ;;  %vm3935_vm3 = vweird.f32 %v8880_v36 }
 0x7e6   :  { %v3918_v19 = vmul.f32 %v6334_v6, %v3917_v25  ;;  %v8865_v41 = vadd.f32 %v3858_v48, %v3830_v61 }
 0x7e8   :  { %v3919_v33 = vadd.f32 %v6334_v6, %v3918_v19  ;;  %v5656_v56 = vmul.f32 -1.442695, %v8865_v41 }
 0x7ea   :  { %v3923_v14 = vsel %vm3922_vm1, %v6334_v6, %v3919_v33 }
 0x7eb   :  { %v3928_v26 = vsel %vm3925_vm9, %v3927_v63, %v3923_v14 }
 0x7ec   :  { %v8855_v60 = vmul.f32 %v3928_v26, %v3851_v10 }
 0x7ed   :  { %v3860_v59 = vpop.f32.mrf.mxu0 }
 0x7ee   :  { %v4102_v7 = vpack.c.bf16 %v8855_v60, %v8853_v57  ;;  %v8863_v52 = vadd.f32 %v3860_v59, %v3832_v39  ;;  %v6137_v57 = vld [vmem:[%s9207_s9 + $0x30] sm:$0xff]  ;;  %v6136_v60 = vld [vmem:[%s9207_s9 + $0x28] sm:$0xff] }
 0x7f0   :  { %v5657_v22 = vmul.f32 -1.442695, %v8863_v52 }
 0x7f2   :  { %6337 = vpow2.f32 %v5657_v22 }
 0x7f3   :  { %6339 = vpow2.f32 %v5656_v56  ;;  %v6150_v56 = vld [vmem:[%s9207_s9 + $0x98] sm:$0xff] }
 0x7f4   :  { %6341 = vpow2.f32 %v5655_v42 }
 0x7f8   :  { %v6338_v10 = vpop.eup %6337 }
 0x7f9   :  { %v6340_v58 = vpop.eup %6339  ;;  %v8882_v12 = vadd.f32 1.0, %v6338_v10 }
 0x7fa   :  { %v6342_v38 = vpop.eup %6341  ;;  %v8884_v62 = vadd.f32 1.0, %v6340_v58  ;;  %v6159_v58 = vld [vmem:[%s9207_s9 + $0xe0] sm:$0xff] }
 0x7fb   :  { %v3863_v4 = vpop.f32.mrf.mxu2  ;;  %v8886_v5 = vadd.f32 1.0, %v6342_v38  ;;  %vm3980_vm6 = vweird.f32 %v8882_v12  ;;  %v3984_v31 = vand.u32 2147483647, %v8882_v12  ;;  %v3986_v22 = vand.u32 2147483648, %v8882_v12 }
 0x7fc   :  { %v8875_v24 = vadd.f32 %v3863_v4, %v3835_v49  ;;  %vm3965_vm5 = vweird.f32 %v8884_v62  ;;  %v3969_v10 = vand.u32 2147483647, %v8884_v62 }
 0x7fd   :  { %v3954_v63 = vand.u32 2147483647, %v8886_v5  ;;  %v3956_v14 = vand.u32 2147483648, %v8886_v5  ;;  %vm3950_vm13 = vweird.f32 %v8886_v5 }
 0x7fe   :  { %v5658_v50 = vmul.f32 -1.442695, %v8875_v24 }
 0x800   :  { %6343 = vpow2.f32 %v5658_v50  ;;  %v3971_v50 = vand.u32 2147483648, %v8884_v62 }
 0x801   :  { %6345 = vrcp.f32 %v8880_v36 }
 0x802   :  { %6347 = vrcp.f32 %v8882_v12 }
 0x803   :  { %v3865_v45 = vpop.f32.mrf.mxu2  ;;  %6349 = vrcp.f32 %v8884_v62 }
 0x804   :  { %v8889_v32 = vadd.f32 %v3865_v45, %v3837_v15  ;;  %6351 = vrcp.f32 %v8886_v5 }
 0x806   :  { %v6344_v44 = vpop.eup %6343  ;;  %v5659_v37 = vmul.f32 -1.442695, %v8889_v32 }
 0x807   :  { %v8895_v27 = vadd.f32 1.0, %v6344_v44  ;;  %v8898_v18 = vpop.eup %6345  ;;  %v3987_v44 = vor.u32 1.1754944e-38, %v3986_v22  ;;  %v6151_v22 = vld [vmem:[%s9207_s9 + $0xa0] sm:$0xff] }
 0x808   :  { %6353 = vpow2.f32 %v5659_v37  ;;  %v8900_v0 = vpop.eup %6347  ;;  %v3931_v47 = vmul.f32 %v8898_v18, %v8880_v36  ;;  %vm3936_vm2 = vweird.f32 %v8898_v18 }
 0x809   :  { %6355 = vrcp.f32 %v8895_v27  ;;  %v8902_v30 = vpop.eup %6349  ;;  %v3976_v43 = vmul.f32 %v8900_v0, %v8882_v12  ;;  %vm3981_vm14 = vweird.f32 %v8900_v0  ;;  %v4001_v29 = vand.u32 2147483648, %v8895_v27 }
 0x80a   :  { %v8904_v6 = vpop.eup %6351  ;;  %v3961_v2 = vmul.f32 %v8902_v30, %v8884_v62  ;;  %v3932_v13 = vsub.f32 1.0, %v3931_v47  ;;  %vm3966_vm10 = vweird.f32 %v8902_v30  ;;  %vm3995_vm12 = vweird.f32 %v8895_v27  ;;  %vm8950_vm0 = vmor %vm3980_vm6, %vm3981_vm14 }
 0x80b   :  { %v3946_v9 = vmul.f32 %v8904_v6, %v8886_v5  ;;  %v3977_v3 = vsub.f32 1.0, %v3976_v43  ;;  %vm3951_vm15 = vweird.f32 %v8904_v6  ;;  %v3999_v61 = vand.u32 2147483647, %v8895_v27  ;;  %vm8958_vm8 = vmor %vm3965_vm5, %vm3966_vm10 }
 0x80c   :  { %v3962_v55 = vsub.f32 1.0, %v3961_v2  ;;  %v3933_v53 = vmul.f32 %v8898_v18, %v3932_v13  ;;  %v4002_v38 = vor.u32 1.1754944e-38, %v4001_v29  ;;  %vm3985_vm5 = vcmp.eq.f32.partialorder %v3984_v31, 8.507059e+37  ;;  %vm8975_vm6 = vmor %vm3950_vm13, %vm3951_vm15  ;;  %v6154_v29 = vld [vmem:[%s9207_s9 + $0xb8] sm:$0xff]  ;;  %v6139_v31 = vld [vmem:[%s9207_s9 + $0x40] sm:$0xff] }
 0x80d   :  { %v3947_v33 = vsub.f32 1.0, %v3946_v9  ;;  %v3978_v17 = vmul.f32 %v8900_v0, %v3977_v3  ;;  %vm4000_vm1 = vcmp.eq.f32.partialorder %v3999_v61, 8.507059e+37  ;;  %v3941_v43 = vand.u32 2147483648, %v8880_v36  ;;  %vm3937_vm15 = vmor %vm3935_vm3, %vm3936_vm2  ;;  %v6129_v36 = vld [vmem:[%s9206_s4 + $0x10] sm:$0xff] }
 0x80e   :  { %v6354_v1 = vpop.eup %6353  ;;  %v3963_v51 = vmul.f32 %v8902_v30, %v3962_v55  ;;  %v3934_v12 = vadd.f32 %v8898_v18, %v3933_v53  ;;  %vm3970_vm14 = vcmp.eq.f32.partialorder %v3969_v10, 8.507059e+37  ;;  %vm3955_vm13 = vcmp.eq.f32.partialorder %v3954_v63, 8.507059e+37  ;;  %v6130_v63 = vld [vmem:[%s9206_s4 + $0x18] sm:$0xff]  ;;  %v6132_v53 = vld [vmem:[%s9207_s9 + $0x8] sm:$0xff]  ;;  %v6153_v61 = vld [vmem:[%s9207_s9 + $0xb0] sm:$0xff] }
 0x80f   :  { %v6356_v21 = vpop.eup %6355  ;;  %v3899_v25 = vadd.f32 1.0, %v6354_v1  ;;  %v3948_v40 = vmul.f32 %v8904_v6, %v3947_v33  ;;  %v3979_v39 = vadd.f32 %v8900_v0, %v3978_v17  ;;  %v3942_v55 = vor.u32 1.1754944e-38, %v3941_v43  ;;  %v6133_v17 = vld [vmem:[%s9207_s9 + $0x10] sm:$0xff]  ;;  %v6160_v10 = vld [vmem:[%s9207_s9 + $0xe8] sm:$0xff] }
 0x810   :  { %v3991_v48 = vmul.f32 %v6356_v21, %v8895_v27  ;;  %vm3996_vm11 = vweird.f32 %v6356_v21  ;;  %v3964_v8 = vadd.f32 %v8902_v30, %v3963_v51  ;;  %vm4126_vm2 = vcmask 523264   ;;  %v6144_v51 = vld [vmem:[%s9207_s9 + $0x68] sm:$0xff] }
 0x811   :  { %6357 = vrcp.f32 %v3899_v25  ;;  %vm8937_vm4 = vmor %vm3995_vm12, %vm3996_vm11  ;;  %v4016_v42 = vand.u32 2147483648, %v3899_v25  ;;  %v4014_v4 = vand.u32 2147483647, %v3899_v25  ;;  %v3949_v54 = vadd.f32 %v8904_v6, %v3948_v40  ;;  %v6131_v40 = vld [vmem:[%s9207_s9] sm:$0xff] }
 0x812   :  { %v3992_v19 = vsub.f32 1.0, %v3991_v48  ;;  %v3983_v15 = vsel %vm8950_vm0, %v8900_v0, %v3979_v39  ;;  %vm4010_vm9 = vweird.f32 %v3899_v25  ;;  %v3968_v62 = vsel %vm8958_vm8, %v8902_v30, %v3964_v8  ;;  %v6141_v39 = vld [vmem:[%s9207_s9 + $0x50] sm:$0xff]  ;;  %v6152_v8 = vld [vmem:[%s9207_s9 + $0xa8] sm:$0xff] }
 0x813   :  { %v4017_v27 = vor.u32 1.1754944e-38, %v4016_v42  ;;  %vm4015_vm10 = vcmp.eq.f32.partialorder %v4014_v4, 8.507059e+37  ;;  %v3988_v47 = vsel %vm3985_vm5, %v3987_v44, %v3983_v15  ;;  %v3953_v30 = vsel %vm8975_vm6, %v8904_v6, %v3949_v54  ;;  %v6162_v42 = vld [vmem:[%s9207_s9 + $0xf8] sm:$0xff]  ;;  %v6148_v54 = vld [vmem:[%s9207_s9 + $0x88] sm:$0xff] }
 0x814   :  { %v3993_v16 = vmul.f32 %v6356_v21, %v3992_v19  ;;  %v3957_v48 = vor.u32 1.1754944e-38, %v3956_v14  ;;  %v3938_v19 = vsel %vm3937_vm15, %v8898_v18, %v3934_v12  ;;  %v4025_v13 = vmul.f32 %v3988_v47, %v8863_v52  ;;  %v6127_v52 = vld [vmem:[%s9206_s4] sm:$0xff]  ;;  %v6158_v15 = vld [vmem:[%s9207_s9 + $0xd8] sm:$0xff]  ;;  %v6156_v44 = vld [vmem:[%s9207_s9 + $0xc8] sm:$0xff] }
 0x815   :  { %vm3940_vm12 = vcmp.eq.f32.partialorder %v3939_v28, 8.507059e+37  ;;  %v6134_v28 = vld [vmem:[%s9207_s9 + $0x18] sm:$0xff]  ;;  %vm4521_vm5 = vcmask 130048  }
 0x816   :  { %v3994_v23 = vadd.f32 %v6356_v21, %v3993_v16  ;;  %v3958_v33 = vsel %vm3955_vm13, %v3957_v48, %v3953_v30  ;;  %v4175_v48 = vpop.permute.xlu1 %4174 }
 0x817   :  { %v6358_v26 = vpop.eup %6357  ;;  %v4023_v16 = vmul.f32 %v3958_v33, %v8867_v46  ;;  %v6146_v46 = vld [vmem:[%s9207_s9 + $0x78] sm:$0xff] }
 0x818   :  { %v4006_v59 = vmul.f32 %v6358_v26, %v3899_v25  ;;  %v3998_v35 = vsel %vm8937_vm4, %v6356_v21, %v3994_v23  ;;  %vm4011_vm7 = vweird.f32 %v6358_v26  ;;  %v3972_v21 = vor.u32 1.1754944e-38, %v3971_v50  ;;  %4388 = vmatpush.bf16.msra.mxu1 %v6146_v46  ;;  %v6143_v23 = vld [vmem:[%s9207_s9 + $0x60] sm:$0xff] }
 0x819   :  { %v4003_v37 = vsel %vm4000_vm1, %v4002_v38, %v3998_v35  ;;  %vm4012_vm11 = vmor %vm4010_vm9, %vm4011_vm7  ;;  %v6149_v35 = vld [vmem:[%s9207_s9 + $0x90] sm:$0xff]  ;;  %v6147_v50 = vld [vmem:[%s9207_s9 + $0x80] sm:$0xff] }
 0x81a   :  { %v4007_v11 = vsub.f32 1.0, %v4006_v59  ;;  %v4026_v25 = vmul.f32 %v4003_v37, %v8875_v24  ;;  %v3973_v3 = vsel %vm3970_vm14, %v3972_v21, %v3968_v62  ;;  %v6142_v59 = vld [vmem:[%s9207_s9 + $0x58] sm:$0xff]  ;;  %v6155_v37 = vld [vmem:[%s9207_s9 + $0xc0] sm:$0xff] }
 0x81b   :  { %v4024_v24 = vmul.f32 %v3973_v3, %v8865_v41  ;;  %v6128_v41 = vld [vmem:[%s9206_s4 + $0x8] sm:$0xff] }
 0x81c   :  { %v4008_v49 = vmul.f32 %v6358_v26, %v4007_v11  ;;  %v6140_v11 = vld [vmem:[%s9207_s9 + $0x48] sm:$0xff] }
 0x81d   :  { %v4104_v14 = vpack.c.bf16 %v4025_v13, %v4024_v24  ;;  %v4180_v24 = vpop.permute.xlu2 %4179 }
 0x81e   :  { %v4009_v45 = vadd.f32 %v6358_v26, %v4008_v49  ;;  %v6161_v49 = vld [vmem:[%s9207_s9 + $0xf0] sm:$0xff] }
 0x820   :  { %v4013_v1 = vsel %vm4012_vm11, %v6358_v26, %v4009_v45  ;;  %v6145_v26 = vld [vmem:[%s9207_s9 + $0x70] sm:$0xff] }
 0x821   :  { %v4018_v2 = vsel %vm4015_vm10, %v4017_v27, %v4013_v1  ;;  %4389 = vmatpush.bf16.msra.mxu1 %v6145_v26  ;;  %v6157_v45 = vld [vmem:[%s9207_s9 + $0xd0] sm:$0xff] }
 0x822   :  { %v4027_v9 = vmul.f32 %v4018_v2, %v8889_v32  ;;  %v3943_v32 = vsel %vm3940_vm12, %v3942_v55, %v3938_v19 }
 0x823   :  { %v4022_v18 = vmul.f32 %v3943_v32, %v8861_v20  ;;  %v6138_v20 = vld [vmem:[%s9207_s9 + $0x38] sm:$0xff] }
 0x824   :  { %v4105_v6 = vpack.c.bf16 %v4027_v9, %v4026_v25  ;;  %4374 = vmatpush.bf16.msrb.mxu0 %v6138_v20 }
 0x825   :  { %v4103_v5 = vpack.c.bf16 %v4023_v16, %v4022_v18  ;;  %4390 = vmatpush.bf16.msra.mxu1 %v6144_v51  ;;  %v6168_v51 = vld [vmem:[%s9208_s10 + $0x28] sm:$0xff] }
 0x826   :  { %4143 = vmatpush.bf16.msra.mxu2 %v4105_v6 }
 0x828   :  { %4375 = vmatpush.bf16.msrb.mxu0 %v6137_v57 }
 0x829   :  { %4391 = vmatpush.bf16.msra.mxu1 %v6143_v23  ;;  %v6184_v23 = vld [vmem:[%s9208_s10 + $0xa8] sm:$0xff] }
 0x82a   :  { %4144 = vmatpush.bf16.msra.mxu2 %v4104_v14 }
 0x82c   :  { %4376 = vmatpush.bf16.msrb.mxu0 %v6136_v60 }
 0x82d   :  { %4392 = vmatpush.bf16.msra.mxu1 %v6142_v59 }
 0x82e   :  { %4145 = vmatpush.bf16.msra.mxu2 %v4103_v5 }
 0x831   :  { %4393 = vmatpush.bf16.msra.mxu1 %v6141_v39 }
 0x832   :  { %4146 = vmatpush.bf16.msra.mxu2 %v4102_v7  ;;  %v6135_v7 = vld [vmem:[%s9207_s9 + $0x20] sm:$0xff] }
 0x833   :  { %4377 = vmatpush.bf16.msrb.mxu0 %v6135_v7  ;;  %v6170_v7 = vld [vmem:[%s9208_s10 + $0x38] sm:$0xff] }
 0x835   :  { %5676 = vmatmul.msk.bf16.vlgmr.msra.gmra.mxu2 %vm4126_vm2, %v6127_v52  ;;  %4394 = vmatpush.bf16.msra.mxu1 %v6140_v11 }
 0x836   :  { %4402 = vmatpush.bf16.msrb.mxu2 %v6154_v29  ;;  %v6167_v29 = vld [vmem:[%s9208_s10 + $0x20] sm:$0xff] }
 0x837   :  { %4378 = vmatpush.bf16.msrb.mxu0 %v6134_v28  ;;  %v6169_v28 = vld [vmem:[%s9208_s10 + $0x30] sm:$0xff] }
 0x839   :  { %4395 = vmatpush.bf16.msra.mxu1 %v6139_v31 }
 0x83a   :  { %4403 = vmatpush.bf16.msrb.mxu2 %v6153_v61  ;;  %v6183_v61 = vld [vmem:[%s9208_s10 + $0xa0] sm:$0xff] }
 0x83b   :  { %4379 = vmatpush.bf16.msrb.mxu0 %v6133_v17 }
 0x83e   :  { %4404 = vmatpush.bf16.msrb.mxu2 %v6152_v8  ;;  %v6166_v8 = vld [vmem:[%s9208_s10 + $0x18] sm:$0xff] }
 0x83f   :  { %4380 = vmatpush.bf16.msrb.mxu0 %v6132_v53 }
 0x842   :  { %4405 = vmatpush.bf16.msrb.mxu2 %v6151_v22 }
 0x843   :  { %4381 = vmatpush.bf16.msrb.mxu0 %v6131_v40 }
 0x845   :  { %5677 = vmatmul.msk.bf16.gmra.mxu2 %vm4126_vm2, %v6128_v41 }
 0x846   :  { %4406 = vmatpush.bf16.msrb.mxu2 %v6150_v56  ;;  %v6182_v56 = vld [vmem:[%s9208_s10 + $0x98] sm:$0xff] }
 0x847   :  { %4416 = vmatpush.bf16.msra.mxu0 %v6162_v42 }
 0x84a   :  { %4407 = vmatpush.bf16.msrb.mxu2 %v6149_v35 }
 0x84b   :  { %4417 = vmatpush.bf16.msra.mxu0 %v6161_v49 }
 0x84e   :  { %4408 = vmatpush.bf16.msrb.mxu2 %v6148_v54  ;;  %v6165_v54 = vld [vmem:[%s9208_s10 + $0x10] sm:$0xff] }
 0x84f   :  { %4418 = vmatpush.bf16.msra.mxu0 %v6160_v10 }
 0x852   :  { %4409 = vmatpush.bf16.msrb.mxu2 %v6147_v50 }
 0x853   :  { %4419 = vmatpush.bf16.msra.mxu0 %v6159_v58 }
 0x855   :  { %5678 = vmatmul.msk.bf16.gmra.mxu2 %vm4126_vm2, %v6129_v36  ;;  %v6186_v36 = vld [vmem:[%s9208_s10 + $0xb8] sm:$0xff] }
 0x856   :  { %4696 = vmatpush.bf16.msra.mxu2 %v6170_v7 }
 0x857   :  { %4420 = vmatpush.bf16.msra.mxu0 %v6158_v15 }
 0x85a   :  { %4697 = vmatpush.bf16.msra.mxu2 %v6169_v28 }
 0x85b   :  { %4421 = vmatpush.bf16.msra.mxu0 %v6157_v45 }
 0x85e   :  { %4698 = vmatpush.bf16.msra.mxu2 %v6168_v51 }
 0x85f   :  { %4422 = vmatpush.bf16.msra.mxu0 %v6156_v44 }
 0x862   :  { %4699 = vmatpush.bf16.msra.mxu2 %v6167_v29 }
 0x863   :  { %4423 = vmatpush.bf16.msra.mxu0 %v6155_v37 }
 0x865   :  { %5679 = vmatmul.msk.bf16.gmra.mxu2 %vm4126_vm2, %v6130_v63  ;;  %v6185_v63 = vld [vmem:[%s9208_s10 + $0xb0] sm:$0xff] }
 0x866   :  { %4700 = vmatpush.bf16.msra.mxu2 %v6166_v8 }
 0x86a   :  { %4701 = vmatpush.bf16.msra.mxu2 %v6165_v54 }
 0x8b8   :  { %v4148_v4 = vpop.f32.mrf.mxu2 }
 0x8c0   :  { %v4150_v38 = vpop.f32.mrf.mxu2 }
 0x8c1   :  { %v4168_v34 = vpack.c.bf16 %v4150_v38, %v4148_v4 }
 0x8c3   :  { %4382 = vmatmul.bf16.vlgmr.msrb.gmra.mxu0 %v4168_v34 }
 0x8c4   :  { %4722 = vmatpush.bf16.msrb.mxu0 %v6186_v36 }
 0x8c8   :  { %v4153_v12 = vpop.f32.mrf.mxu2  ;;  %4723 = vmatpush.bf16.msrb.mxu0 %v6185_v63 }
 0x8cc   :  { %4724 = vmatpush.bf16.msrb.mxu0 %v6184_v23 }
 0x8d0   :  { %v4155_v27 = vpop.f32.mrf.mxu2  ;;  %4725 = vmatpush.bf16.msrb.mxu0 %v6183_v61 }
 0x8d1   :  { %v4169_v62 = vpack.c.bf16 %v4155_v27, %v4153_v12  ;;  %v6164_v12 = vld [vmem:[%s9208_s10 + $0x8] sm:$0xff] }
 0x8d2   :  { %4702 = vmatpush.bf16.msra.mxu2 %v6164_v12 }
 0x8d3   :  { %4396 = vmatmul.bf16.vlgmr.msra.gmra.mxu1 %v4169_v62 }
 0x8d4   :  { %4726 = vmatpush.bf16.msrb.mxu0 %v6182_v56 }
 0x8d8   :  { %v4158_v1 = vpop.f32.mrf.mxu2 }
 0x8e0   :  { %v4160_v43 = vpop.f32.mrf.mxu2 }
 0x8e1   :  { %v4170_v0 = vpack.c.bf16 %v4160_v43, %v4158_v1  ;;  %v6178_v1 = vld [vmem:[%s9208_s10 + $0x78] sm:$0xff] }
 0x8e3   :  { %4410 = vmatmul.bf16.vlgmr.msrb.gmra.mxu2 %v4170_v0  ;;  %v4470_v0 = vld [vmem:[%s9209_s5] sm:$0x3] }
 0x8e8   :  { %v4163_v21 = vpop.f32.mrf.mxu2 }
 0x8f0   :  { %v4165_v47 = vpop.f32.mrf.mxu2 }
 0x8f1   :  { %v4171_v2 = vpack.c.bf16 %v4165_v47, %v4163_v21  ;;  %v6177_v21 = vld [vmem:[%s9208_s10 + $0x70] sm:$0xff]  ;;  %v6176_v47 = vld [vmem:[%s9208_s10 + $0x68] sm:$0xff] }
 0x8f3   :  { %4424 = vmatmul.bf16.vlgmr.msra.gmra.mxu0 %v4171_v2  ;;  %v6175_v2 = vld [vmem:[%s9208_s10 + $0x60] sm:$0xff] }
 0x940   :  { %v4383_v30 = vpop.f32.mrf.mxu0 }
 0x941   :  { %v4384_v19 = vadd.f32 %v4383_v30, %v4175_v48  ;;  %v6174_v30 = vld [vmem:[%s9208_s10 + $0x58] sm:$0xff]  ;;  %v6172_v48 = vld [vmem:[%s9208_s10 + $0x48] sm:$0xff] }
 0x948   :  { %v4385_v25 = vpop.f32.mrf.mxu0 }
 0x949   :  { %v4386_v16 = vadd.f32 %v4385_v25, %v4180_v24  ;;  %v6173_v25 = vld [vmem:[%s9208_s10 + $0x50] sm:$0xff] }
 0x950   :  { %v4397_v9 = vpop.f32.mrf.mxu1 }
 0x951   :  { %v4398_v13 = vadd.f32 %v4397_v9, %v4384_v19  ;;  %v6181_v9 = vld [vmem:[%s9208_s10 + $0x90] sm:$0xff]  ;;  %v6163_v19 = vld [vmem:[%s9208_s10] sm:$0xff] }
 0x952   :  { %4727 = vmatpush.bf16.msrb.mxu0 %v6181_v9  ;;  %4703 = vmatpush.bf16.msra.mxu2 %v6163_v19 }
 0x958   :  { %v4399_v32 = vpop.f32.mrf.mxu1 }
 0x959   :  { %v4400_v5 = vadd.f32 %v4399_v32, %v4386_v16 }
 0x966   :  { %v4411_v3 = vpop.f32.mrf.mxu2 }
 0x967   :  { %v4412_v6 = vadd.f32 %v4411_v3, %v4398_v13  ;;  %v6180_v3 = vld [vmem:[%s9208_s10 + $0x88] sm:$0xff]  ;;  %v6171_v13 = vld [vmem:[%s9208_s10 + $0x40] sm:$0xff] }
 0x968   :  { %4728 = vmatpush.bf16.msrb.mxu0 %v6180_v3 }
 0x96e   :  { %v4413_v18 = vpop.f32.mrf.mxu2 }
 0x96f   :  { %v4414_v52 = vadd.f32 %v4413_v18, %v4400_v5  ;;  %v4549_v5 = vpop.permute.xlu0 %4548 }
 0x970   :  { %v4425_v55 = vpop.f32.mrf.mxu0 }
 0x971   :  { %v9112_v33 = vadd.f32 %v4425_v55, %v4412_v6  ;;  %v6179_v6 = vld [vmem:[%s9208_s10 + $0x80] sm:$0xff] }
 0x972   :  { %4729 = vmatpush.bf16.msrb.mxu0 %v6179_v6 }
 0x973   :  { %v5808_v14 = vmul.f32 -1.442695, %v9112_v33 }
 0x975   :  { %6359 = vpow2.f32 %v5808_v14 }
 0x978   :  { %v4427_v41 = vpop.f32.mrf.mxu0 }
 0x979   :  { %v4428_v20 = vadd.f32 %v4427_v41, %v4414_v52 }
 0x97b   :  { %v6360_v46 = vpop.eup %6359  ;;  %v5809_v57 = vmul.f32 -1.442695, %v4428_v20 }
 0x97c   :  { %v4436_v60 = vadd.f32 1.0, %v6360_v46 }
 0x97d   :  { %6361 = vpow2.f32 %v5809_v57 }
 0x97e   :  { %6363 = vrcp.f32 %v4436_v60  ;;  %v4449_v42 = vand.u32 2147483648, %v4436_v60  ;;  %vm4443_vm4 = vweird.f32 %v4436_v60  ;;  %v4447_v35 = vand.u32 2147483647, %v4436_v60 }
 0x980   :  { %v4450_v38 = vor.u32 1.1754944e-38, %v4449_v42  ;;  %vm4448_vm8 = vcmp.eq.f32.partialorder %v4447_v35, 8.507059e+37 }
 0x983   :  { %v6362_v17 = vpop.eup %6361 }
 0x984   :  { %v6364_v26 = vpop.eup %6363  ;;  %v4437_v53 = vadd.f32 1.0, %v6362_v17 }
 0x985   :  { %v4439_v40 = vmul.f32 %v6364_v26, %v4436_v60  ;;  %vm4444_vm3 = vweird.f32 %v6364_v26 }
 0x986   :  { %6365 = vrcp.f32 %v4437_v53  ;;  %vm4445_vm7 = vmor %vm4443_vm4, %vm4444_vm3  ;;  %v4464_v4 = vand.u32 2147483648, %v4437_v53  ;;  %v4462_v58 = vand.u32 2147483647, %v4437_v53  ;;  %vm4458_vm1 = vweird.f32 %v4437_v53 }
 0x987   :  { %v4440_v59 = vsub.f32 1.0, %v4439_v40 }
 0x988   :  { %v4465_v45 = vor.u32 1.1754944e-38, %v4464_v4  ;;  %vm4463_vm11 = vcmp.eq.f32.partialorder %v4462_v58, 8.507059e+37 }
 0x989   :  { %v4441_v39 = vmul.f32 %v6364_v26, %v4440_v59 }
 0x98b   :  { %v4442_v31 = vadd.f32 %v6364_v26, %v4441_v39 }
 0x98c   :  { %v6366_v11 = vpop.eup %6365 }
 0x98d   :  { %v4454_v22 = vmul.f32 %v6366_v11, %v4437_v53  ;;  %v4446_v10 = vsel %vm4445_vm7, %v6364_v26, %v4442_v31  ;;  %vm4459_vm0 = vweird.f32 %v6366_v11 }
 0x98e   :  { %v4451_v15 = vsel %vm4448_vm8, %v4450_v38, %v4446_v10  ;;  %vm4460_vm9 = vmor %vm4458_vm1, %vm4459_vm0 }
 0x98f   :  { %v4455_v49 = vsub.f32 1.0, %v4454_v22  ;;  %v4468_v27 = vmul.f32 %v4451_v15, %v9112_v33 }
 0x991   :  { %v4456_v50 = vmul.f32 %v6366_v11, %v4455_v49 }
 0x993   :  { %v4457_v34 = vadd.f32 %v6366_v11, %v4456_v50 }
 0x995   :  { %v4461_v44 = vsel %vm4460_vm9, %v6366_v11, %v4457_v34 }
 0x996   :  { %v4466_v37 = vsel %vm4463_vm11, %v4465_v45, %v4461_v44 }
 0x997   :  { %v4469_v62 = vmul.f32 %v4466_v37, %v4428_v20  ;;  %v4551_v20 = vperm.slane %v4549_v5, 0 }
 0x999   :  { %v4520_v43 = vpack.c.bf16 %v4469_v62, %v4468_v27 }
 0x99b   :  { %4532 = vmatpush.bf16.msrb.mxu1 %v4520_v43 }
 0x99e   :  { %5810 = vmatmul.msk.bf16.vlgmr.msrb.gmra.mxu1 %vm4521_vm5, %v4470_v0 }
 0x99f   :  { %4709 = vmatpush.bf16.msra.mxu1 %v6178_v1 }
 0x9a3   :  { %4710 = vmatpush.bf16.msra.mxu1 %v6177_v21 }
 0x9a7   :  { %4711 = vmatpush.bf16.msra.mxu1 %v6176_v47 }
 0x9ab   :  { %4712 = vmatpush.bf16.msra.mxu1 %v6175_v2 }
 0x9af   :  { %4713 = vmatpush.bf16.msra.mxu1 %v6174_v30 }
 0x9b3   :  { %4714 = vmatpush.bf16.msra.mxu1 %v6173_v25 }
 0x9b7   :  { %4715 = vmatpush.bf16.msra.mxu1 %v6172_v48 }
 0x9bb   :  { %4716 = vmatpush.bf16.msra.mxu1 %v6171_v13 }
 0xa1b   :  { %v4534_v55 = vpop.f32.mrf.mxu1 }
 0xa1c   :  { %v4539_v33 = vrot.slane %v4534_v55, 1  ;;  %v4541_v24 = vrot.slane %v4534_v55, 2  ;;  %v4543_v32 = vpack.c.bf16 %v4534_v55, %v4534_v55 }
 0xa1e   :  { %v4544_v16 = vpack.c.bf16 %v4539_v33, %v4539_v33  ;;  %v4545_v14 = vpack.c.bf16 %v4541_v24, %v4541_v24  ;;  %4704 = vmatmul.bf16.vlgmr.msra.gmra.mxu2 %v4543_v32 }
 0xa20   :  { %4717 = vmatmul.bf16.vlgmr.msra.gmra.mxu1 %v4544_v16  ;;  %4730 = vmatmul.bf16.vlgmr.msrb.gmra.mxu0 %v4545_v14 }
 0xa23   :  { %v4536_v18 = vpop.f32.mrf.mxu1 }
 0xa9d   :  { %v4718_v52 = vpop.f32.mrf.mxu1  ;;  %v4731_v41 = vpop.f32.mrf.mxu0 }
 0xaa1   :  { %v4705_v46 = vpop.f32.mrf.mxu2 }
 0xaa2   :  { %v4706_v57 = vadd.f32 %v4705_v46, %v4551_v20 }
 0xaa4   :  { %v4719_v60 = vadd.f32 %v4718_v52, %v4706_v57 }
 0xaa5   :  { %v4720_v7 = vpop.f32.mrf.mxu1  ;;  %v4733_v36 = vpop.f32.mrf.mxu0 }
 0xaa6   :  { %v4732_v28 = vadd.f32 %v4731_v41, %v4719_v60 }
 0xaa8   :  { %4735 = vst [vmem:[%s9210_s16] sm:$0x1] %v4732_v28 }
 0xaa9   :  { %v4707_v63 = vpop.f32.mrf.mxu2 }

</bundles_post_ra>
